<compile_context>
chip_gen: v7x
topology: tpu7x:2x2x1
jax: 0.10.0
libtpu: 0.0.40
codegen_flags: <defaults>
</compile_context>

<pallas_src>
import functools

import jax
import jax.numpy as jnp
from jax.experimental import pallas as pl
from jax.experimental.pallas import tpu as pltpu


def _round_up(n, m):
    return ((n + m - 1) // m) * m


# ----------------------------------------------------------------------------
# Fused kernel: ReLU(Conv2(ReLU(Conv1(x)))) + x for one batch element
# ----------------------------------------------------------------------------
def _rcu_kernel(x_ref, w1_ref, b1_ref, w2_ref, b2_ref, o_ref, h_ref,
                *, kh, kw, H, W, Wp):
    """
    x_ref : (Rtot, C) bf16   flattened, spatially zero-padded input frame (+ tail slack rows)
    w*_ref: (kh*kw, C, C) bf16  per-tap weights (HWIO, taps flattened row-major)
    b*_ref: (1, C) f32
    o_ref : (M, C) f32       M = H*Wp accumulation-domain rows (wrap columns are garbage)
    h_ref : (Rtot, C) bf16   VMEM scratch: zero-padded Conv1 activation (never hits HBM)
    """
    C = o_ref.shape[-1]
    M = H * Wp                                  # rows of the accumulation domain
    base = (kh // 2) * Wp + (kw // 2)           # flat offset of pixel (0,0) inside the padded frame

    def conv(frame_ref, w_ref, b_ref):
        # Output position P = i*Wp + j; tap (di,dj) reads frame row P + di*Wp + dj.
        # Static flat offsets -> layout-friendly slices, no 2-D window relayout copies.
        acc = jnp.zeros((M, C), jnp.float32)
        for di in range(kh):                    # unrolled static tap loop (kh*kw MXU matmuls)
            for dj in range(kw):
                off = di * Wp + dj
                acc = acc + jnp.dot(frame_ref[pl.ds(off, M), :],
                                    w_ref[di * kw + dj],
                                    preferred_element_type=jnp.float32)
        return jnp.maximum(acc + b_ref[...], 0.0)          # bias + ReLU

    # Rows whose in-row column index is >= W are "wrap" garbage -> must be zeroed before
    # they become Conv2's horizontal padding border.
    row = jax.lax.broadcasted_iota(jnp.int32, (M, C), 0)
    valid = (row % Wp) < W

    # ---- Conv1 + ReLU -> zero-padded bf16 frame kept entirely in VMEM ----
    h1 = jnp.where(valid, conv(x_ref, w1_ref, b1_ref), 0.0)
    h_ref[...] = jnp.zeros_like(h_ref)                      # zero top/bottom border + tail rows
    h_ref[pl.ds(base, M), :] = h1.astype(h_ref.dtype)

    # ---- Conv2 + ReLU + residual (reuse already-resident bf16 input block) ----
    y = conv(h_ref, w2_ref, b2_ref)
    y = y + x_ref[pl.ds(base, M), :].astype(jnp.float32)
    o_ref[...] = y.astype(o_ref.dtype)


# ----------------------------------------------------------------------------
# Wrapper: NCHW in/out, one fused pallas_call over the batch
# ----------------------------------------------------------------------------
def residual_conv_unit_forward(params, x_nchw):
    w1, b1 = params["conv1"]["w"], params["conv1"]["b"]     # (kh,kw,C,C) HWIO, (C,)
    w2, b2 = params["conv2"]["w"], params["conv2"]["b"]
    kh, kw = int(w1.shape[0]), int(w1.shape[1])
    ph, pw = kh // 2, kw // 2

    B, C, H, W = x_nchw.shape
    Hp, Wp = H + 2 * ph, W + 2 * pw
    M = H * Wp                                               # rows the kernel writes per image
    Rtot = _round_up(Hp * Wp + (kw - 1), 8)                  # frame rows + tap over-read slack

    # NCHW -> NHWC, pad spatially once, flatten (Hp,Wp)->rows, cast to bf16.
    x = jnp.transpose(x_nchw, (0, 2, 3, 1)).astype(jnp.float32)
    xf = jnp.pad(x, ((0, 0), (ph, ph), (pw, pw), (0, 0))).reshape(B, Hp * Wp, C)
    xf = jnp.pad(xf, ((0, 0), (0, Rtot - Hp * Wp), (0, 0))).astype(jnp.bfloat16)

    wf1 = w1.reshape(kh * kw, C, C).astype(jnp.bfloat16)
    wf2 = w2.reshape(kh * kw, C, C).astype(jnp.bfloat16)
    b1r = b1.reshape(1, C).astype(jnp.float32)
    b2r = b2.reshape(1, C).astype(jnp.float32)

    # VMEM budget: double-buffered in/out blocks + resident weights/biases + scratch + slack.
    need = (2 * (Rtot * C * 2 + M * C * 4)
            + 2 * (2 * kh * kw * C * C * 2 + 2 * C * 4)
            + Rtot * C * 2 + (4 << 20))
    try:  # chip-aware cap: 64 MiB/TC on v7x, 128 MiB on v5e/v6e
        cap = int(pltpu.get_tpu_info().vmem_capacity_bytes)
    except Exception:
        cap = 64 << 20
    vmem_limit = int(min(max(need, 16 << 20), cap * 3 // 4))
    # TODO(synk): for large H*W*C (need > budget, esp. v7x 64 MiB VMEM) or B==1 on v7x, add a
    # row-tile grid axis with a (kh-1)-row halo instead of whole-image-per-batch blocks.

    out_flat = pl.pallas_call(
        functools.partial(_rcu_kernel, kh=kh, kw=kw, H=H, W=W, Wp=Wp),
        out_shape=jax.ShapeDtypeStruct((B, M, C), jnp.float32),
        grid=(B,),
        in_specs=[
            pl.BlockSpec((None, Rtot, C), lambda b: (b, 0, 0)),      # x (batch dim squeezed)
            pl.BlockSpec((kh * kw, C, C), lambda b: (0, 0, 0)),      # w1 (grid-invariant)
            pl.BlockSpec((1, C), lambda b: (0, 0)),                  # b1
            pl.BlockSpec((kh * kw, C, C), lambda b: (0, 0, 0)),      # w2
            pl.BlockSpec((1, C), lambda b: (0, 0)),                  # b2
        ],
        out_specs=pl.BlockSpec((None, M, C), lambda b: (b, 0, 0)),
        scratch_shapes=[pltpu.VMEM((Rtot, C), jnp.bfloat16)],        # Conv1 activation frame
        compiler_params=pltpu.CompilerParams(
            dimension_semantics=("parallel",),
            vmem_limit_bytes=vmem_limit),
    )(xf, wf1, b1r, wf2, b2r)

    # Drop wrap columns; XLA fuses this slice with the NCHW transpose (single epilogue pass).
    out = out_flat.reshape(B, H, Wp, C)[:, :, :W, :]
    return jnp.transpose(out, (0, 3, 1, 2))


# ----------------------------------------------------------------------------
# Deterministic parameter init (synthetic weights, HWIO layout)
# ----------------------------------------------------------------------------
def init_residual_conv_unit(key, features, kernel_size):
    k1, k2, k3, k4 = jax.random.split(key, 4)
    fan_in = kernel_size * kernel_size * features

    def conv(kw_key, kb_key):
        w = jax.random.normal(kw_key, (kernel_size, kernel_size, features, features),
                              jnp.float32) / jnp.sqrt(float(fan_in))
        b = jax.random.normal(kb_key, (features,), jnp.float32) * 0.01
        return {"w": w, "b": b}

    return {"conv1": conv(k1, k2), "conv2": conv(k3, k4)}


# ----------------------------------------------------------------------------
# Pure-JAX reference for validation
# ----------------------------------------------------------------------------
def _reference(params, x_nchw):
    x = jnp.transpose(x_nchw, (0, 2, 3, 1)).astype(jnp.float32)

    def conv(v, w, b):
        y = jax.lax.conv_general_dilated(
            v, w, window_strides=(1, 1), padding="SAME",
            dimension_numbers=("NHWC", "HWIO", "NHWC"))
        return y + b[None, None, None, :]

    h = jax.nn.relu(conv(x, params["conv1"]["w"], params["conv1"]["b"]))
    h = jax.nn.relu(conv(h, params["conv2"]["w"], params["conv2"]["b"]))
    return jnp.transpose(h + x, (0, 3, 1, 2))


# ----------------------------------------------------------------------------
if __name__ == "__main__":
    key = jax.random.PRNGKey(0)

    B, features, H, W = 2, 32, 16, 16
    kernel_size = 3

    k_params, k_x = jax.random.split(key)
    params = init_residual_conv_unit(k_params, features, kernel_size)
    x = jax.random.normal(k_x, (B, features, H, W), jnp.float32)

    forward = jax.jit(residual_conv_unit_forward)
    out = jax.block_until_ready(forward(params, x))

    assert out.shape == (B, features, H, W), out.shape
    assert bool(jnp.all(jnp.isfinite(out)))

    ref = jax.block_until_ready(_reference(params, x))
    max_err = float(jnp.max(jnp.abs(out - ref)))
    assert max_err < 1e-1, f"max abs err {max_err}"   # loose tol: bf16 matmul/residual inputs

    print("KERNEL_OK")
</pallas_src>

<mosaic_0001>
module attributes {stable_mosaic.version = 11 : i64} {
  func.func @_rcu_kernel(%arg0: i32, %arg1: memref<1x328x32xbf16, #tpu.memory_space<vmem>>, %arg2: memref<9x32x32xbf16, #tpu.memory_space<vmem>>, %arg3: memref<1x32xf32, #tpu.memory_space<vmem>>, %arg4: memref<9x32x32xbf16, #tpu.memory_space<vmem>>, %arg5: memref<1x32xf32, #tpu.memory_space<vmem>>, %arg6: memref<1x288x32xf32, #tpu.memory_space<vmem>>, %arg7: memref<328x32xbf16, #tpu.memory_space<vmem>>) attributes {dimension_semantics = [#tpu.dimension_semantics<parallel>], iteration_bounds = array<i64: 2>, scalar_prefetch = 0 : i64, scratch_operands = 1 : i64, tpu.core_type = #tpu.core_type<tc>, window_params = [{transform_indices = @transform_0, window_bounds = array<i64: 1, 328, 32>}, {pipeline_mode = #tpu.pipeline_mode<synchronous>, transform_indices = @transform_1, window_bounds = array<i64: 9, 32, 32>}, {pipeline_mode = #tpu.pipeline_mode<synchronous>, transform_indices = @transform_2, window_bounds = array<i64: 1, 32>}, {pipeline_mode = #tpu.pipeline_mode<synchronous>, transform_indices = @transform_3, window_bounds = array<i64: 9, 32, 32>}, {pipeline_mode = #tpu.pipeline_mode<synchronous>, transform_indices = @transform_4, window_bounds = array<i64: 1, 32>}, {transform_indices = @transform_5, window_bounds = array<i64: 1, 288, 32>}]} {
    %0 = tpu.iota {dimensions = array<i32: 0>} : vector<288x32xi32>
    %c18_i32 = arith.constant 18 : i32
    %c0_i32 = arith.constant 0 : i32
    %1 = arith.cmpi eq, %c18_i32, %c0_i32 : i32
    %c1_i32 = arith.constant 1 : i32
    %2 = arith.select %1, %c1_i32, %c18_i32 : i32
    %3 = vector.broadcast %2 : i32 to vector<288x32xi32>
    %4 = arith.remsi %0, %3 : vector<288x32xi32>
    %c0_i32_0 = arith.constant 0 : i32
    %5 = vector.broadcast %c0_i32_0 : i32 to vector<288x32xi32>
    %6 = arith.cmpi ne, %4, %5 : vector<288x32xi32>
    %c0_i32_1 = arith.constant 0 : i32
    %7 = vector.broadcast %c0_i32_1 : i32 to vector<288x32xi32>
    %8 = arith.cmpi slt, %4, %7 : vector<288x32xi32>
    %c0_i32_2 = arith.constant 0 : i32
    %9 = arith.cmpi slt, %2, %c0_i32_2 : i32
    %10 = vector.broadcast %9 : i1 to vector<288x32xi1>
    %11 = vector.broadcast %10 : vector<288x32xi1> to vector<288x32xi1>
    %12 = arith.xori %8, %11 : vector<288x32xi1>
    %13 = arith.andi %12, %6 : vector<288x32xi1>
    %14 = vector.broadcast %2 : i32 to vector<288x32xi32>
    %15 = arith.addi %4, %14 : vector<288x32xi32>
    %16 = arith.select %13, %15, %4 : vector<288x32xi1>, vector<288x32xi32>
    %c16_i32 = arith.constant 16 : i32
    %17 = vector.broadcast %c16_i32 : i32 to vector<288x32xi32>
    %18 = arith.cmpi slt, %16, %17 : vector<288x32xi32>
    %cst = arith.constant 0.000000e+00 : f32
    %19 = vector.broadcast %cst : f32 to vector<288x32xf32>
    %c0 = arith.constant 0 : index
    %c0_3 = arith.constant 0 : index
    %c0_4 = arith.constant 0 : index
    %20 = vector.load %arg1[%c0, %c0_3, %c0_4] : memref<1x328x32xbf16, #tpu.memory_space<vmem>>, vector<1x288x32xbf16>
    %21 = vector.shape_cast %20 : vector<1x288x32xbf16> to vector<288x32xbf16>
    %c0_5 = arith.constant 0 : index
    %c0_6 = arith.constant 0 : index
    %c0_7 = arith.constant 0 : index
    %22 = vector.load %arg2[%c0_5, %c0_6, %c0_7] : memref<9x32x32xbf16, #tpu.memory_space<vmem>>, vector<1x32x32xbf16>
    %23 = vector.shape_cast %22 : vector<1x32x32xbf16> to vector<32x32xbf16>
    %cst_8 = arith.constant dense<0.000000e+00> : vector<288x32xf32>
    %24 = tpu.matmul %21, %23, %cst_8 {dimension_numbers = #tpu.dot_dimension_numbers<[1], [0], [0], [1], [0, 0, 1, 1], [], []>} : vector<288x32xbf16>, vector<32x32xbf16>, vector<288x32xf32> -> vector<288x32xf32>
    %25 = arith.addf %19, %24 : vector<288x32xf32>
    %c0_9 = arith.constant 0 : index
    %c1 = arith.constant 1 : index
    %c0_10 = arith.constant 0 : index
    %26 = vector.load %arg1[%c0_9, %c1, %c0_10] : memref<1x328x32xbf16, #tpu.memory_space<vmem>>, vector<1x288x32xbf16>
    %27 = vector.shape_cast %26 : vector<1x288x32xbf16> to vector<288x32xbf16>
    %c1_11 = arith.constant 1 : index
    %c0_12 = arith.constant 0 : index
    %c0_13 = arith.constant 0 : index
    %28 = vector.load %arg2[%c1_11, %c0_12, %c0_13] : memref<9x32x32xbf16, #tpu.memory_space<vmem>>, vector<1x32x32xbf16>
    %29 = vector.shape_cast %28 : vector<1x32x32xbf16> to vector<32x32xbf16>
    %cst_14 = arith.constant dense<0.000000e+00> : vector<288x32xf32>
    %30 = tpu.matmul %27, %29, %cst_14 {dimension_numbers = #tpu.dot_dimension_numbers<[1], [0], [0], [1], [0, 0, 1, 1], [], []>} : vector<288x32xbf16>, vector<32x32xbf16>, vector<288x32xf32> -> vector<288x32xf32>
    %31 = arith.addf %25, %30 : vector<288x32xf32>
    %c0_15 = arith.constant 0 : index
    %c2 = arith.constant 2 : index
    %c0_16 = arith.constant 0 : index
    %32 = vector.load %arg1[%c0_15, %c2, %c0_16] : memref<1x328x32xbf16, #tpu.memory_space<vmem>>, vector<1x288x32xbf16>
    %33 = vector.shape_cast %32 : vector<1x288x32xbf16> to vector<288x32xbf16>
    %c2_17 = arith.constant 2 : index
    %c0_18 = arith.constant 0 : index
    %c0_19 = arith.constant 0 : index
    %34 = vector.load %arg2[%c2_17, %c0_18, %c0_19] : memref<9x32x32xbf16, #tpu.memory_space<vmem>>, vector<1x32x32xbf16>
    %35 = vector.shape_cast %34 : vector<1x32x32xbf16> to vector<32x32xbf16>
    %cst_20 = arith.constant dense<0.000000e+00> : vector<288x32xf32>
    %36 = tpu.matmul %33, %35, %cst_20 {dimension_numbers = #tpu.dot_dimension_numbers<[1], [0], [0], [1], [0, 0, 1, 1], [], []>} : vector<288x32xbf16>, vector<32x32xbf16>, vector<288x32xf32> -> vector<288x32xf32>
    %37 = arith.addf %31, %36 : vector<288x32xf32>
    %c0_21 = arith.constant 0 : index
    %c18 = arith.constant 18 : index
    %c0_22 = arith.constant 0 : index
    %38 = vector.load %arg1[%c0_21, %c18, %c0_22] : memref<1x328x32xbf16, #tpu.memory_space<vmem>>, vector<1x288x32xbf16>
    %39 = vector.shape_cast %38 : vector<1x288x32xbf16> to vector<288x32xbf16>
    %c3 = arith.constant 3 : index
    %c0_23 = arith.constant 0 : index
    %c0_24 = arith.constant 0 : index
    %40 = vector.load %arg2[%c3, %c0_23, %c0_24] : memref<9x32x32xbf16, #tpu.memory_space<vmem>>, vector<1x32x32xbf16>
    %41 = vector.shape_cast %40 : vector<1x32x32xbf16> to vector<32x32xbf16>
    %cst_25 = arith.constant dense<0.000000e+00> : vector<288x32xf32>
    %42 = tpu.matmul %39, %41, %cst_25 {dimension_numbers = #tpu.dot_dimension_numbers<[1], [0], [0], [1], [0, 0, 1, 1], [], []>} : vector<288x32xbf16>, vector<32x32xbf16>, vector<288x32xf32> -> vector<288x32xf32>
    %43 = arith.addf %37, %42 : vector<288x32xf32>
    %c0_26 = arith.constant 0 : index
    %c19 = arith.constant 19 : index
    %c0_27 = arith.constant 0 : index
    %44 = vector.load %arg1[%c0_26, %c19, %c0_27] : memref<1x328x32xbf16, #tpu.memory_space<vmem>>, vector<1x288x32xbf16>
    %45 = vector.shape_cast %44 : vector<1x288x32xbf16> to vector<288x32xbf16>
    %c4 = arith.constant 4 : index
    %c0_28 = arith.constant 0 : index
    %c0_29 = arith.constant 0 : index
    %46 = vector.load %arg2[%c4, %c0_28, %c0_29] : memref<9x32x32xbf16, #tpu.memory_space<vmem>>, vector<1x32x32xbf16>
    %47 = vector.shape_cast %46 : vector<1x32x32xbf16> to vector<32x32xbf16>
    %cst_30 = arith.constant dense<0.000000e+00> : vector<288x32xf32>
    %48 = tpu.matmul %45, %47, %cst_30 {dimension_numbers = #tpu.dot_dimension_numbers<[1], [0], [0], [1], [0, 0, 1, 1], [], []>} : vector<288x32xbf16>, vector<32x32xbf16>, vector<288x32xf32> -> vector<288x32xf32>
    %49 = arith.addf %43, %48 : vector<288x32xf32>
    %c0_31 = arith.constant 0 : index
    %c20 = arith.constant 20 : index
    %c0_32 = arith.constant 0 : index
    %50 = vector.load %arg1[%c0_31, %c20, %c0_32] : memref<1x328x32xbf16, #tpu.memory_space<vmem>>, vector<1x288x32xbf16>
    %51 = vector.shape_cast %50 : vector<1x288x32xbf16> to vector<288x32xbf16>
    %c5 = arith.constant 5 : index
    %c0_33 = arith.constant 0 : index
    %c0_34 = arith.constant 0 : index
    %52 = vector.load %arg2[%c5, %c0_33, %c0_34] : memref<9x32x32xbf16, #tpu.memory_space<vmem>>, vector<1x32x32xbf16>
    %53 = vector.shape_cast %52 : vector<1x32x32xbf16> to vector<32x32xbf16>
    %cst_35 = arith.constant dense<0.000000e+00> : vector<288x32xf32>
    %54 = tpu.matmul %51, %53, %cst_35 {dimension_numbers = #tpu.dot_dimension_numbers<[1], [0], [0], [1], [0, 0, 1, 1], [], []>} : vector<288x32xbf16>, vector<32x32xbf16>, vector<288x32xf32> -> vector<288x32xf32>
    %55 = arith.addf %49, %54 : vector<288x32xf32>
    %c0_36 = arith.constant 0 : index
    %c36 = arith.constant 36 : index
    %c0_37 = arith.constant 0 : index
    %56 = vector.load %arg1[%c0_36, %c36, %c0_37] : memref<1x328x32xbf16, #tpu.memory_space<vmem>>, vector<1x288x32xbf16>
    %57 = vector.shape_cast %56 : vector<1x288x32xbf16> to vector<288x32xbf16>
    %c6 = arith.constant 6 : index
    %c0_38 = arith.constant 0 : index
    %c0_39 = arith.constant 0 : index
    %58 = vector.load %arg2[%c6, %c0_38, %c0_39] : memref<9x32x32xbf16, #tpu.memory_space<vmem>>, vector<1x32x32xbf16>
    %59 = vector.shape_cast %58 : vector<1x32x32xbf16> to vector<32x32xbf16>
    %cst_40 = arith.constant dense<0.000000e+00> : vector<288x32xf32>
    %60 = tpu.matmul %57, %59, %cst_40 {dimension_numbers = #tpu.dot_dimension_numbers<[1], [0], [0], [1], [0, 0, 1, 1], [], []>} : vector<288x32xbf16>, vector<32x32xbf16>, vector<288x32xf32> -> vector<288x32xf32>
    %61 = arith.addf %55, %60 : vector<288x32xf32>
    %c0_41 = arith.constant 0 : index
    %c37 = arith.constant 37 : index
    %c0_42 = arith.constant 0 : index
    %62 = vector.load %arg1[%c0_41, %c37, %c0_42] : memref<1x328x32xbf16, #tpu.memory_space<vmem>>, vector<1x288x32xbf16>
    %63 = vector.shape_cast %62 : vector<1x288x32xbf16> to vector<288x32xbf16>
    %c7 = arith.constant 7 : index
    %c0_43 = arith.constant 0 : index
    %c0_44 = arith.constant 0 : index
    %64 = vector.load %arg2[%c7, %c0_43, %c0_44] : memref<9x32x32xbf16, #tpu.memory_space<vmem>>, vector<1x32x32xbf16>
    %65 = vector.shape_cast %64 : vector<1x32x32xbf16> to vector<32x32xbf16>
    %cst_45 = arith.constant dense<0.000000e+00> : vector<288x32xf32>
    %66 = tpu.matmul %63, %65, %cst_45 {dimension_numbers = #tpu.dot_dimension_numbers<[1], [0], [0], [1], [0, 0, 1, 1], [], []>} : vector<288x32xbf16>, vector<32x32xbf16>, vector<288x32xf32> -> vector<288x32xf32>
    %67 = arith.addf %61, %66 : vector<288x32xf32>
    %c0_46 = arith.constant 0 : index
    %c38 = arith.constant 38 : index
    %c0_47 = arith.constant 0 : index
    %68 = vector.load %arg1[%c0_46, %c38, %c0_47] : memref<1x328x32xbf16, #tpu.memory_space<vmem>>, vector<1x288x32xbf16>
    %69 = vector.shape_cast %68 : vector<1x288x32xbf16> to vector<288x32xbf16>
    %c8 = arith.constant 8 : index
    %c0_48 = arith.constant 0 : index
    %c0_49 = arith.constant 0 : index
    %70 = vector.load %arg2[%c8, %c0_48, %c0_49] : memref<9x32x32xbf16, #tpu.memory_space<vmem>>, vector<1x32x32xbf16>
    %71 = vector.shape_cast %70 : vector<1x32x32xbf16> to vector<32x32xbf16>
    %cst_50 = arith.constant dense<0.000000e+00> : vector<288x32xf32>
    %72 = tpu.matmul %69, %71, %cst_50 {dimension_numbers = #tpu.dot_dimension_numbers<[1], [0], [0], [1], [0, 0, 1, 1], [], []>} : vector<288x32xbf16>, vector<32x32xbf16>, vector<288x32xf32> -> vector<288x32xf32>
    %73 = arith.addf %67, %72 : vector<288x32xf32>
    %c0_51 = arith.constant 0 : index
    %c0_52 = arith.constant 0 : index
    %74 = vector.load %arg3[%c0_51, %c0_52] : memref<1x32xf32, #tpu.memory_space<vmem>>, vector<1x32xf32>
    %75 = vector.broadcast %74 : vector<1x32xf32> to vector<288x32xf32>
    %76 = arith.addf %73, %75 : vector<288x32xf32>
    %cst_53 = arith.constant 0.000000e+00 : f32
    %77 = vector.broadcast %cst_53 : f32 to vector<288x32xf32>
    %78 = arith.maximumf %76, %77 : vector<288x32xf32>
    %cst_54 = arith.constant 0.000000e+00 : f32
    %79 = vector.broadcast %cst_54 : f32 to vector<288x32xf32>
    %80 = arith.select %18, %78, %79 : vector<288x32xi1>, vector<288x32xf32>
    %cst_55 = arith.constant 0.000000e+00 : bf16
    %81 = vector.broadcast %cst_55 : bf16 to vector<328x32xbf16>
    %c0_56 = arith.constant 0 : index
    %c0_57 = arith.constant 0 : index
    %82 = vector.load %arg7[%c0_56, %c0_57] : memref<328x32xbf16, #tpu.memory_space<vmem>>, vector<328x32xbf16>
    tpu.vector_store %arg7[%c0_56, %c0_57], %81 {strides = array<i32>} : memref<328x32xbf16, #tpu.memory_space<vmem>>, vector<328x32xbf16>,
    %83 = arith.truncf %80 : vector<288x32xf32> to vector<288x32xbf16>
    %c19_58 = arith.constant 19 : index
    %c0_59 = arith.constant 0 : index
    %84 = vector.load %arg7[%c19_58, %c0_59] : memref<328x32xbf16, #tpu.memory_space<vmem>>, vector<288x32xbf16>
    tpu.vector_store %arg7[%c19_58, %c0_59], %83 {strides = array<i32>} : memref<328x32xbf16, #tpu.memory_space<vmem>>, vector<288x32xbf16>,
    %cst_60 = arith.constant 0.000000e+00 : f32
    %85 = vector.broadcast %cst_60 : f32 to vector<288x32xf32>
    %c0_61 = arith.constant 0 : index
    %c0_62 = arith.constant 0 : index
    %86 = vector.load %arg7[%c0_61, %c0_62] : memref<328x32xbf16, #tpu.memory_space<vmem>>, vector<288x32xbf16>
    %c0_63 = arith.constant 0 : index
    %c0_64 = arith.constant 0 : index
    %c0_65 = arith.constant 0 : index
    %87 = vector.load %arg4[%c0_63, %c0_64, %c0_65] : memref<9x32x32xbf16, #tpu.memory_space<vmem>>, vector<1x32x32xbf16>
    %88 = vector.shape_cast %87 : vector<1x32x32xbf16> to vector<32x32xbf16>
    %cst_66 = arith.constant dense<0.000000e+00> : vector<288x32xf32>
    %89 = tpu.matmul %86, %88, %cst_66 {dimension_numbers = #tpu.dot_dimension_numbers<[1], [0], [0], [1], [0, 0, 1, 1], [], []>} : vector<288x32xbf16>, vector<32x32xbf16>, vector<288x32xf32> -> vector<288x32xf32>
    %90 = arith.addf %85, %89 : vector<288x32xf32>
    %c1_67 = arith.constant 1 : index
    %c0_68 = arith.constant 0 : index
    %91 = vector.load %arg7[%c1_67, %c0_68] : memref<328x32xbf16, #tpu.memory_space<vmem>>, vector<288x32xbf16>
    %c1_69 = arith.constant 1 : index
    %c0_70 = arith.constant 0 : index
    %c0_71 = arith.constant 0 : index
    %92 = vector.load %arg4[%c1_69, %c0_70, %c0_71] : memref<9x32x32xbf16, #tpu.memory_space<vmem>>, vector<1x32x32xbf16>
    %93 = vector.shape_cast %92 : vector<1x32x32xbf16> to vector<32x32xbf16>
    %cst_72 = arith.constant dense<0.000000e+00> : vector<288x32xf32>
    %94 = tpu.matmul %91, %93, %cst_72 {dimension_numbers = #tpu.dot_dimension_numbers<[1], [0], [0], [1], [0, 0, 1, 1], [], []>} : vector<288x32xbf16>, vector<32x32xbf16>, vector<288x32xf32> -> vector<288x32xf32>
    %95 = arith.addf %90, %94 : vector<288x32xf32>
    %c2_73 = arith.constant 2 : index
    %c0_74 = arith.constant 0 : index
    %96 = vector.load %arg7[%c2_73, %c0_74] : memref<328x32xbf16, #tpu.memory_space<vmem>>, vector<288x32xbf16>
    %c2_75 = arith.constant 2 : index
    %c0_76 = arith.constant 0 : index
    %c0_77 = arith.constant 0 : index
    %97 = vector.load %arg4[%c2_75, %c0_76, %c0_77] : memref<9x32x32xbf16, #tpu.memory_space<vmem>>, vector<1x32x32xbf16>
    %98 = vector.shape_cast %97 : vector<1x32x32xbf16> to vector<32x32xbf16>
    %cst_78 = arith.constant dense<0.000000e+00> : vector<288x32xf32>
    %99 = tpu.matmul %96, %98, %cst_78 {dimension_numbers = #tpu.dot_dimension_numbers<[1], [0], [0], [1], [0, 0, 1, 1], [], []>} : vector<288x32xbf16>, vector<32x32xbf16>, vector<288x32xf32> -> vector<288x32xf32>
    %100 = arith.addf %95, %99 : vector<288x32xf32>
    %c18_79 = arith.constant 18 : index
    %c0_80 = arith.constant 0 : index
    %101 = vector.load %arg7[%c18_79, %c0_80] : memref<328x32xbf16, #tpu.memory_space<vmem>>, vector<288x32xbf16>
    %c3_81 = arith.constant 3 : index
    %c0_82 = arith.constant 0 : index
    %c0_83 = arith.constant 0 : index
    %102 = vector.load %arg4[%c3_81, %c0_82, %c0_83] : memref<9x32x32xbf16, #tpu.memory_space<vmem>>, vector<1x32x32xbf16>
    %103 = vector.shape_cast %102 : vector<1x32x32xbf16> to vector<32x32xbf16>
    %cst_84 = arith.constant dense<0.000000e+00> : vector<288x32xf32>
    %104 = tpu.matmul %101, %103, %cst_84 {dimension_numbers = #tpu.dot_dimension_numbers<[1], [0], [0], [1], [0, 0, 1, 1], [], []>} : vector<288x32xbf16>, vector<32x32xbf16>, vector<288x32xf32> -> vector<288x32xf32>
    %105 = arith.addf %100, %104 : vector<288x32xf32>
    %c19_85 = arith.constant 19 : index
    %c0_86 = arith.constant 0 : index
    %106 = vector.load %arg7[%c19_85, %c0_86] : memref<328x32xbf16, #tpu.memory_space<vmem>>, vector<288x32xbf16>
    %c4_87 = arith.constant 4 : index
    %c0_88 = arith.constant 0 : index
    %c0_89 = arith.constant 0 : index
    %107 = vector.load %arg4[%c4_87, %c0_88, %c0_89] : memref<9x32x32xbf16, #tpu.memory_space<vmem>>, vector<1x32x32xbf16>
    %108 = vector.shape_cast %107 : vector<1x32x32xbf16> to vector<32x32xbf16>
    %cst_90 = arith.constant dense<0.000000e+00> : vector<288x32xf32>
    %109 = tpu.matmul %106, %108, %cst_90 {dimension_numbers = #tpu.dot_dimension_numbers<[1], [0], [0], [1], [0, 0, 1, 1], [], []>} : vector<288x32xbf16>, vector<32x32xbf16>, vector<288x32xf32> -> vector<288x32xf32>
    %110 = arith.addf %105, %109 : vector<288x32xf32>
    %c20_91 = arith.constant 20 : index
    %c0_92 = arith.constant 0 : index
    %111 = vector.load %arg7[%c20_91, %c0_92] : memref<328x32xbf16, #tpu.memory_space<vmem>>, vector<288x32xbf16>
    %c5_93 = arith.constant 5 : index
    %c0_94 = arith.constant 0 : index
    %c0_95 = arith.constant 0 : index
    %112 = vector.load %arg4[%c5_93, %c0_94, %c0_95] : memref<9x32x32xbf16, #tpu.memory_space<vmem>>, vector<1x32x32xbf16>
    %113 = vector.shape_cast %112 : vector<1x32x32xbf16> to vector<32x32xbf16>
    %cst_96 = arith.constant dense<0.000000e+00> : vector<288x32xf32>
    %114 = tpu.matmul %111, %113, %cst_96 {dimension_numbers = #tpu.dot_dimension_numbers<[1], [0], [0], [1], [0, 0, 1, 1], [], []>} : vector<288x32xbf16>, vector<32x32xbf16>, vector<288x32xf32> -> vector<288x32xf32>
    %115 = arith.addf %110, %114 : vector<288x32xf32>
    %c36_97 = arith.constant 36 : index
    %c0_98 = arith.constant 0 : index
    %116 = vector.load %arg7[%c36_97, %c0_98] : memref<328x32xbf16, #tpu.memory_space<vmem>>, vector<288x32xbf16>
    %c6_99 = arith.constant 6 : index
    %c0_100 = arith.constant 0 : index
    %c0_101 = arith.constant 0 : index
    %117 = vector.load %arg4[%c6_99, %c0_100, %c0_101] : memref<9x32x32xbf16, #tpu.memory_space<vmem>>, vector<1x32x32xbf16>
    %118 = vector.shape_cast %117 : vector<1x32x32xbf16> to vector<32x32xbf16>
    %cst_102 = arith.constant dense<0.000000e+00> : vector<288x32xf32>
    %119 = tpu.matmul %116, %118, %cst_102 {dimension_numbers = #tpu.dot_dimension_numbers<[1], [0], [0], [1], [0, 0, 1, 1], [], []>} : vector<288x32xbf16>, vector<32x32xbf16>, vector<288x32xf32> -> vector<288x32xf32>
    %120 = arith.addf %115, %119 : vector<288x32xf32>
    %c37_103 = arith.constant 37 : index
    %c0_104 = arith.constant 0 : index
    %121 = vector.load %arg7[%c37_103, %c0_104] : memref<328x32xbf16, #tpu.memory_space<vmem>>, vector<288x32xbf16>
    %c7_105 = arith.constant 7 : index
    %c0_106 = arith.constant 0 : index
    %c0_107 = arith.constant 0 : index
    %122 = vector.load %arg4[%c7_105, %c0_106, %c0_107] : memref<9x32x32xbf16, #tpu.memory_space<vmem>>, vector<1x32x32xbf16>
    %123 = vector.shape_cast %122 : vector<1x32x32xbf16> to vector<32x32xbf16>
    %cst_108 = arith.constant dense<0.000000e+00> : vector<288x32xf32>
    %124 = tpu.matmul %121, %123, %cst_108 {dimension_numbers = #tpu.dot_dimension_numbers<[1], [0], [0], [1], [0, 0, 1, 1], [], []>} : vector<288x32xbf16>, vector<32x32xbf16>, vector<288x32xf32> -> vector<288x32xf32>
    %125 = arith.addf %120, %124 : vector<288x32xf32>
    %c38_109 = arith.constant 38 : index
    %c0_110 = arith.constant 0 : index
    %126 = vector.load %arg7[%c38_109, %c0_110] : memref<328x32xbf16, #tpu.memory_space<vmem>>, vector<288x32xbf16>
    %c8_111 = arith.constant 8 : index
    %c0_112 = arith.constant 0 : index
    %c0_113 = arith.constant 0 : index
    %127 = vector.load %arg4[%c8_111, %c0_112, %c0_113] : memref<9x32x32xbf16, #tpu.memory_space<vmem>>, vector<1x32x32xbf16>
    %128 = vector.shape_cast %127 : vector<1x32x32xbf16> to vector<32x32xbf16>
    %cst_114 = arith.constant dense<0.000000e+00> : vector<288x32xf32>
    %129 = tpu.matmul %126, %128, %cst_114 {dimension_numbers = #tpu.dot_dimension_numbers<[1], [0], [0], [1], [0, 0, 1, 1], [], []>} : vector<288x32xbf16>, vector<32x32xbf16>, vector<288x32xf32> -> vector<288x32xf32>
    %130 = arith.addf %125, %129 : vector<288x32xf32>
    %c0_115 = arith.constant 0 : index
    %c0_116 = arith.constant 0 : index
    %131 = vector.load %arg5[%c0_115, %c0_116] : memref<1x32xf32, #tpu.memory_space<vmem>>, vector<1x32xf32>
    %132 = vector.broadcast %131 : vector<1x32xf32> to vector<288x32xf32>
    %133 = arith.addf %130, %132 : vector<288x32xf32>
    %cst_117 = arith.constant 0.000000e+00 : f32
    %134 = vector.broadcast %cst_117 : f32 to vector<288x32xf32>
    %135 = arith.maximumf %133, %134 : vector<288x32xf32>
    %c0_118 = arith.constant 0 : index
    %c19_119 = arith.constant 19 : index
    %c0_120 = arith.constant 0 : index
    %136 = vector.load %arg1[%c0_118, %c19_119, %c0_120] : memref<1x328x32xbf16, #tpu.memory_space<vmem>>, vector<1x288x32xbf16>
    %137 = vector.shape_cast %136 : vector<1x288x32xbf16> to vector<288x32xbf16>
    %138 = arith.extf %137 : vector<288x32xbf16> to vector<288x32xf32>
    %139 = arith.addf %135, %138 : vector<288x32xf32>
    %c0_121 = arith.constant 0 : index
    %c0_122 = arith.constant 0 : index
    %c0_123 = arith.constant 0 : index
    %140 = vector.load %arg6[%c0_121, %c0_122, %c0_123] : memref<1x288x32xf32, #tpu.memory_space<vmem>>, vector<1x288x32xf32>
    %141 = vector.shape_cast %140 : vector<1x288x32xf32> to vector<288x32xf32>
    %142 = vector.shape_cast %139 : vector<288x32xf32> to vector<1x288x32xf32>
    tpu.vector_store %arg6[%c0_121, %c0_122, %c0_123], %142 {strides = array<i32>} : memref<1x288x32xf32, #tpu.memory_space<vmem>>, vector<1x288x32xf32>,
    return
  }
  func.func @transform_0(%arg0: i32) -> (i32, i32, i32) {
    %c0_i32 = arith.constant 0 : i32
    %c0_i32_0 = arith.constant 0 : i32
    %c0_i32_1 = arith.constant 0 : i32
    return %arg0, %c0_i32, %c0_i32_0 : i32, i32, i32
  }
  func.func @transform_1(%arg0: i32) -> (i32, i32, i32) {
    %c0_i32 = arith.constant 0 : i32
    %c0_i32_0 = arith.constant 0 : i32
    %c0_i32_1 = arith.constant 0 : i32
    %c0_i32_2 = arith.constant 0 : i32
    return %c0_i32, %c0_i32_0, %c0_i32_1 : i32, i32, i32
  }
  func.func @transform_2(%arg0: i32) -> (i32, i32) {
    %c0_i32 = arith.constant 0 : i32
    %c0_i32_0 = arith.constant 0 : i32
    %c0_i32_1 = arith.constant 0 : i32
    return %c0_i32, %c0_i32_0 : i32, i32
  }
  func.func @transform_3(%arg0: i32) -> (i32, i32, i32) {
    %c0_i32 = arith.constant 0 : i32
    %c0_i32_0 = arith.constant 0 : i32
    %c0_i32_1 = arith.constant 0 : i32
    %c0_i32_2 = arith.constant 0 : i32
    return %c0_i32, %c0_i32_0, %c0_i32_1 : i32, i32, i32
  }
  func.func @transform_4(%arg0: i32) -> (i32, i32) {
    %c0_i32 = arith.constant 0 : i32
    %c0_i32_0 = arith.constant 0 : i32
    %c0_i32_1 = arith.constant 0 : i32
    return %c0_i32, %c0_i32_0 : i32, i32
  }
  func.func @transform_5(%arg0: i32) -> (i32, i32, i32) {
    %c0_i32 = arith.constant 0 : i32
    %c0_i32_0 = arith.constant 0 : i32
    %c0_i32_1 = arith.constant 0 : i32
    return %arg0, %c0_i32, %c0_i32_0 : i32, i32, i32
  }
}

</mosaic_0001>

<bundles_post_ra>
// kernel: residual_conv_unit_forward.1
= control target key start
LH: loop header
LB: loop body
LE: loop exit
PB: predicated region body
PF: predicated region fallthrough
CT: control target
= control target key end

     0   :  { %s11781_s18 = smov 0   ;;  %s15380_s0 = inlined_call_operand.vmem [shape: bf16[2,328,32], index: 0, kind: input, shape index: {}]   ;;  %s15381_s1 = inlined_call_operand.vmem [shape: bf16[9,32,32], index: 1, kind: input, shape index: {}]   ;;  %s15382_s2 = inlined_call_operand.vmem [shape: f32[1,32], index: 2, kind: input, shape index: {}]   ;;  %s15383_s3 = inlined_call_operand.vmem [shape: bf16[9,32,32], index: 3, kind: input, shape index: {}]   ;;  %s15384_s4 = inlined_call_operand.vmem [shape: f32[1,32], index: 4, kind: input, shape index: {}]   ;;  %s15385_s5 = inlined_call_operand.vmem [shape: f32[2,288,32], index: 5, kind: output, shape index: {}]  }
   0x1 LB: > { %s9115_s19 = sadd.s32 4294967295, %s11748_s18   ;;  %p9119_p0 = scmp.ge.s32.totalorder %s11748_s18, 1  ;;  %s11748_s18 = sphi %s11781_s18, %s15_s18  }
   0x2   : > { %p187_p1 = scmp.lt.s32.totalorder %s11748_s18, 3 }
   0x4   : > { %p188_p2 = pnand %p9119_p0, %p187_p1 }
   0x6   : > { %191 = sbr.rel (%p188_p2) target bundleno = 1787 (0x6fb), region = 40 }
   0xd   : > { %v11570_v0 = vld [vmem:[%s15381_s1 + $0x10] sm:$0xff]   ;;  %p215_p3 = scmp.lt.s32.totalorder %s9115_s19, 1  ;;  %v11571_v1 = vld [vmem:[%s15381_s1 + $0x18] sm:$0xff]   ;;  %v11574_v2 = vld [vmem:[%s15381_s1] sm:$0xff]   ;;  %vm15391_vm0 = vcmask 261120   ;;  %vm15387_vm2 = vcmask 1046528  }
   0xe   : > { %10191 = vmatprep.subr.bf16.mxu0 %v11570_v0  ;;  %vm15392_vm1 = vsmask.f32 7424  ;;  %v11584_v27 = vld [vmem:[%s15381_s1 + $0x8] sm:$0xff]   ;;  %v11854_v36 = vld [vmem:[%s15381_s1 + $0x20] sm:$0xff]   ;;  %vm15390_vm3 = vsmask.f32 6400 }
   0xf   : > { %s16436_s19 = smov (!%p215_p3, %s9115_s19), 1  ;;  %10192 = vmatpush3.bf16.msra.mxu0 %v11570_v0  ;;  %vm15389_vm4 = vcmask 1045504   ;;  %vm15388_vm5 = vsmask.f32 5376  ;;  %vm15386_vm6 = vcmask 1044480   ;;  %vm15393_vm7 = vcmask 257024  }
  0x10   : > { %10193 = vmatprep.subr.bf16.mxu0 %v11571_v1  ;;  %s11487_s24 = smul.u32 164, %s16436_s19 }
  0x11   : > { %s11488_s13 = smul.u32 288, %s16436_s19 }
  0x12   : > { %s11804_s29 = scalar_lea.vmem %s15380_s0, %s11487_s24 }
  0x13   : > { %10194 = vmatpush3.bf16.msra.mxu0 %v11571_v1  ;;  %v875_v3 = vld [vmem:[%s11804_s29] sm:$0xf]  ;;  %v11808_v4 = vld [vmem:[%s11804_s29 + $0x4] sm:$0xf]  ;;  %v11814_v6 = vld [vmem:[%s11804_s29 + $0x8] sm:$0xff]   ;;  %s15222_s15 = scalar_lea.vmem %s15385_s5, %s11488_s13 }
  0x14   : > { %v11811_v5 = vcombine.low %v875_v3, %v11808_v4  ;;  %10231 = vmatprep.subr.bf16.mxu0 %v11574_v2  ;;  %v11817_v7 = vld [vmem:[%s11804_s29 + $0x10] sm:$0xff]   ;;  %v1023_v10 = vshll.u32 %v11814_v6, 16  ;;  %v1027_v11 = vshrl.u32 %v11814_v6, 16  ;;  %v11825_v13 = vld [vmem:[%s11804_s29 + $0x18] sm:$0xff]   ;;  %v11829_v15 = vld [vmem:[%s11804_s29 + $0x20] sm:$0xff]  }
  0x15   : > { %v1031_v12 = vshll.u32 %v11817_v7, 16  ;;  %v1035_v14 = vshrl.u32 %v11817_v7, 16  ;;  %v1039_v19 = vshll.u32 %v11825_v13, 16  ;;  %v1047_v22 = vshll.u32 %v11829_v15, 16  ;;  %v11834_v23 = vld [vmem:[%s11804_s29 + $0x28] sm:$0xff]   ;;  %v11848_v34 = vld [vmem:[%s11804_s29 + $0x30] sm:$0xff]  }
  0x16   : > { %v1016_v8 = vshrl.u32 %v11811_v5, 16  ;;  %v1018_v9 = vshll.u32 %v11811_v5, 16  ;;  %v1025_v17 = vrot.slane %v1023_v10, 1  ;;  %v1043_v26 = vshrl.u32 %v11825_v13, 16  ;;  %v11857_v39 = vld [vmem:[%s11804_s29 + $0x38] sm:$0xff]   ;;  %v11867_v46 = vld [vmem:[%s11804_s29 + $0x40] sm:$0xff]  }
  0x17   : > { %v1033_v18 = vrot.slane %v1031_v12, 1  ;;  %v1041_v25 = vrot.slane %v1039_v19, 1  ;;  %v1051_v30 = vshrl.u32 %v11829_v15, 16  ;;  %v1055_v31 = vshll.u32 %v11834_v23, 16  ;;  %v11871_v48 = vld [vmem:[%s11804_s29 + $0x48] sm:$0xff]   ;;  %v11874_v49 = vld [vmem:[%s11804_s29 + $0x50] sm:$0xff]  }
  0x18   : > { %v1020_v16 = vrot.slane %v1018_v9, 1  ;;  %v1029_v21 = vor.u32 %v1027_v11, %v1025_v17  ;;  %v1049_v33 = vrot.slane %v1047_v22, 1  ;;  %v1063_v40 = vshll.u32 %v11848_v34, 16  ;;  %v11878_v51 = vld [vmem:[%s11804_s29 + $0x58] sm:$0xff]   ;;  %v11887_v60 = vld [vmem:[%s11804_s29 + $0x60] sm:$0xff]   ;;  %v11892_v63 = vld [vmem:[%s11804_s29 + $0x68] sm:$0xff]  }
  0x19   : > { %v1037_v24 = vor.u32 %v1035_v14, %v1033_v18  ;;  %v1045_v35 = vor.u32 %v1043_v26, %v1041_v25  ;;  %v1057_v38 = vrot.slane %v1055_v31, 1  ;;  %v1059_v42 = vshrl.u32 %v11834_v23, 16 }
  0x1a   : > { %v1021_v20 = vor.u32 %v1020_v16, %v1016_v8  ;;  %v1034_v29 = vsel %vm15392_vm1, %v1029_v21, %v1033_v18  ;;  %v1053_v37 = vor.u32 %v1051_v30, %v1049_v33  ;;  %v1067_v44 = vshrl.u32 %v11848_v34, 16  ;;  %v11903_v18 = vld [vmem:[%s11804_s29 + $0x70] sm:$0xff]  }
  0x1b   : > { %v1042_v32 = vsel %vm15392_vm1, %v1037_v24, %v1041_v25  ;;  %v1050_v41 = vsel %vm15392_vm1, %v1045_v35, %v1049_v33  ;;  %v1071_v45 = vshll.u32 %v11857_v39, 16  ;;  %v1065_v47 = vrot.slane %v1063_v40, 1  ;;  %v11922_v40 = vld [vmem:[%s11804_s29 + $0x80] sm:$0xff]  }
  0x1c   : > { %v1026_v28 = vsel %vm15392_vm1, %v1021_v20, %v1025_v17  ;;  %v1058_v43 = vsel %vm15392_vm1, %v1053_v37, %v1057_v38  ;;  %v1061_v50 = vor.u32 %v1059_v42, %v1057_v38  ;;  %v1079_v54 = vshll.u32 %v11867_v46, 16 }
  0x1d   : > { %10195 = vmatprep.mubr.msk.bf16.mxu0 %vm15391_vm0, %v1026_v28  ;;  %v1069_v52 = vor.u32 %v1067_v44, %v1065_v47  ;;  %v1073_v53 = vrot.slane %v1071_v45, 1  ;;  %v1075_v55 = vshrl.u32 %v11857_v39, 16  ;;  %v1087_v56 = vshll.u32 %v11871_v48, 16  ;;  %v11912_v28 = vld [vmem:[%s11804_s29 + $0x78] sm:$0xff]  }
  0x1e   : > { %10196 = vmatmul.mubr.msk.bf16.vlgmr.msra.gmra.mrb[0].mxu0 %vm15391_vm0, %v1034_v29  ;;  %v1066_v57 = vsel %vm15392_vm1, %v1061_v50, %v1065_v47  ;;  %v1095_v58 = vshll.u32 %v11874_v49, 16  ;;  %v1103_v59 = vshll.u32 %v11878_v51, 16  ;;  %v1083_v62 = vshrl.u32 %v11867_v46, 16 }
  0x1f   : > { %10232 = vmatpush3.bf16.msra.mxu0 %v11574_v2  ;;  %10199 = vmatprep.mubr.msk.bf16.mxu0 %vm15391_vm0, %v1042_v32  ;;  %v1074_v61 = vsel %vm15392_vm1, %v1069_v52, %v1073_v53  ;;  %v1081_v0 = vrot.slane %v1079_v54, 1  ;;  %v1091_v1 = vshrl.u32 %v11871_v48, 16  ;;  %v1077_v2 = vor.u32 %v1075_v55, %v1073_v53  ;;  %v11935_v54 = vld [vmem:[%s11804_s29 + $0x90] ss:$0 sps:$4 sm:$0x11]  }
  0x20   : > { %10233 = vmatprep.subr.bf16.mxu0 %v11584_v27  ;;  %v1089_v3 = vrot.slane %v1087_v56, 1  ;;  %v1099_v8 = vshrl.u32 %v11874_v49, 16  ;;  %v1097_v9 = vrot.slane %v1095_v58, 1  ;;  %v1105_v10 = vrot.slane %v1103_v59, 1 }
  0x21   : > { %v1107_v11 = vshrl.u32 %v11878_v51, 16  ;;  %v1111_v12 = vshll.u32 %v11887_v60, 16  ;;  %v1085_v14 = vor.u32 %v1083_v62, %v1081_v0  ;;  %v1115_v16 = vshrl.u32 %v11887_v60, 16 }
  0x22   : > { %v1119_v17 = vshll.u32 %v11892_v63, 16  ;;  %v1082_v19 = vsel %vm15392_vm1, %v1077_v2, %v1081_v0  ;;  %v1123_v22 = vshrl.u32 %v11892_v63, 16  ;;  %v1093_v24 = vor.u32 %v1091_v1, %v1089_v3 }
  0x23   : > { %10234 = vmatpush3.bf16.msra.mxu0 %v11584_v27  ;;  %v1090_v20 = vsel %vm15392_vm1, %v1085_v14, %v1089_v3  ;;  %v1113_v21 = vrot.slane %v1111_v12, 1  ;;  %v1127_v26 = vshll.u32 %v11903_v18, 16  ;;  %v1101_v27 = vor.u32 %v1099_v8, %v1097_v9 }
  0x24   : > { %10271 = vmatprep.subr.bf16.mxu0 %v11854_v36  ;;  %v1121_v25 = vrot.slane %v1119_v17, 1  ;;  %v1098_v29 = vsel %vm15392_vm1, %v1093_v24, %v1097_v9  ;;  %v1131_v31 = vshrl.u32 %v11903_v18, 16  ;;  %v1135_v32 = vshll.u32 %v11912_v28, 16 }
  0x25   : > { %v1106_v30 = vsel %vm15392_vm1, %v1101_v27, %v1105_v10  ;;  %v1109_v33 = vor.u32 %v1107_v11, %v1105_v10  ;;  %v1129_v35 = vrot.slane %v1127_v26, 1  ;;  %v1139_v37 = vshrl.u32 %v11912_v28, 16  ;;  %v11594_v10 = vld [vmem:[%s15381_s1 + $0x28] sm:$0xff]   ;;  %v11596_v11 = vld [vmem:[%s15381_s1 + $0x30] sm:$0xff]  }
  0x26   : > { %10200 = vmatmul.mubr.msk.bf16.gmra.mrb[4].mxu0 %vm15391_vm0, %v1050_v41  ;;  %v1117_v38 = vor.u32 %v1115_v16, %v1113_v21  ;;  %v11925_v41 = vld [vmem:[%s11804_s29 + $0x88] sm:$0xff]   ;;  %v1137_v44 = vrot.slane %v1135_v32, 1  ;;  %v1143_v45 = vshll.u32 %v11922_v40, 16  ;;  %v1125_v47 = vor.u32 %v1123_v22, %v1121_v25 }
  0x27   : > { %10203 = vmatprep.mubr.msk.bf16.mxu0 %vm15391_vm0, %v1058_v43  ;;  %v1114_v42 = vsel %vm15392_vm1, %v1109_v33, %v1113_v21  ;;  %v1147_v50 = vshrl.u32 %v11922_v40, 16  ;;  %v1151_v52 = vshll.u32 %v11925_v41, 16  ;;  %v1133_v53 = vor.u32 %v1131_v31, %v1129_v35 }
  0x28   : > { %v1122_v43 = vsel %vm15392_vm1, %v1117_v38, %v1121_v25  ;;  %v1130_v55 = vsel %vm15392_vm1, %v1125_v47, %v1129_v35  ;;  %v1155_v58 = vshrl.u32 %v11925_v41, 16  ;;  %v1141_v59 = vor.u32 %v1139_v37, %v1137_v44  ;;  %v12060_v47 = vld [vmem:[%s11804_s29 + $0x10] sm:$0xff]  }
  0x29   : > { %v1138_v56 = vsel %vm15392_vm1, %v1133_v53, %v1137_v44  ;;  %v1159_v62 = vshll.u32 %v11935_v54, 16  ;;  %v1643_v14 = vrot.slane %v11814_v6, 1  ;;  %v1645_v17 = vrot.slane %v11817_v7, 1  ;;  %v12052_v44 = vld [vmem:[%s11804_s29 + $0xc] sm:$0xf]  ;;  %v12069_v53 = vld [vmem:[%s11804_s29 + $0x18] sm:$0xff]  }
  0x2a   : > { %v1649_v21 = vrot.slane %v11829_v15, 1  ;;  %v1651_v22 = vrot.slane %v11834_v23, 1  ;;  %v1657_v27 = vrot.slane %v11867_v46, 1  ;;  %v1671_v37 = vrot.slane %v11912_v28, 1 }
  0x2b   : > { %v1161_v8 = vrot.slane %v1159_v62, 1  ;;  %v12085_v62 = vld [vmem:[%s11804_s29 + $0x30] sm:$0xff]  }
  0x2c   : > { %v1652_v24 = vsel %vm15387_vm2, %v1649_v21, %v1651_v22 }
  0x2e   : > { %10204 = vmatmul.mubr.msk.bf16.gmra.mrb[8].mxu0 %vm15391_vm0, %v1066_v57  ;;  %v1145_v57 = vrot.slane %v1143_v45, 1 }
  0x2f   : > { %10207 = vmatprep.mubr.msk.bf16.mxu0 %vm15391_vm0, %v1074_v61  ;;  %v1153_v61 = vrot.slane %v1151_v52, 1 }
  0x30   : > { %v1149_v0 = vor.u32 %v1147_v50, %v1145_v57  ;;  %v1146_v1 = vsel %vm15392_vm1, %v1141_v59, %v1145_v57  ;;  %v2094_v50 = vrot.slane %v12060_v47, 1  ;;  %v2096_v57 = vrot.slane %v12069_v53, 1  ;;  %v12081_v59 = vld [vmem:[%s11804_s29 + $0x28] sm:$0xff]  }
  0x31   : > { %v1157_v3 = vor.u32 %v1155_v58, %v1153_v61 }
  0x32   : > { %v1154_v2 = vsel %vm15392_vm1, %v1149_v0, %v1153_v61  ;;  %v2097_v58 = vsel %vm15387_vm2, %v2094_v50, %v2096_v57  ;;  %v11610_v0 = vld [vmem:[%s15381_s1 + $0x48] sm:$0xff]  }
  0x33   : > { %v1162_v9 = vsel %vm15392_vm1, %v1157_v3, %v1161_v8  ;;  %v12098_v3 = vld [vmem:[%s15381_s1 + $0x50] sm:$0xff]  }
  0x36   : > { %10208 = vmatmul.mubr.msk.bf16.gmra.mrb[12].mxu0 %vm15391_vm0, %v1082_v19  ;;  %v1646_v19 = vsel %vm15387_vm2, %v1643_v14, %v1645_v17 }
  0x37   : > { %10211 = vmatprep.mubr.msk.bf16.mxu0 %vm15391_vm0, %v1090_v20 }
  0x3e   : > { %10212 = vmatmul.mubr.msk.bf16.gmra.mrb[16].mxu0 %vm15391_vm0, %v1098_v29  ;;  %v1659_v29 = vrot.slane %v11871_v48, 1 }
  0x3f   : > { %10215 = vmatprep.mubr.msk.bf16.mxu0 %vm15391_vm0, %v1106_v30 }
  0x40   : > { %v1660_v31 = vsel %vm15387_vm2, %v1657_v27, %v1659_v29 }
  0x46   : > { %10216 = vmatmul.mubr.msk.bf16.gmra.mrb[20].mxu0 %vm15391_vm0, %v1114_v42 }
  0x47   : > { %10219 = vmatprep.mubr.msk.bf16.mxu0 %vm15391_vm0, %v1122_v43  ;;  %v1958_v43 = vld [vmem:[%s11804_s29 + $0x8] sm:$0xe] }
  0x48   : > { %v12057_v45 = vcombine.low %v1958_v43, %v12052_v44 }
  0x4e   : > { %10220 = vmatmul.mubr.msk.bf16.gmra.mrb[24].mxu0 %vm15391_vm0, %v1130_v55 }
  0x4f   : > { %10223 = vmatprep.mubr.msk.bf16.mxu0 %vm15391_vm0, %v1138_v56  ;;  %v12073_v56 = vld [vmem:[%s11804_s29 + $0x20] sm:$0xff]  }
  0x56   : > { %10224 = vmatmul.mubr.msk.bf16.gmra.mrb[28].mxu0 %vm15391_vm0, %v1146_v1  ;;  %v2100_v1 = vrot.slane %v12081_v59, 1 }
  0x57   : > { %10227 = vmatprep.mubr.msk.bf16.mxu0 %vm15391_vm0, %v1154_v2  ;;  %v2102_v2 = vrot.slane %v12085_v62, 1 }
  0x5e   : > { %10228 = vmatmul.mubr.msk.bf16.gmra.mrb[32].mxu0 %vm15391_vm0, %v1162_v9  ;;  %v12102_v9 = vld [vmem:[%s11804_s29 + $0x38] sm:$0xff]  }
  0x5f   : > { %10235 = vmatprep.mubr.msk.bf16.mxu0 %vm15391_vm0, %v11811_v5  ;;  %v1632_v5 = vld [vmem:[%s11804_s29] sm:$0xe] }
  0x66   : > { %10236 = vmatmul.mubr.msk.bf16.vlgmr.msra.gmra.mrb[0].mxu0 %vm15391_vm0, %v11814_v6  ;;  %v11597_v6 = vld [vmem:[%s15381_s1 + $0x38] sm:$0xff]  }
  0x67   : > { %10272 = vmatpush3.bf16.msra.mxu0 %v11854_v36  ;;  %10239 = vmatprep.mubr.msk.bf16.mxu0 %vm15391_vm0, %v11817_v7  ;;  %v9189_v36 = vcombine.low %v1632_v5, %v11808_v4  ;;  %v1647_v4 = vrot.slane %v11825_v13, 1  ;;  %v12011_v7 = vld [vmem:[%s15381_s1 + $0x40] sm:$0xff]   ;;  %v2104_v5 = vrot.slane %v12102_v9, 1 }
  0x68   : > { %10273 = vmatprep.subr.bf16.mxu0 %v11594_v10 }
  0x69   : > { %v1642_v12 = vrot.slane %v9189_v36, 1  ;;  %v1648_v20 = vsel %vm15387_vm2, %v1645_v17, %v1647_v4  ;;  %v12119_v17 = vld [vmem:[%s11804_s29 + $0x50] sm:$0xff]  }
  0x6b   : > { %10274 = vmatpush3.bf16.msra.mxu0 %v11594_v10  ;;  %v1644_v16 = vsel %vm15387_vm2, %v1642_v12, %v1643_v14  ;;  %v2103_v10 = vsel %vm15387_vm2, %v2100_v1, %v2102_v2  ;;  %v2105_v12 = vsel %vm15387_vm2, %v2102_v2, %v2104_v5  ;;  %v12115_v14 = vld [vmem:[%s11804_s29 + $0x48] sm:$0xff]  }
  0x6c   : > { %10311 = vmatprep.subr.bf16.mxu0 %v11596_v11 }
  0x6e   : > { %10240 = vmatmul.mubr.msk.bf16.gmra.mrb[4].mxu0 %vm15391_vm0, %v11825_v13  ;;  %v1650_v13 = vsel %vm15387_vm2, %v1647_v4, %v1649_v21  ;;  %v2108_v4 = vrot.slane %v12115_v14, 1 }
  0x6f   : > { %10243 = vmatprep.mubr.msk.bf16.mxu0 %vm15391_vm0, %v11829_v15  ;;  %v1653_v15 = vrot.slane %v11848_v34, 1 }
  0x71   : > { %v1654_v25 = vsel %vm15387_vm2, %v1651_v22, %v1653_v15  ;;  %v12131_v22 = vld [vmem:[%s11804_s29 + $0x60] sm:$0xff]  }
  0x76   : > { %10244 = vmatmul.mubr.msk.bf16.gmra.mrb[8].mxu0 %vm15391_vm0, %v11834_v23  ;;  %v1655_v23 = vrot.slane %v11857_v39, 1 }
  0x77   : > { %10247 = vmatprep.mubr.msk.bf16.mxu0 %vm15391_vm0, %v11848_v34  ;;  %v1661_v34 = vrot.slane %v11874_v49, 1 }
  0x78   : > { %v1656_v26 = vsel %vm15387_vm2, %v1653_v15, %v1655_v23  ;;  %v1658_v30 = vsel %vm15387_vm2, %v1655_v23, %v1657_v27  ;;  %v12139_v15 = vld [vmem:[%s11804_s29 + $0x68] sm:$0xff]  }
  0x79   : > { %v1662_v32 = vsel %vm15387_vm2, %v1659_v29, %v1661_v34 }
  0x7e   : > { %10248 = vmatmul.mubr.msk.bf16.gmra.mrb[12].mxu0 %vm15391_vm0, %v11857_v39  ;;  %v1663_v39 = vrot.slane %v11878_v51, 1 }
  0x7f   : > { %10251 = vmatprep.mubr.msk.bf16.mxu0 %vm15391_vm0, %v11867_v46  ;;  %v1665_v46 = vrot.slane %v11887_v60, 1 }
  0x80   : > { %v1664_v33 = vsel %vm15387_vm2, %v1661_v34, %v1663_v39  ;;  %v12155_v34 = vld [vmem:[%s11804_s29 + $0x80] sm:$0xff]  }
  0x81   : > { %v1666_v35 = vsel %vm15387_vm2, %v1663_v39, %v1665_v46 }
  0x86   : > { %10252 = vmatmul.mubr.msk.bf16.gmra.mrb[16].mxu0 %vm15391_vm0, %v11871_v48  ;;  %v1667_v48 = vrot.slane %v11892_v63, 1 }
  0x87   : > { %10255 = vmatprep.mubr.msk.bf16.mxu0 %vm15391_vm0, %v11874_v49 }
  0x88   : > { %v1668_v49 = vsel %vm15387_vm2, %v1665_v46, %v1667_v48  ;;  %v12163_v46 = vld [vmem:[%s11804_s29 + $0x88] sm:$0xff]  }
  0x8e   : > { %10256 = vmatmul.mubr.msk.bf16.gmra.mrb[20].mxu0 %vm15391_vm0, %v11878_v51  ;;  %v1669_v51 = vrot.slane %v11903_v18, 1 }
  0x8f   : > { %10259 = vmatprep.mubr.msk.bf16.mxu0 %vm15391_vm0, %v11887_v60  ;;  %v1673_v60 = vrot.slane %v11922_v40, 1 }
  0x90   : > { %v1670_v38 = vsel %vm15387_vm2, %v1667_v48, %v1669_v51  ;;  %v1672_v42 = vsel %vm15387_vm2, %v1669_v51, %v1671_v37  ;;  %v12166_v48 = vld [vmem:[%s11804_s29 + $0x90] sm:$0xff]  }
  0x91   : > { %v2126_v51 = vrot.slane %v12166_v48, 1 }
  0x96   : > { %10260 = vmatmul.mubr.msk.bf16.gmra.mrb[24].mxu0 %vm15391_vm0, %v11892_v63  ;;  %v1675_v63 = vrot.slane %v11925_v41, 1 }
  0x97   : > { %10263 = vmatprep.mubr.msk.bf16.mxu0 %vm15391_vm0, %v11903_v18  ;;  %v1674_v18 = vsel %vm15387_vm2, %v1671_v37, %v1673_v60  ;;  %v2420_v37 = vshrl.u32 %v12057_v45, 16 }
  0x9e   : > { %10264 = vmatmul.mubr.msk.bf16.gmra.mrb[28].mxu0 %vm15391_vm0, %v11912_v28  ;;  %v1676_v28 = vsel %vm15387_vm2, %v1673_v60, %v1675_v63  ;;  %v2431_v60 = vshll.u32 %v12060_v47, 16 }
  0x9f   : > { %10267 = vmatprep.mubr.msk.bf16.mxu0 %vm15391_vm0, %v11922_v40  ;;  %v1677_v40 = vrot.slane %v11935_v54, 1  ;;  %v2098_v54 = vrot.slane %v12073_v56, 1 }
  0xa1   : > { %v1678_v52 = vsel %vm15387_vm2, %v1675_v63, %v1677_v40  ;;  %v2099_v61 = vsel %vm15387_vm2, %v2096_v57, %v2098_v54  ;;  %v2101_v8 = vsel %vm15387_vm2, %v2098_v54, %v2100_v1 }
  0xa6   : > { %10268 = vmatmul.mubr.msk.bf16.gmra.mrb[32].mxu0 %vm15391_vm0, %v11925_v41  ;;  %v2093_v41 = vrot.slane %v12057_v45, 1 }
  0xa7   : > { %10275 = vmatprep.mubr.msk.bf16.mxu0 %vm15391_vm0, %v1644_v16 }
  0xa8   : > { %v2095_v55 = vsel %vm15387_vm2, %v2093_v41, %v2094_v50  ;;  %v2433_v50 = vrot.slane %v2431_v60, 2 }
  0xae   : > { %10276 = vmatmul.mubr.msk.bf16.vlgmr.msra.gmra.mrb[0].mxu0 %vm15391_vm0, %v1646_v19  ;;  %v2110_v19 = vrot.slane %v12119_v17, 1 }
  0xaf   : > { %10312 = vmatpush3.bf16.msra.mxu0 %v11596_v11  ;;  %10279 = vmatprep.mubr.msk.bf16.mxu0 %vm15391_vm0, %v1648_v20  ;;  %v12106_v11 = vld [vmem:[%s11804_s29 + $0x40] sm:$0xff]  }
  0xb0   : > { %10313 = vmatprep.subr.bf16.mxu0 %v11597_v6  ;;  %v2106_v36 = vrot.slane %v12106_v11, 1  ;;  %v2111_v21 = vsel %vm15387_vm2, %v2108_v4, %v2110_v19 }
  0xb2   : > { %v2107_v16 = vsel %vm15387_vm2, %v2104_v5, %v2106_v36  ;;  %v2109_v20 = vsel %vm15387_vm2, %v2106_v36, %v2108_v4 }
  0xb3   : > { %10314 = vmatpush3.bf16.msra.mxu0 %v11597_v6  ;;  %v12127_v6 = vld [vmem:[%s11804_s29 + $0x58] sm:$0xff]  }
  0xb4   : > { %10351 = vmatprep.subr.bf16.mxu0 %v12011_v7 }
  0xb6   : > { %10280 = vmatmul.mubr.msk.bf16.gmra.mrb[4].mxu0 %vm15391_vm0, %v1650_v13  ;;  %v2114_v13 = vrot.slane %v12131_v22, 1 }
  0xb7   : > { %10283 = vmatprep.mubr.msk.bf16.mxu0 %vm15391_vm0, %v1652_v24 }
  0xbe   : > { %10284 = vmatmul.mubr.msk.bf16.gmra.mrb[8].mxu0 %vm15391_vm0, %v1654_v25  ;;  %v12143_v25 = vld [vmem:[%s11804_s29 + $0x70] sm:$0xff]  }
  0xbf   : > { %10287 = vmatprep.mubr.msk.bf16.mxu0 %vm15391_vm0, %v1656_v26  ;;  %v2116_v26 = vrot.slane %v12139_v15, 1  ;;  %v2118_v27 = vrot.slane %v12143_v25, 1 }
  0xc1   : > { %v2117_v29 = vsel %vm15387_vm2, %v2114_v13, %v2116_v26 }
  0xc6   : > { %10288 = vmatmul.mubr.msk.bf16.gmra.mrb[12].mxu0 %vm15391_vm0, %v1658_v30  ;;  %v12151_v30 = vld [vmem:[%s11804_s29 + $0x78] sm:$0xff]  }
  0xc7   : > { %10291 = vmatprep.mubr.msk.bf16.mxu0 %vm15391_vm0, %v1660_v31  ;;  %v2119_v31 = vsel %vm15387_vm2, %v2116_v26, %v2118_v27  ;;  %v2120_v39 = vrot.slane %v12151_v30, 1 }
  0xce   : > { %10292 = vmatmul.mubr.msk.bf16.gmra.mrb[16].mxu0 %vm15391_vm0, %v1662_v32  ;;  %v2122_v32 = vrot.slane %v12155_v34, 1 }
  0xcf   : > { %10295 = vmatprep.mubr.msk.bf16.mxu0 %vm15391_vm0, %v1664_v33  ;;  %v2121_v33 = vsel %vm15387_vm2, %v2118_v27, %v2120_v39  ;;  %v11620_v27 = vld [vmem:[%s15381_s1 + $0x58] sm:$0xff]  }
  0xd6   : > { %10296 = vmatmul.mubr.msk.bf16.gmra.mrb[20].mxu0 %vm15391_vm0, %v1666_v35  ;;  %v2123_v35 = vsel %vm15387_vm2, %v2120_v39, %v2122_v32  ;;  %v2476_v39 = vshll.u32 %v12102_v9, 16 }
  0xd7   : > { %10299 = vmatprep.mubr.msk.bf16.mxu0 %vm15391_vm0, %v1668_v49  ;;  %v2124_v49 = vrot.slane %v12163_v46, 1 }
  0xd9   : > { %v2125_v63 = vsel %vm15387_vm2, %v2122_v32, %v2124_v49  ;;  %v2127_v43 = vsel %vm15387_vm2, %v2124_v49, %v2126_v51  ;;  %v12209_v49 = vld [vmem:[%s15381_s1 + $0x60] sm:$0xff]  }
  0xde   : > { %10300 = vmatmul.mubr.msk.bf16.gmra.mrb[24].mxu0 %vm15391_vm0, %v1670_v38  ;;  %v2423_v38 = vshll.u32 %v12057_v45, 16  ;;  %v2437_v45 = vshrl.u32 %v12069_v53, 16 }
  0xdf   : > { %10303 = vmatprep.mubr.msk.bf16.mxu0 %vm15391_vm0, %v1672_v42  ;;  %v2428_v42 = vshrl.u32 %v12060_v47, 16 }
  0xe0   : > { %v2425_v40 = vrot.slane %v2423_v38, 2  ;;  %v2439_v1 = vrot.slane %v2437_v45, 1 }
  0xe1   : > { %v2430_v41 = vrot.slane %v2428_v42, 1 }
  0xe3   : > { %v2434_v54 = vor.u32 %v2433_v50, %v2430_v41  ;;  %v2503_v41 = vshll.u32 %v12119_v17, 16 }
  0xe6   : > { %10304 = vmatmul.mubr.msk.bf16.gmra.mrb[28].mxu0 %vm15391_vm0, %v1674_v18  ;;  %v11618_v18 = vld [vmem:[%s11804_s29 + $0x98] ss:$0 sps:$4 sm:$0x11]  }
  0xe7   : > { %10307 = vmatprep.mubr.msk.bf16.mxu0 %vm15391_vm0, %v1676_v28  ;;  %v2422_v28 = vrot.slane %v2420_v37, 1  ;;  %v2478_v37 = vrot.slane %v2476_v39, 2 }
  0xe9   : > { %v2426_v57 = vor.u32 %v2425_v40, %v2422_v28  ;;  %v2500_v40 = vshrl.u32 %v12119_v17, 16 }
  0xee   : > { %10308 = vmatmul.mubr.msk.bf16.gmra.mrb[32].mxu0 %vm15391_vm0, %v1678_v52  ;;  %v2128_v52 = vrot.slane %v11618_v18, 1  ;;  %v2494_v18 = vshll.u32 %v12115_v14, 16 }
  0xef   : > { %10315 = vmatprep.mubr.msk.bf16.mxu0 %vm15391_vm0, %v2095_v55  ;;  %v2440_v55 = vshll.u32 %v12069_v53, 16 }
  0xf0   : > { %v2496_v45 = vrot.slane %v2494_v18, 2 }
  0xf1   : > { %v2442_v2 = vrot.slane %v2440_v55, 2 }
  0xf3   : > { %v2443_v36 = vor.u32 %v2442_v2, %v2439_v1  ;;  %v2518_v2 = vshrl.u32 %v12131_v22, 16 }
  0xf6   : > { %10316 = vmatmul.mubr.msk.bf16.vlgmr.msra.gmra.mrb[0].mxu0 %vm15391_vm0, %v2097_v58  ;;  %v2446_v58 = vshrl.u32 %v12073_v56, 16 }
  0xf7   : > { %10352 = vmatpush3.bf16.msra.mxu0 %v12011_v7  ;;  %10319 = vmatprep.mubr.msk.bf16.mxu0 %vm15391_vm0, %v2099_v61  ;;  %v2112_v7 = vrot.slane %v12127_v6, 1  ;;  %v2449_v61 = vshll.u32 %v12073_v56, 16 }
  0xf8   : > { %10353 = vmatprep.subr.bf16.mxu0 %v11610_v0 }
  0xf9   : > { %v2113_v24 = vsel %vm15387_vm2, %v2110_v19, %v2112_v7  ;;  %v2115_v23 = vsel %vm15387_vm2, %v2112_v7, %v2114_v13  ;;  %v2451_v5 = vrot.slane %v2449_v61, 2  ;;  %v2464_v19 = vshrl.u32 %v12085_v62, 16 }
  0xfa   : > { %v2509_v61 = vshrl.u32 %v12127_v6, 16 }
  0xfb   : > { %10354 = vmatpush3.bf16.msra.mxu0 %v11610_v0  ;;  %v2129_v0 = vsel %vm15387_vm2, %v2126_v51, %v2128_v52 }
  0xfc   : > { %10391 = vmatprep.subr.bf16.mxu0 %v12098_v3 }
  0xfe   : > { %10320 = vmatmul.mubr.msk.bf16.gmra.mrb[4].mxu0 %vm15391_vm0, %v2101_v8  ;;  %v2435_v8 = vsel %vm15390_vm3, %v2426_v57, %v2434_v54  ;;  %v2502_v57 = vrot.slane %v2500_v40, 1  ;;  %v2563_v40 = vshrl.u32 %v12163_v46, 16 }
  0xff   : > { %10323 = vmatprep.mubr.msk.bf16.mxu0 %vm15391_vm0, %v2103_v10  ;;  %v2448_v10 = vrot.slane %v2446_v58, 1 }
 0x101   : > { %v2452_v4 = vor.u32 %v2451_v5, %v2448_v10  ;;  %v2511_v5 = vrot.slane %v2509_v61, 1 }
 0x106   : > { %10324 = vmatmul.mubr.msk.bf16.gmra.mrb[8].mxu0 %vm15391_vm0, %v2105_v12  ;;  %v2455_v12 = vshrl.u32 %v12081_v59, 16 }
 0x107   : > { %10327 = vmatprep.mubr.msk.bf16.mxu0 %vm15391_vm0, %v2107_v16  ;;  %v2458_v16 = vshll.u32 %v12081_v59, 16 }
 0x108   : > { %v2457_v7 = vrot.slane %v2455_v12, 1 }
 0x109   : > { %v2460_v13 = vrot.slane %v2458_v16, 2  ;;  %v2520_v16 = vrot.slane %v2518_v2, 1 }
 0x10e   : > { %10328 = vmatmul.mubr.msk.bf16.gmra.mrb[12].mxu0 %vm15391_vm0, %v2109_v20  ;;  %v2467_v20 = vshll.u32 %v12085_v62, 16 }
 0x10f   : > { %10331 = vmatprep.mubr.msk.bf16.mxu0 %vm15391_vm0, %v2111_v21  ;;  %v2444_v21 = vsel %vm15390_vm3, %v2434_v54, %v2443_v36  ;;  %v2505_v54 = vrot.slane %v2503_v41, 2  ;;  %v2566_v41 = vshll.u32 %v12163_v46, 16 }
 0x110   : > { %v2469_v26 = vrot.slane %v2467_v20, 2  ;;  %v2527_v20 = vshrl.u32 %v12139_v15, 16 }
 0x111   : > { %v2506_v1 = vor.u32 %v2505_v54, %v2502_v57  ;;  %v2565_v57 = vrot.slane %v2563_v40, 1  ;;  %v2568_v54 = vrot.slane %v2566_v41, 2  ;;  %v12328_v40 = vld [vmem:[%s11804_s29 + $0x14] sm:$0xf] }
 0x113   : > { %v2569_v2 = vor.u32 %v2568_v54, %v2565_v57  ;;  %v12349_v54 = vld [vmem:[%s11804_s29 + $0x28] sm:$0xff]  }
 0x116   : > { %10332 = vmatmul.mubr.msk.bf16.gmra.mrb[16].mxu0 %vm15391_vm0, %v2113_v24  ;;  %v2453_v24 = vsel %vm15390_vm3, %v2443_v36, %v2452_v4 }
 0x117   : > { %10335 = vmatprep.mubr.msk.bf16.mxu0 %vm15391_vm0, %v2115_v23  ;;  %v2466_v23 = vrot.slane %v2464_v19, 1 }
 0x119   : > { %v2470_v32 = vor.u32 %v2469_v26, %v2466_v23  ;;  %v2529_v26 = vrot.slane %v2527_v20, 1 }
 0x11e   : > { %10336 = vmatmul.mubr.msk.bf16.gmra.mrb[20].mxu0 %vm15391_vm0, %v2117_v29  ;;  %v2461_v29 = vor.u32 %v2460_v13, %v2457_v7  ;;  %v2536_v13 = vshrl.u32 %v12143_v25, 16 }
 0x11f   : > { %10339 = vmatprep.mubr.msk.bf16.mxu0 %vm15391_vm0, %v2119_v31  ;;  %v2473_v31 = vshrl.u32 %v12102_v9, 16 }
 0x120   : > { %v2471_v38 = vsel %vm15390_vm3, %v2461_v29, %v2470_v32 }
 0x121   : > { %v2475_v51 = vrot.slane %v2473_v31, 1  ;;  %v2538_v31 = vrot.slane %v2536_v13, 1  ;;  %v2879_v13 = vrot.slane %v12060_v47, 2  ;;  %v11624_v47 = vld [vmem:[%s15381_s1 + $0x68] sm:$0xff]  }
 0x126   : > { %10340 = vmatmul.mubr.msk.bf16.gmra.mrb[24].mxu0 %vm15391_vm0, %v2121_v33  ;;  %v2482_v33 = vshrl.u32 %v12106_v11, 16 }
 0x127   : > { %10343 = vmatprep.mubr.msk.bf16.mxu0 %vm15391_vm0, %v2123_v35  ;;  %v2485_v35 = vshll.u32 %v12106_v11, 16 }
 0x128   : > { %v2484_v42 = vrot.slane %v2482_v33, 1  ;;  %v2545_v33 = vshrl.u32 %v12151_v30, 16 }
 0x129   : > { %v2487_v60 = vrot.slane %v2485_v35, 2  ;;  %v2548_v35 = vshll.u32 %v12151_v30, 16 }
 0x12b   : > { %v2488_v28 = vor.u32 %v2487_v60, %v2484_v42  ;;  %v2547_v42 = vrot.slane %v2545_v33, 1  ;;  %v2550_v60 = vrot.slane %v2548_v35, 2  ;;  %v2893_v35 = vrot.slane %v12115_v14, 2 }
 0x12e   : > { %10344 = vmatmul.mubr.msk.bf16.gmra.mrb[28].mxu0 %vm15391_vm0, %v2125_v63  ;;  %v2479_v63 = vor.u32 %v2478_v37, %v2475_v51  ;;  %v2554_v51 = vshrl.u32 %v12155_v34, 16  ;;  %v2557_v37 = vshll.u32 %v12155_v34, 16 }
 0x12f   : > { %10347 = vmatprep.mubr.msk.bf16.mxu0 %vm15391_vm0, %v2127_v43  ;;  %v2491_v43 = vshrl.u32 %v12115_v14, 16  ;;  %v2901_v14 = vrot.slane %v12139_v15, 2 }
 0x130   : > { %v2480_v50 = vsel %vm15390_vm3, %v2470_v32, %v2479_v63  ;;  %v2489_v55 = vsel %vm15390_vm3, %v2479_v63, %v2488_v28  ;;  %v2559_v18 = vrot.slane %v2557_v37, 2 }
 0x131   : > { %v2493_v52 = vrot.slane %v2491_v43, 1  ;;  %v2556_v43 = vrot.slane %v2554_v51, 1 }
 0x133   : > { %v2497_v58 = vor.u32 %v2496_v45, %v2493_v52  ;;  %v2572_v52 = vshrl.u32 %v12166_v48, 16  ;;  %v2575_v45 = vshll.u32 %v12166_v48, 16 }
 0x135   : > { %v2498_v10 = vsel %vm15390_vm3, %v2488_v28, %v2497_v58  ;;  %v2507_v12 = vsel %vm15390_vm3, %v2497_v58, %v2506_v1  ;;  %v2551_v28 = vor.u32 %v2550_v60, %v2547_v42  ;;  %v12254_v58 = vld [vmem:[%s11804_s29 + $0x98] ss:$0 sps:$4 sm:$0x33]  }
 0x136   : > { %10348 = vmatmul.mubr.msk.bf16.gmra.mrb[32].mxu0 %vm15391_vm0, %v2129_v0  ;;  %v2512_v0 = vshll.u32 %v12127_v6, 16 }
 0x137   : > { %10355 = vmatprep.mubr.msk.bf16.mxu0 %vm15391_vm0, %v2435_v8  ;;  %v2521_v8 = vshll.u32 %v12131_v22, 16 }
 0x138   : > { %v2514_v36 = vrot.slane %v2512_v0, 2  ;;  %v2574_v0 = vrot.slane %v2572_v52, 1 }
 0x13a   : > { %v2515_v19 = vor.u32 %v2514_v36, %v2511_v5  ;;  %v2868_v36 = vld [vmem:[%s11804_s29 + $0x8] sm:$0xc] }
 0x13b   : > { %v9282_v20 = vcombine.low %v2868_v36, %v12052_v44  ;;  %v2883_v44 = vrot.slane %v12073_v56, 2  ;;  %v12287_v56 = vld [vmem:[%s15381_s1 + $0x70] sm:$0xff]  }
 0x13c   : > { %v2516_v23 = vsel %vm15390_vm3, %v2506_v1, %v2515_v19  ;;  %v2577_v1 = vrot.slane %v2575_v45, 2 }
 0x13e   : > { %10356 = vmatmul.mubr.msk.bf16.vlgmr.msra.gmra.mrb[0].mxu0 %vm15391_vm0, %v2444_v21  ;;  %v2530_v21 = vshll.u32 %v12139_v15, 16  ;;  %v2578_v5 = vor.u32 %v2577_v1, %v2574_v0  ;;  %v2909_v15 = vrot.slane %v12163_v46, 2  ;;  %v2913_v46 = vrot.slane %v12254_v58, 2  ;;  %v12357_v1 = vld [vmem:[%s11804_s29 + $0x30] sm:$0xff]  }
 0x13f   : > { %10392 = vmatpush3.bf16.msra.mxu0 %v12098_v3  ;;  %10359 = vmatprep.mubr.msk.bf16.mxu0 %vm15391_vm0, %v2453_v24  ;;  %v2462_v3 = vsel %vm15390_vm3, %v2452_v4, %v2461_v29  ;;  %v2523_v4 = vrot.slane %v2521_v8, 2  ;;  %v2539_v24 = vshll.u32 %v12143_v25, 16  ;;  %v2581_v8 = vshrl.u32 %v12254_v58, 16 }
 0x140   : > { %10393 = vmatprep.subr.bf16.mxu0 %v11620_v27 }
 0x141   : > { %v2524_v7 = vor.u32 %v2523_v4, %v2520_v16  ;;  %v2541_v39 = vrot.slane %v2539_v24, 2  ;;  %v2583_v16 = vrot.slane %v2581_v8, 1  ;;  %v12361_v8 = vld [vmem:[%s11804_s29 + $0x38] sm:$0xff]  }
 0x142   : > { %v3338_v36 = vrot.slane %v12361_v8, 2 }
 0x143   : > { %10394 = vmatpush3.bf16.msra.mxu0 %v11620_v27  ;;  %v2532_v27 = vrot.slane %v2530_v21, 2  ;;  %v2525_v29 = vsel %vm15390_vm3, %v2515_v19, %v2524_v7  ;;  %v2579_v19 = vsel %vm15390_vm3, %v2569_v2, %v2578_v5 }
 0x144   : > { %10431 = vmatprep.subr.bf16.mxu0 %v12209_v49 }
 0x145   : > { %v2533_v32 = vor.u32 %v2532_v27, %v2529_v26  ;;  %v2881_v26 = vrot.slane %v12069_v53, 2  ;;  %v2887_v53 = vrot.slane %v12085_v62, 2  ;;  %v2891_v62 = vrot.slane %v12106_v11, 2 }
 0x146   : > { %10360 = vmatmul.mubr.msk.bf16.gmra.mrb[4].mxu0 %vm15391_vm0, %v2462_v3  ;;  %v2542_v3 = vor.u32 %v2541_v39, %v2538_v31  ;;  %v2885_v31 = vrot.slane %v12081_v59, 2  ;;  %v2889_v59 = vrot.slane %v12102_v9, 2  ;;  %v2897_v9 = vrot.slane %v12127_v6, 2 }
 0x147   : > { %10363 = vmatprep.mubr.msk.bf16.mxu0 %vm15391_vm0, %v2471_v38  ;;  %v2534_v38 = vsel %vm15390_vm3, %v2524_v7, %v2533_v32  ;;  %v2878_v7 = vrot.slane %v9282_v20, 2  ;;  %v2882_v27 = vsel %vm15389_vm4, %v2879_v13, %v2881_v26  ;;  %v2894_v51 = vsel %vm15389_vm4, %v2891_v62, %v2893_v35  ;;  %v12382_v20 = vld [vmem:[%s11804_s29 + $0x48] sm:$0xff]  }
 0x148   : > { %v2543_v63 = vsel %vm15390_vm3, %v2533_v32, %v2542_v3  ;;  %v2886_v39 = vsel %vm15389_vm4, %v2883_v44, %v2885_v31  ;;  %v2888_v32 = vsel %vm15389_vm4, %v2885_v31, %v2887_v53  ;;  %v2892_v33 = vsel %vm15389_vm4, %v2889_v59, %v2891_v62 }
 0x149   : > { %v2899_v11 = vrot.slane %v12131_v22, 2  ;;  %v2905_v22 = vrot.slane %v12151_v30, 2 }
 0x14b   : > { %v2900_v42 = vsel %vm15389_vm4, %v2897_v9, %v2899_v11  ;;  %v2902_v60 = vsel %vm15389_vm4, %v2899_v11, %v2901_v14 }
 0x14e   : > { %10364 = vmatmul.mubr.msk.bf16.gmra.mrb[8].mxu0 %vm15391_vm0, %v2480_v50  ;;  %v2560_v50 = vor.u32 %v2559_v18, %v2556_v43 }
 0x14f   : > { %10367 = vmatprep.mubr.msk.bf16.mxu0 %vm15391_vm0, %v2489_v55  ;;  %v2552_v55 = vsel %vm15390_vm3, %v2542_v3, %v2551_v28  ;;  %v2895_v3 = vrot.slane %v12119_v17, 2  ;;  %v2903_v17 = vrot.slane %v12143_v25, 2  ;;  %v2911_v25 = vrot.slane %v12166_v48, 2 }
 0x150   : > { %v2561_v61 = vsel %vm15390_vm3, %v2551_v28, %v2560_v50  ;;  %v3194_v28 = vld [vmem:[%s11804_s29 + $0x10] sm:$0xc] }
 0x151   : > { %v2896_v37 = vsel %vm15389_vm4, %v2893_v35, %v2895_v3  ;;  %v2904_v6 = vsel %vm15389_vm4, %v2901_v14, %v2903_v17  ;;  %v2906_v43 = vsel %vm15389_vm4, %v2903_v17, %v2905_v22  ;;  %v12333_v41 = vcombine.low %v3194_v28, %v12328_v40  ;;  %v12439_v14 = vld [vmem:[%s11804_s29 + $0x90] sm:$0xff]   ;;  %v12442_v17 = vld [vmem:[%s11804_s29 + $0x98] sm:$0xff]  }
 0x152   : > { %v2914_v45 = vsel %vm15389_vm4, %v2911_v25, %v2913_v46 }
 0x153   : > { %v3329_v48 = vrot.slane %v12333_v41, 2 }
 0x156   : > { %10368 = vmatmul.mubr.msk.bf16.gmra.mrb[12].mxu0 %vm15391_vm0, %v2498_v10  ;;  %v2584_v10 = vshll.u32 %v12254_v58, 16  ;;  %v3334_v58 = vrot.slane %v12349_v54, 2 }
 0x157   : > { %10371 = vmatprep.mubr.msk.bf16.mxu0 %vm15391_vm0, %v2507_v12  ;;  %v2570_v12 = vsel %vm15390_vm3, %v2560_v50, %v2569_v2  ;;  %v12336_v50 = vld [vmem:[%s11804_s29 + $0x18] sm:$0xff]  }
 0x158   : > { %v2586_v4 = vrot.slane %v2584_v10, 2  ;;  %v3330_v52 = vrot.slane %v12336_v50, 2  ;;  %v11637_v10 = vld [vmem:[%s15381_s1 + $0x78] sm:$0xff]  }
 0x15a   : > { %v2587_v21 = vor.u32 %v2586_v4, %v2583_v16  ;;  %v3331_v57 = vsel %vm15389_vm4, %v3329_v48, %v3330_v52  ;;  %v12378_v4 = vld [vmem:[%s11804_s29 + $0x40] sm:$0xff]  }
 0x15c   : > { %v2588_v24 = vsel %vm15390_vm3, %v2578_v5, %v2587_v21  ;;  %v3336_v5 = vrot.slane %v12357_v1, 2  ;;  %v3340_v21 = vrot.slane %v12378_v4, 2 }
 0x15e   : > { %10372 = vmatmul.mubr.msk.bf16.gmra.mrb[16].mxu0 %vm15391_vm0, %v2516_v23  ;;  %v2880_v23 = vsel %vm15389_vm4, %v2878_v7, %v2879_v13  ;;  %v3337_v16 = vsel %vm15389_vm4, %v3334_v58, %v3336_v5  ;;  %v3342_v7 = vrot.slane %v12382_v20, 2  ;;  %v3341_v13 = vsel %vm15389_vm4, %v3338_v36, %v3340_v21 }
 0x15f   : > { %10375 = vmatprep.mubr.msk.bf16.mxu0 %vm15391_vm0, %v2525_v29  ;;  %v2884_v29 = vsel %vm15389_vm4, %v2881_v26, %v2883_v44  ;;  %v12395_v26 = vld [vmem:[%s11804_s29 + $0x58] sm:$0xff]  }
 0x166   : > { %10376 = vmatmul.mubr.msk.bf16.gmra.mrb[20].mxu0 %vm15391_vm0, %v2534_v38  ;;  %v2898_v38 = vsel %vm15389_vm4, %v2895_v3, %v2897_v9  ;;  %v12431_v9 = vld [vmem:[%s11804_s29 + $0x88] sm:$0xff]  }
 0x167   : > { %10379 = vmatprep.mubr.msk.bf16.mxu0 %vm15391_vm0, %v2543_v63  ;;  %v2907_v63 = vrot.slane %v12155_v34, 2  ;;  %v2912_v34 = vsel %vm15389_vm4, %v2909_v15, %v2911_v25 }
 0x169   : > { %v2908_v18 = vsel %vm15389_vm4, %v2905_v22, %v2907_v63  ;;  %v2910_v30 = vsel %vm15389_vm4, %v2907_v63, %v2909_v15  ;;  %v3362_v22 = vrot.slane %v12442_v17, 2  ;;  %v3656_v63 = vshrl.u32 %v12333_v41, 16 }
 0x16a   : > { %v3667_v15 = vshll.u32 %v12336_v50, 16 }
 0x16e   : > { %10380 = vmatmul.mubr.msk.bf16.gmra.mrb[24].mxu0 %vm15391_vm0, %v2552_v55  ;;  %v12345_v55 = vld [vmem:[%s11804_s29 + $0x20] sm:$0xff]  }
 0x16f   : > { %10383 = vmatprep.mubr.msk.bf16.mxu0 %vm15391_vm0, %v2561_v61  ;;  %v3332_v61 = vrot.slane %v12345_v55, 2 }
 0x171   : > { %v3333_v0 = vsel %vm15389_vm4, %v3330_v52, %v3332_v61  ;;  %v3335_v2 = vsel %vm15389_vm4, %v3332_v61, %v3334_v58  ;;  %v3669_v52 = vrot.slane %v3667_v15, 3 }
 0x176   : > { %10384 = vmatmul.mubr.msk.bf16.gmra.mrb[28].mxu0 %vm15391_vm0, %v2570_v12  ;;  %v12374_v12 = vld [vmem:[%s15381_s1 + $0x80] sm:$0xff]  }
 0x177   : > { %10387 = vmatprep.mubr.msk.bf16.mxu0 %vm15391_vm0, %v2579_v19  ;;  %v3339_v19 = vsel %vm15389_vm4, %v3336_v5, %v3338_v36 }
 0x17e   : > { %10388 = vmatmul.mubr.msk.bf16.gmra.mrb[32].mxu0 %vm15391_vm0, %v2588_v24  ;;  %v12391_v24 = vld [vmem:[%s11804_s29 + $0x50] sm:$0xff]  }
 0x17f   : > { %10395 = vmatprep.mubr.msk.bf16.mxu0 %vm15391_vm0, %v2880_v23  ;;  %v3343_v23 = vsel %vm15389_vm4, %v3340_v21, %v3342_v7  ;;  %v3344_v44 = vrot.slane %v12391_v24, 2 }
 0x186   : > { %10396 = vmatmul.mubr.msk.bf16.vlgmr.msra.gmra.mrb[0].mxu0 %vm15391_vm0, %v2882_v27  ;;  %v3346_v27 = vrot.slane %v12395_v26, 2 }
 0x187   : > { %10432 = vmatpush3.bf16.msra.mxu0 %v12209_v49  ;;  %10399 = vmatprep.mubr.msk.bf16.mxu0 %vm15391_vm0, %v2884_v29  ;;  %v2890_v49 = vsel %vm15389_vm4, %v2887_v53, %v2889_v59  ;;  %v3345_v29 = vsel %vm15389_vm4, %v3342_v7, %v3344_v44  ;;  %v12407_v53 = vld [vmem:[%s11804_s29 + $0x68] sm:$0xff]   ;;  %v12415_v59 = vld [vmem:[%s11804_s29 + $0x70] sm:$0xff]  }
 0x188   : > { %10433 = vmatprep.subr.bf16.mxu0 %v11624_v47  ;;  %v3347_v31 = vsel %vm15389_vm4, %v3344_v44, %v3346_v27 }
 0x18b   : > { %10434 = vmatpush3.bf16.msra.mxu0 %v11624_v47  ;;  %v12403_v47 = vld [vmem:[%s11804_s29 + $0x60] sm:$0xff]  }
 0x18c   : > { %10471 = vmatprep.subr.bf16.mxu0 %v12287_v56 }
 0x18e   : > { %10400 = vmatmul.mubr.msk.bf16.gmra.mrb[4].mxu0 %vm15391_vm0, %v2886_v39  ;;  %v3350_v39 = vrot.slane %v12407_v53, 2 }
 0x18f   : > { %10403 = vmatprep.mubr.msk.bf16.mxu0 %vm15391_vm0, %v2888_v32 }
 0x196   : > { %10404 = vmatmul.mubr.msk.bf16.gmra.mrb[8].mxu0 %vm15391_vm0, %v2890_v49  ;;  %v12419_v49 = vld [vmem:[%s11804_s29 + $0x78] sm:$0xff]  }
 0x197   : > { %10407 = vmatprep.mubr.msk.bf16.mxu0 %vm15391_vm0, %v2892_v33  ;;  %v3352_v33 = vrot.slane %v12415_v59, 2  ;;  %v3354_v35 = vrot.slane %v12419_v49, 2 }
 0x199   : > { %v3353_v3 = vsel %vm15389_vm4, %v3350_v39, %v3352_v33 }
 0x19e   : > { %10408 = vmatmul.mubr.msk.bf16.gmra.mrb[12].mxu0 %vm15391_vm0, %v2894_v51  ;;  %v12427_v51 = vld [vmem:[%s11804_s29 + $0x80] sm:$0xff]  }
 0x19f   : > { %10411 = vmatprep.mubr.msk.bf16.mxu0 %vm15391_vm0, %v2896_v37  ;;  %v3355_v37 = vsel %vm15389_vm4, %v3352_v33, %v3354_v35  ;;  %v3356_v11 = vrot.slane %v12427_v51, 2 }
 0x1a6   : > { %10412 = vmatmul.mubr.msk.bf16.gmra.mrb[16].mxu0 %vm15391_vm0, %v2898_v38  ;;  %v3358_v38 = vrot.slane %v12431_v9, 2 }
 0x1a7   : > { %10415 = vmatprep.mubr.msk.bf16.mxu0 %vm15391_vm0, %v2900_v42  ;;  %v3357_v42 = vsel %vm15389_vm4, %v3354_v35, %v3356_v11  ;;  %v11647_v35 = vld [vmem:[%s15381_s1 + $0x88] sm:$0xff]  }
 0x1ae   : > { %10416 = vmatmul.mubr.msk.bf16.gmra.mrb[20].mxu0 %vm15391_vm0, %v2902_v60  ;;  %v3359_v60 = vsel %vm15389_vm4, %v3356_v11, %v3358_v38  ;;  %v3712_v11 = vshll.u32 %v12378_v4, 16 }
 0x1af   : > { %10419 = vmatprep.mubr.msk.bf16.mxu0 %vm15391_vm0, %v2904_v6  ;;  %v3360_v6 = vrot.slane %v12439_v14, 2 }
 0x1b1   : > { %v3361_v25 = vsel %vm15389_vm4, %v3358_v38, %v3360_v6  ;;  %v3363_v28 = vsel %vm15389_vm4, %v3360_v6, %v3362_v22 }
 0x1b6   : > { %10420 = vmatmul.mubr.msk.bf16.gmra.mrb[24].mxu0 %vm15391_vm0, %v2906_v43  ;;  %v3659_v43 = vshll.u32 %v12333_v41, 16  ;;  %v3673_v41 = vshrl.u32 %v12345_v55, 16 }
 0x1b7   : > { %10423 = vmatprep.mubr.msk.bf16.mxu0 %vm15391_vm0, %v2908_v18  ;;  %v3664_v18 = vshrl.u32 %v12336_v50, 16 }
 0x1b8   : > { %v3661_v46 = vrot.slane %v3659_v43, 3  ;;  %v3675_v5 = vrot.slane %v3673_v41, 2 }
 0x1b9   : > { %v3666_v48 = vrot.slane %v3664_v18, 2 }
 0x1bb   : > { %v3670_v58 = vor.u32 %v3669_v52, %v3666_v48 }
 0x1be   : > { %10424 = vmatmul.mubr.msk.bf16.gmra.mrb[28].mxu0 %vm15391_vm0, %v2910_v30  ;;  %v11645_v30 = vld [vmem:[%s11804_s29 + $0xa0] ss:$0 sps:$4 sm:$0x33]  }
 0x1bf   : > { %10427 = vmatprep.mubr.msk.bf16.mxu0 %vm15391_vm0, %v2912_v34  ;;  %v3658_v34 = vrot.slane %v3656_v63, 2  ;;  %v3714_v63 = vrot.slane %v3712_v11, 3 }
 0x1c1   : > { %v3662_v61 = vor.u32 %v3661_v46, %v3658_v34  ;;  %v3736_v34 = vshrl.u32 %v12395_v26, 16  ;;  %v3739_v46 = vshll.u32 %v12395_v26, 16 }
 0x1c6   : > { %10428 = vmatmul.mubr.msk.bf16.gmra.mrb[32].mxu0 %vm15391_vm0, %v2914_v45  ;;  %v3364_v45 = vrot.slane %v11645_v30, 2 }
 0x1c7   : > { %10435 = vmatprep.mubr.msk.bf16.mxu0 %vm15391_vm0, %v3331_v57  ;;  %v3676_v57 = vshll.u32 %v12345_v55, 16 }
 0x1c9   : > { %v3678_v36 = vrot.slane %v3676_v57, 3  ;;  %v3738_v57 = vrot.slane %v3736_v34, 2  ;;  %v3802_v34 = vshll.u32 %v12439_v14, 16 }
 0x1cb   : > { %v3679_v7 = vor.u32 %v3678_v36, %v3675_v5  ;;  %v3754_v5 = vshrl.u32 %v12407_v53, 16  ;;  %v3757_v36 = vshll.u32 %v12407_v53, 16 }
 0x1ce   : > { %10436 = vmatmul.mubr.msk.bf16.vlgmr.msra.gmra.mrb[0].mxu0 %vm15391_vm0, %v3333_v0  ;;  %v3682_v0 = vshrl.u32 %v12349_v54, 16 }
 0x1cf   : > { %10472 = vmatpush3.bf16.msra.mxu0 %v12287_v56  ;;  %10439 = vmatprep.mubr.msk.bf16.mxu0 %vm15391_vm0, %v3335_v2  ;;  %v3348_v56 = vrot.slane %v12403_v47, 2  ;;  %v3685_v2 = vshll.u32 %v12349_v54, 16 }
 0x1d0   : > { %10473 = vmatprep.subr.bf16.mxu0 %v11637_v10 }
 0x1d1   : > { %v3349_v32 = vsel %vm15389_vm4, %v3346_v27, %v3348_v56  ;;  %v3351_v62 = vsel %vm15389_vm4, %v3348_v56, %v3350_v39  ;;  %v3687_v21 = vrot.slane %v3685_v2, 3  ;;  %v3700_v27 = vshrl.u32 %v12361_v8, 16 }
 0x1d2   : > { %v3748_v2 = vshll.u32 %v12403_v47, 16 }
 0x1d3   : > { %10474 = vmatpush3.bf16.msra.mxu0 %v11637_v10  ;;  %v3365_v10 = vsel %vm15389_vm4, %v3362_v22, %v3364_v45 }
 0x1d4   : > { %10511 = vmatprep.subr.bf16.mxu0 %v12374_v12 }
 0x1d6   : > { %10440 = vmatmul.mubr.msk.bf16.gmra.mrb[4].mxu0 %vm15391_vm0, %v3337_v16  ;;  %v3671_v16 = vsel %vm15388_vm5, %v3662_v61, %v3670_v58  ;;  %v3741_v61 = vrot.slane %v3739_v46, 3 }
 0x1d7   : > { %10443 = vmatprep.mubr.msk.bf16.mxu0 %vm15391_vm0, %v3339_v19  ;;  %v3684_v19 = vrot.slane %v3682_v0, 2  ;;  %v3745_v0 = vshrl.u32 %v12403_v47, 16 }
 0x1d9   : > { %v3688_v44 = vor.u32 %v3687_v21, %v3684_v19  ;;  %v3747_v19 = vrot.slane %v3745_v0, 2  ;;  %v3750_v21 = vrot.slane %v3748_v2, 3 }
 0x1de   : > { %10444 = vmatmul.mubr.msk.bf16.gmra.mrb[8].mxu0 %vm15391_vm0, %v3341_v13  ;;  %v3691_v13 = vshrl.u32 %v12357_v1, 16 }
 0x1df   : > { %10447 = vmatprep.mubr.msk.bf16.mxu0 %vm15391_vm0, %v3343_v23  ;;  %v3694_v23 = vshll.u32 %v12357_v1, 16 }
 0x1e0   : > { %v3693_v56 = vrot.slane %v3691_v13, 2  ;;  %v3756_v13 = vrot.slane %v3754_v5, 2 }
 0x1e1   : > { %v3696_v39 = vrot.slane %v3694_v23, 3  ;;  %v3759_v23 = vrot.slane %v3757_v36, 3 }
 0x1e6   : > { %10448 = vmatmul.mubr.msk.bf16.gmra.mrb[12].mxu0 %vm15391_vm0, %v3345_v29  ;;  %v3703_v29 = vshll.u32 %v12361_v8, 16 }
 0x1e7   : > { %10451 = vmatprep.mubr.msk.bf16.mxu0 %vm15391_vm0, %v3347_v31  ;;  %v3680_v31 = vsel %vm15388_vm5, %v3670_v58, %v3679_v7 }
 0x1e8   : > { %v3705_v33 = vrot.slane %v3703_v29, 3  ;;  %v3766_v29 = vshll.u32 %v12415_v59, 16 }
 0x1ee   : > { %10452 = vmatmul.mubr.msk.bf16.gmra.mrb[16].mxu0 %vm15391_vm0, %v3349_v32  ;;  %v3689_v32 = vsel %vm15388_vm5, %v3679_v7, %v3688_v44 }
 0x1ef   : > { %10455 = vmatprep.mubr.msk.bf16.mxu0 %vm15391_vm0, %v3351_v62  ;;  %v3702_v62 = vrot.slane %v3700_v27, 2  ;;  %v3763_v27 = vshrl.u32 %v12415_v59, 16 }
 0x1f1   : > { %v3706_v38 = vor.u32 %v3705_v33, %v3702_v62  ;;  %v3765_v62 = vrot.slane %v3763_v27, 2  ;;  %v3768_v33 = vrot.slane %v3766_v29, 3 }
 0x1f3   : > { %v3769_v11 = vor.u32 %v3768_v33, %v3765_v62 }
 0x1f6   : > { %10456 = vmatmul.mubr.msk.bf16.gmra.mrb[20].mxu0 %vm15391_vm0, %v3353_v3  ;;  %v3697_v3 = vor.u32 %v3696_v39, %v3693_v56  ;;  %v3772_v56 = vshrl.u32 %v12419_v49, 16  ;;  %v3775_v39 = vshll.u32 %v12419_v49, 16 }
 0x1f7   : > { %10459 = vmatprep.mubr.msk.bf16.mxu0 %vm15391_vm0, %v3355_v37  ;;  %v3709_v37 = vshrl.u32 %v12378_v4, 16 }
 0x1f8   : > { %v3698_v6 = vsel %vm15388_vm5, %v3688_v44, %v3697_v3  ;;  %v3751_v44 = vor.u32 %v3750_v21, %v3747_v19  ;;  %v4104_v19 = vld [vmem:[%s11804_s29 + $0x10] sm:$0x8] }
 0x1f9   : > { %v3711_v22 = vrot.slane %v3709_v37, 2  ;;  %v3777_v37 = vrot.slane %v3775_v39, 3 }
 0x1fb   : > { %v3715_v15 = vor.u32 %v3714_v63, %v3711_v22  ;;  %v3793_v22 = vshll.u32 %v12431_v9, 16 }
 0x1fd   : > { %v3716_v48 = vsel %vm15388_vm5, %v3706_v38, %v3715_v15 }
 0x1fe   : > { %10460 = vmatmul.mubr.msk.bf16.gmra.mrb[24].mxu0 %vm15391_vm0, %v3357_v42  ;;  %v3718_v42 = vshrl.u32 %v12382_v20, 16 }
 0x1ff   : > { %10463 = vmatprep.mubr.msk.bf16.mxu0 %vm15391_vm0, %v3359_v60  ;;  %v3721_v60 = vshll.u32 %v12382_v20, 16 }
 0x200   : > { %v3720_v43 = vrot.slane %v3718_v42, 2  ;;  %v3784_v42 = vshll.u32 %v12427_v51, 16 }
 0x201   : > { %v3723_v18 = vrot.slane %v3721_v60, 3 }
 0x203   : > { %v3724_v30 = vor.u32 %v3723_v18, %v3720_v43  ;;  %v3786_v43 = vrot.slane %v3784_v42, 3 }
 0x205   : > { %v3725_v41 = vsel %vm15388_vm5, %v3715_v15, %v3724_v30 }
 0x206   : > { %10464 = vmatmul.mubr.msk.bf16.gmra.mrb[28].mxu0 %vm15391_vm0, %v3361_v25  ;;  %v3727_v25 = vshrl.u32 %v12391_v24, 16 }
 0x207   : > { %10467 = vmatprep.mubr.msk.bf16.mxu0 %vm15391_vm0, %v3363_v28  ;;  %v3730_v28 = vshll.u32 %v12391_v24, 16 }
 0x208   : > { %v3729_v52 = vrot.slane %v3727_v25, 2  ;;  %v3795_v25 = vrot.slane %v3793_v22, 3 }
 0x209   : > { %v3732_v45 = vrot.slane %v3730_v28, 3 }
 0x20b   : > { %v3733_v58 = vor.u32 %v3732_v45, %v3729_v52  ;;  %v3811_v52 = vshll.u32 %v12442_v17, 16 }
 0x20d   : > { %v3813_v2 = vrot.slane %v3811_v52, 3 }
 0x20e   : > { %10468 = vmatmul.mubr.msk.bf16.gmra.mrb[32].mxu0 %vm15391_vm0, %v3365_v10  ;;  %v3742_v10 = vor.u32 %v3741_v61, %v3738_v57  ;;  %v3804_v57 = vrot.slane %v3802_v34, 3  ;;  %v12524_v61 = vld [vmem:[%s11804_s29 + $0xa0] ss:$0 sps:$4 sm:$0x77]  }
 0x20f   : > { %10475 = vmatprep.mubr.msk.bf16.mxu0 %vm15391_vm0, %v3671_v16  ;;  %v3734_v16 = vsel %vm15388_vm5, %v3724_v30, %v3733_v58  ;;  %v3799_v30 = vshrl.u32 %v12439_v14, 16  ;;  %v3817_v5 = vshrl.u32 %v12524_v61, 16  ;;  %v3820_v36 = vshll.u32 %v12524_v61, 16 }
 0x210   : > { %v3743_v7 = vsel %vm15388_vm5, %v3733_v58, %v3742_v10 }
 0x216   : > { %10476 = vmatmul.mubr.msk.bf16.vlgmr.msra.gmra.mrb[0].mxu0 %vm15391_vm0, %v3680_v31  ;;  %v3760_v31 = vor.u32 %v3759_v23, %v3756_v13  ;;  %v3822_v13 = vrot.slane %v3820_v36, 3 }
 0x217   : > { %10512 = vmatpush3.bf16.msra.mxu0 %v12374_v12  ;;  %10479 = vmatprep.mubr.msk.bf16.mxu0 %vm15391_vm0, %v3689_v32  ;;  %v3707_v12 = vsel %vm15388_vm5, %v3697_v3, %v3706_v38  ;;  %v3752_v32 = vsel %vm15388_vm5, %v3742_v10, %v3751_v44  ;;  %v3774_v3 = vrot.slane %v3772_v56, 2  ;;  %v3781_v38 = vshrl.u32 %v12427_v51, 16 }
 0x218   : > { %10513 = vmatprep.subr.bf16.mxu0 %v11647_v35  ;;  %v3770_v63 = vsel %vm15388_vm5, %v3760_v31, %v3769_v11 }
 0x219   : > { %v3778_v60 = vor.u32 %v3777_v37, %v3774_v3 }
 0x21b   : > { %10514 = vmatpush3.bf16.msra.mxu0 %v11647_v35  ;;  %v3761_v35 = vsel %vm15388_vm5, %v3751_v44, %v3760_v31  ;;  %v3779_v18 = vsel %vm15388_vm5, %v3769_v11, %v3778_v60  ;;  %v9375_v44 = vcombine.low %v4104_v19, %v12328_v40  ;;  %v4115_v31 = vrot.slane %v12336_v50, 3 }
 0x21c   : > { %v4119_v40 = vrot.slane %v12349_v54, 3  ;;  %v4121_v50 = vrot.slane %v12357_v1, 3  ;;  %v4127_v54 = vrot.slane %v12382_v20, 3  ;;  %v4129_v1 = vrot.slane %v12391_v24, 3 }
 0x21d   : > { %v4114_v29 = vrot.slane %v9375_v44, 3  ;;  %v4135_v20 = vrot.slane %v12407_v53, 3  ;;  %v4137_v24 = vrot.slane %v12415_v59, 3  ;;  %v4143_v53 = vrot.slane %v12431_v9, 3 }
 0x21e   : > { %10480 = vmatmul.mubr.msk.bf16.gmra.mrb[4].mxu0 %vm15391_vm0, %v3698_v6  ;;  %v3790_v6 = vshrl.u32 %v12431_v9, 16  ;;  %v4122_v3 = vsel %vm15386_vm6, %v4119_v40, %v4121_v50  ;;  %v4130_v42 = vsel %vm15386_vm6, %v4127_v54, %v4129_v1  ;;  %v4145_v59 = vrot.slane %v12439_v14, 3 }
 0x21f   : > { %10483 = vmatprep.mubr.msk.bf16.mxu0 %vm15391_vm0, %v3707_v12  ;;  %v3783_v12 = vrot.slane %v3781_v38, 2  ;;  %v4116_v39 = vsel %vm15386_vm6, %v4114_v29, %v4115_v31  ;;  %v226_v14 = vlaneseq }
 0x220   : > { %v3792_v15 = vrot.slane %v3790_v6, 2 }
 0x221   : > { %v3787_v28 = vor.u32 %v3786_v43, %v3783_v12 }
 0x222   : > { %v3796_v46 = vor.u32 %v3795_v25, %v3792_v15  ;;  %v4146_v15 = vsel %vm15386_vm6, %v4143_v53, %v4145_v59 }
 0x223   : > { %v3788_v45 = vsel %vm15388_vm5, %v3778_v60, %v3787_v28 }
 0x224   : > { %v3797_v58 = vsel %vm15388_vm5, %v3787_v28, %v3796_v46  ;;  %v11750_v28 = vmov 0  }
 0x225   : > { %4548 = vst.msk [vmem:[#allocation2 + $0x8] sm:$0xf] %vm15393_vm7, %v11750_v28  ;;  %4546 = vst.msk [vmem:[#allocation2] sm:$0xf] %vm15393_vm7, %v11750_v28 }
 0x226   : > { %10484 = vmatmul.mubr.msk.bf16.gmra.mrb[8].mxu0 %vm15391_vm0, %v3716_v48  ;;  %v3808_v48 = vshrl.u32 %v12442_v17, 16  ;;  %4547 = vst.msk [vmem:[#allocation2 + $0x4] sm:$0xf] %vm15393_vm7, %v11750_v28  ;;  %4549 = vst.msk [vmem:[#allocation2 + $0xc] sm:$0xf] %vm15393_vm7, %v11750_v28 }
 0x227   : > { %10487 = vmatprep.mubr.msk.bf16.mxu0 %vm15391_vm0, %v3725_v41  ;;  %v3801_v41 = vrot.slane %v3799_v30, 2  ;;  %4550 = vst.msk [vmem:[#allocation2 + $0x10] sm:$0xf] %vm15393_vm7, %v11750_v28  ;;  %4551 = vst.msk [vmem:[#allocation2 + $0x14] sm:$0xf] %vm15393_vm7, %v11750_v28 }
 0x228   : > { %v3810_v0 = vrot.slane %v3808_v48, 2  ;;  %4552 = vst.msk [vmem:[#allocation2 + $0x18] sm:$0xf] %vm15393_vm7, %v11750_v28  ;;  %4553 = vst.msk [vmem:[#allocation2 + $0x1c] sm:$0xf] %vm15393_vm7, %v11750_v28 }
 0x229   : > { %v3805_v10 = vor.u32 %v3804_v57, %v3801_v41  ;;  %4554 = vst.msk [vmem:[#allocation2 + $0x20] sm:$0xf] %vm15393_vm7, %v11750_v28  ;;  %4555 = vst.msk [vmem:[#allocation2 + $0x24] sm:$0xf] %vm15393_vm7, %v11750_v28 }
 0x22a   : > { %4556 = vst.msk [vmem:[#allocation2 + $0x28] sm:$0xf] %vm15393_vm7, %v11750_v28  ;;  %4557 = vst.msk [vmem:[#allocation2 + $0x2c] sm:$0xf] %vm15393_vm7, %v11750_v28 }
 0x22b   : > { %v3806_v21 = vsel %vm15388_vm5, %v3796_v46, %v3805_v10  ;;  %4558 = vst.msk [vmem:[#allocation2 + $0x30] sm:$0xf] %vm15393_vm7, %v11750_v28  ;;  %4559 = vst.msk [vmem:[#allocation2 + $0x34] sm:$0xf] %vm15393_vm7, %v11750_v28 }
 0x22c   : > { %4560 = vst.msk [vmem:[#allocation2 + $0x38] sm:$0xf] %vm15393_vm7, %v11750_v28  ;;  %4561 = vst.msk [vmem:[#allocation2 + $0x3c] sm:$0xf] %vm15393_vm7, %v11750_v28 }
 0x22d   : > { %4562 = vst.msk [vmem:[#allocation2 + $0x40] sm:$0xf] %vm15393_vm7, %v11750_v28  ;;  %4563 = vst.msk [vmem:[#allocation2 + $0x44] sm:$0xf] %vm15393_vm7, %v11750_v28 }
 0x22e   : > { %10488 = vmatmul.mubr.msk.bf16.gmra.mrb[12].mxu0 %vm15391_vm0, %v3734_v16  ;;  %v3814_v16 = vor.u32 %v3813_v2, %v3810_v0  ;;  %4564 = vst.msk [vmem:[#allocation2 + $0x48] sm:$0xf] %vm15393_vm7, %v11750_v28  ;;  %4565 = vst.msk [vmem:[#allocation2 + $0x4c] sm:$0xf] %vm15393_vm7, %v11750_v28 }
 0x22f   : > { %10491 = vmatprep.mubr.msk.bf16.mxu0 %vm15391_vm0, %v3743_v7  ;;  %v3819_v7 = vrot.slane %v3817_v5, 2  ;;  %4566 = vst.msk [vmem:[#allocation2 + $0x50] sm:$0xf] %vm15393_vm7, %v11750_v28  ;;  %4567 = vst.msk [vmem:[#allocation2 + $0x54] sm:$0xf] %vm15393_vm7, %v11750_v28 }
 0x230   : > { %v3815_v23 = vsel %vm15388_vm5, %v3805_v10, %v3814_v16  ;;  %4568 = vst.msk [vmem:[#allocation2 + $0x58] sm:$0xf] %vm15393_vm7, %v11750_v28  ;;  %4569 = vst.msk [vmem:[#allocation2 + $0x5c] sm:$0xf] %vm15393_vm7, %v11750_v28 }
 0x231   : > { %v3823_v27 = vor.u32 %v3822_v13, %v3819_v7  ;;  %4570 = vst.msk [vmem:[#allocation2 + $0x60] sm:$0xf] %vm15393_vm7, %v11750_v28  ;;  %4571 = vst.msk [vmem:[#allocation2 + $0x64] sm:$0xf] %vm15393_vm7, %v11750_v28  ;;  %v11651_v7 = vld [vmem:[%s15383_s3 + $0x18] sm:$0xff]  }
 0x232   : > { %4572 = vst.msk [vmem:[#allocation2 + $0x68] sm:$0xf] %vm15393_vm7, %v11750_v28  ;;  %4573 = vst.msk [vmem:[#allocation2 + $0x6c] sm:$0xf] %vm15393_vm7, %v11750_v28 }
 0x233   : > { %v3824_v56 = vsel %vm15388_vm5, %v3814_v16, %v3823_v27  ;;  %4574 = vst.msk [vmem:[#allocation2 + $0x70] sm:$0xf] %vm15393_vm7, %v11750_v28  ;;  %4575 = vst.msk [vmem:[#allocation2 + $0x74] sm:$0xf] %vm15393_vm7, %v11750_v28 }
 0x234   : > { %4576 = vst.msk [vmem:[#allocation2 + $0x78] sm:$0xf] %vm15393_vm7, %v11750_v28  ;;  %4577 = vst.msk [vmem:[#allocation2 + $0x7c] sm:$0xf] %vm15393_vm7, %v11750_v28 }
 0x235   : > { %4578 = vst.msk [vmem:[#allocation2 + $0x80] sm:$0xf] %vm15393_vm7, %v11750_v28  ;;  %4579 = vst.msk [vmem:[#allocation2 + $0x84] sm:$0xf] %vm15393_vm7, %v11750_v28 }
 0x236   : > { %10492 = vmatmul.mubr.msk.bf16.gmra.mrb[16].mxu0 %vm15391_vm0, %v3752_v32  ;;  %v4117_v32 = vrot.slane %v12345_v55, 3  ;;  %v4125_v55 = vrot.slane %v12378_v4, 3  ;;  %v4133_v4 = vrot.slane %v12403_v47, 3  ;;  %v4141_v47 = vrot.slane %v12427_v51, 3  ;;  %4580 = vst.msk [vmem:[#allocation2 + $0x88] sm:$0xf] %vm15393_vm7, %v11750_v28 }
 0x237   : > { %10495 = vmatprep.mubr.msk.bf16.mxu0 %vm15391_vm0, %v3761_v35  ;;  %v4123_v35 = vrot.slane %v12361_v8, 3  ;;  %v4131_v8 = vrot.slane %v12395_v26, 3  ;;  %v4139_v26 = vrot.slane %v12419_v49, 3  ;;  %v4147_v49 = vrot.slane %v12442_v17, 3  ;;  %4581 = vst.msk [vmem:[#allocation2 + $0x8c] sm:$0xf] %vm15393_vm7, %v11750_v28 }
 0x238   : > { %v4118_v62 = vsel %vm15386_vm6, %v4115_v31, %v4117_v32  ;;  %v4120_v33 = vsel %vm15386_vm6, %v4117_v32, %v4119_v40  ;;  %v4128_v38 = vsel %vm15386_vm6, %v4125_v55, %v4127_v54  ;;  %v4136_v22 = vsel %vm15386_vm6, %v4133_v4, %v4135_v20  ;;  %4582 = vst.msk [vmem:[#allocation2 + $0x90] sm:$0xf] %vm15393_vm7, %v11750_v28 }
 0x239   : > { %v4124_v37 = vsel %vm15386_vm6, %v4121_v50, %v4123_v35  ;;  %v4126_v11 = vsel %vm15386_vm6, %v4123_v35, %v4125_v55  ;;  %v4132_v60 = vsel %vm15386_vm6, %v4129_v1, %v4131_v8  ;;  %v4134_v6 = vsel %vm15386_vm6, %v4131_v8, %v4133_v4  ;;  %4583 = vst.msk [vmem:[#allocation2 + $0x94] sm:$0xf] %vm15393_vm7, %v11750_v28 }
 0x23a   : > { %v4140_v12 = vsel %vm15386_vm6, %v4137_v24, %v4139_v26  ;;  %v4142_v43 = vsel %vm15386_vm6, %v4139_v26, %v4141_v47  ;;  %v4148_v25 = vsel %vm15386_vm6, %v4145_v59, %v4147_v49  ;;  %v4149_v51 = vrot.slane %v12524_v61, 3  ;;  %4584 = vst.msk [vmem:[#allocation2 + $0x98] sm:$0xf] %vm15393_vm7, %v11750_v28  ;;  %4585 = vst.msk [vmem:[#allocation2 + $0x9c] sm:$0xf] %vm15393_vm7, %v11750_v28  ;;  %v11650_v61 = vld [vmem:[%s15383_s3 + $0x10] sm:$0xff]  }
 0x23b   : > { %4586 = vst.msk [vmem:[#allocation2 + $0xa0] sm:$0xf] %vm15393_vm7, %v11750_v28  ;;  %v12634_v17 = vshrl.u32 %v226_v14, 7  ;;  %10551 = vmatprep.subr.bf16.mxu1 %v11650_v61 }
 0x23c   : > { %v4150_v9 = vsel %vm15386_vm6, %v4147_v49, %v4149_v51  ;;  %10552 = vmatpush3.bf16.msra.mxu1 %v11650_v61 }
 0x23d   : > { %v229_v30 = vadd.s32 16, %v12634_v17  ;;  %v230_v48 = vadd.s32 24, %v12634_v17  ;;  %v228_v52 = vadd.s32 8, %v12634_v17  ;;  %v233_v57 = vadd.s32 48, %v12634_v17  ;;  %10553 = vmatprep.subr.bf16.mxu1 %v11651_v7 }
 0x23e   : > { %10496 = vmatmul.mubr.msk.bf16.gmra.mrb[20].mxu0 %vm15391_vm0, %v3770_v63  ;;  %v4138_v63 = vsel %vm15386_vm6, %v4135_v20, %v4137_v24  ;;  %v231_v16 = vadd.s32 32, %v12634_v17  ;;  %v234_v19 = vadd.s32 56, %v12634_v17  ;;  %v12680_v35 = vadd.s32 80, %v12634_v17 }
 0x23f   : > { %10499 = vmatprep.mubr.msk.bf16.mxu0 %vm15391_vm0, %v3779_v18  ;;  %v4144_v18 = vsel %vm15386_vm6, %v4141_v47, %v4143_v53  ;;  %v12637_v34 = vmul.u32.u64.low 3817748708, %v229_v30  ;;  %v12638_v46 = vmul.u32.u64.high 3817748708, %v229_v30, %v12637_v34  ;;  %v12714_v53 = vadd.s32 88, %v12634_v17 }
 0x240   : > { %v12653_v2 = vmul.u32.u64.low 3817748708, %v228_v52  ;;  %v12654_v10 = vmul.u32.u64.high 3817748708, %v228_v52, %v12653_v2  ;;  %v12656_v5 = vmul.u32.u64.low 3817748708, %v233_v57  ;;  %v12657_v36 = vmul.u32.u64.high 3817748708, %v233_v57, %v12656_v5  ;;  %10554 = vmatpush3.bf16.msra.mxu1 %v11651_v7 }
 0x241   : > { %v291_v13 = vshrl.u32 %v12638_v46, 4  ;;  %v12667_v44 = vmul.u32.u64.low 3817748708, %v231_v16  ;;  %v12668_v27 = vmul.u32.u64.high 3817748708, %v231_v16, %v12667_v44  ;;  %v12721_v59 = vadd.s32 72, %v12634_v17 }
 0x242   : > { %v12670_v29 = vmul.u32.u64.low 3817748708, %v234_v19  ;;  %v12671_v31 = vmul.u32.u64.high 3817748708, %v234_v19, %v12670_v29  ;;  %v12742_v28 = vmul.u32.u64.low 3817748708, %v12714_v53  ;;  %v12743_v14 = vmul.u32.u64.high 3817748708, %v12714_v53, %v12742_v28 }
 0x243   : > { %v292_v32 = vmul.u32 18, %v291_v13  ;;  %v313_v1 = vshrl.u32 %v12668_v27, 4  ;;  %v15520_v27 = vmov 0  ;;  %v15651_v5 = vmov 0 }
 0x244   : > { %v346_v8 = vshrl.u32 %v12671_v31, 4 }
 0x246   : > { %10500 = vmatmul.mubr.msk.bf16.gmra.mrb[24].mxu0 %vm15391_vm0, %v3788_v45  ;;  %v12643_v45 = vmul.u32.u64.low 3817748708, %v12634_v17  ;;  %v12644_v41 = vmul.u32.u64.high 3817748708, %v12634_v17, %v12643_v45  ;;  %v347_v47 = vmul.u32 18, %v346_v8 }
 0x247   : > { %10503 = vmatprep.mubr.msk.bf16.mxu0 %vm15391_vm0, %v3797_v58  ;;  %v12650_v58 = vmul.u32.u64.low 3817748708, %v230_v48  ;;  %v12651_v0 = vmul.u32.u64.high 3817748708, %v230_v48, %v12650_v58 }
 0x249   : > { %v302_v40 = vshrl.u32 %v12651_v0, 4 }
 0x24e   : > { %10504 = vmatmul.mubr.msk.bf16.gmra.mrb[28].mxu0 %vm15391_vm0, %v3806_v21  ;;  %v232_v21 = vadd.s32 40, %v12634_v17 }
 0x24f   : > { %10507 = vmatprep.mubr.msk.bf16.mxu0 %vm15391_vm0, %v3815_v23  ;;  %v269_v23 = vshrl.u32 %v12644_v41, 4  ;;  %v12765_v41 = vadd.s32 96, %v12634_v17 }
 0x251   : > { %v270_v50 = vmul.u32 18, %v269_v23  ;;  %v12820_v7 = vmul.u32.u64.low 3817748708, %v12765_v41  ;;  %v12821_v13 = vmul.u32.u64.high 3817748708, %v12765_v41, %v12820_v7 }
 0x252   : > { %v12924_v7 = vadd.s32 136, %v12634_v17 }
 0x256   : > { %10508 = vmatmul.mubr.msk.bf16.gmra.mrb[32].mxu0 %vm15391_vm0, %v3824_v56 }
 0x257   : > { %10515 = vmatprep.mubr.msk.bf16.mxu0 %vm15391_vm0, %v4116_v39  ;;  %v12673_v56 = vmul.u32.u64.low 3817748708, %v232_v21  ;;  %v12674_v39 = vmul.u32.u64.high 3817748708, %v232_v21, %v12673_v56 }
 0x25e   : > { %10516 = vmatmul.mubr.msk.bf16.vlgmr.msra.gmra.mrb[0].mxu0 %vm15391_vm0, %v4118_v62  ;;  %v280_v62 = vshrl.u32 %v12654_v10, 4  ;;  %v12784_v10 = vadd.s32 104, %v12634_v17 }
 0x25f   : > { %10519 = vmatprep.mubr.msk.bf16.mxu0 %vm15391_vm0, %v4120_v33  ;;  %v335_v33 = vshrl.u32 %v12657_v36, 4  ;;  %v12798_v36 = vadd.s32 144, %v12634_v17 }
 0x260   : > { %v281_v55 = vmul.u32 18, %v280_v62 }
 0x261   : > { %v336_v54 = vmul.u32 18, %v335_v33 }
 0x263   : > { %v12706_v24 = vsub.s32 %v233_v57, %v336_v54  ;;  %v12768_v57 = vadd.s32 120, %v12634_v17 }
 0x265   : > { %15504 = vst [vmem:[#allocation3_spill] sm:$0xff] %v12706_v24  ;;  %vm665_vm6 = vcmp.ne.s32.totalorder %v12706_v24, 0  ;;  %vm701_vm5 = vcmp.lt.s32.totalorder %v12706_v24, 0  ;;  %v12762_v45 = vadd.s32 18, %v12706_v24  ;;  %v15607_v24 = vmov 0 }
 0x266   : > { %10520 = vmatmul.mubr.msk.bf16.gmra.mrb[4].mxu0 %vm15391_vm0, %v4122_v3  ;;  %v12682_v3 = vsub.s32 %v229_v30, %v292_v32  ;;  %vm12815_vm1 = vmand %vm701_vm5, %vm665_vm6  ;;  %v12824_v23 = vmul.u32.u64.low 3817748708, %v12768_v57  ;;  %v12825_v44 = vmul.u32.u64.high 3817748708, %v12768_v57, %v12824_v23  ;;  %v11654_v32 = vld [vmem:[%s15383_s3] sm:$0xff]  }
 0x267   : > { %10523 = vmatprep.mubr.msk.bf16.mxu0 %vm15391_vm0, %v4124_v37  ;;  %v303_v37 = vmul.u32 18, %v302_v40  ;;  %15510 = vst [vmem:[#allocation7_spill] sm:$0xff] %v12762_v45  ;;  %v15524_v40 = vmov 0  ;;  %10591 = vmatprep.subr.bf16.mxu1 %v11654_v32  ;;  %v12932_v32 = vadd.s32 176, %v12634_v17 }
 0x268   : > { %vm661_vm8 = vcmp.ne.s32.totalorder %v12682_v3, 0  ;;  %vm697_vm9 = vcmp.lt.s32.totalorder %v12682_v3, 0 }
 0x269   : > { %v12699_v20 = vsub.s32 %v230_v48, %v303_v37  ;;  %v12749_v46 = vmul.u32.u64.low 3817748708, %v12721_v59  ;;  %v12750_v48 = vmul.u32.u64.high 3817748708, %v12721_v59, %v12749_v46  ;;  %vm12756_vm2 = vmand %vm697_vm9, %vm661_vm8 }
 0x26a   : > { %v12913_v46 = vadd.s32 152, %v12634_v17 }
 0x26b   : > { %vm662_vm12 = vcmp.ne.s32.totalorder %v12699_v20, 0  ;;  %vm698_vm13 = vcmp.lt.s32.totalorder %v12699_v20, 0  ;;  %v12726_v49 = vadd.s32 18, %v12699_v20  ;;  %v368_v8 = vshrl.u32 %v12750_v48, 4 }
 0x26c   : > { %vm12790_vm8 = vmand %vm698_vm13, %vm662_vm12 }
 0x26e   : > { %10524 = vmatmul.mubr.msk.bf16.gmra.mrb[8].mxu0 %vm15391_vm0, %v4126_v11  ;;  %v12685_v11 = vadd.s32 64, %v12634_v17 }
 0x26f   : > { %10527 = vmatprep.mubr.msk.bf16.mxu0 %vm15391_vm0, %v4128_v38  ;;  %v12688_v38 = vsub.s32 %v12634_v17, %v270_v50  ;;  %v12856_v50 = vmul.u32.u64.low 3817748708, %v12798_v36  ;;  %v12857_v37 = vmul.u32.u64.high 3817748708, %v12798_v36, %v12856_v50 }
 0x270   : > { %v15536_v50 = vmov 0 }
 0x271   : > { %vm659_vm10 = vcmp.ne.s32.totalorder %v12688_v38, 0  ;;  %vm695_vm11 = vcmp.lt.s32.totalorder %v12688_v38, 0  ;;  %v467_v23 = vshrl.u32 %v12857_v37, 4 }
 0x272   : > { %vm12774_vm4 = vmand %vm695_vm11, %vm659_vm10 }
 0x276   : > { %10528 = vmatmul.mubr.msk.bf16.gmra.mrb[12].mxu0 %vm15391_vm0, %v4130_v42  ;;  %v324_v42 = vshrl.u32 %v12674_v39, 4  ;;  %v12835_v56 = vmul.u32.u64.low 3817748708, %v12784_v10  ;;  %v12836_v39 = vmul.u32.u64.high 3817748708, %v12784_v10, %v12835_v56 }
 0x277   : > { %10531 = vmatprep.mubr.msk.bf16.mxu0 %vm15391_vm0, %v4132_v60  ;;  %v12694_v60 = vmul.u32.u64.low 3817748708, %v12680_v35  ;;  %v12695_v4 = vmul.u32.u64.high 3817748708, %v12680_v35, %v12694_v60 }
 0x279   : > { %v379_v34 = vshrl.u32 %v12695_v4, 4 }
 0x27e   : > { %10532 = vmatmul.mubr.msk.bf16.gmra.mrb[16].mxu0 %vm15391_vm0, %v4134_v6  ;;  %v12701_v6 = vsub.s32 %v228_v52, %v281_v55  ;;  %v15529_v55 = vmov 0 }
 0x27f   : > { %10535 = vmatprep.mubr.msk.bf16.mxu0 %vm15391_vm0, %v4136_v22  ;;  %v12704_v22 = vadd.s32 18, %v12682_v3 }
 0x280   : > { %vm660_vm14 = vcmp.ne.s32.totalorder %v12701_v6, 0  ;;  %vm696_vm15 = vcmp.lt.s32.totalorder %v12701_v6, 0 }
 0x281   : > { %vm12804_vm3 = vmand %vm696_vm15, %vm660_vm14 }
 0x286   : > { %10536 = vmatmul.mubr.msk.bf16.gmra.mrb[20].mxu0 %vm15391_vm0, %v4138_v63  ;;  %v12709_v26 = vmul.u32.u64.low 3817748708, %v12685_v11  ;;  %v12710_v63 = vmul.u32.u64.high 3817748708, %v12685_v11, %v12709_v26 }
 0x287   : > { %10539 = vmatprep.mubr.msk.bf16.mxu0 %vm15391_vm0, %v4140_v12  ;;  %v314_v12 = vmul.u32 18, %v313_v1  ;;  %v390_v1 = vshrl.u32 %v12743_v14, 4 }
 0x288   : > { %v357_v58 = vshrl.u32 %v12710_v63, 4 }
 0x289   : > { %v12737_v51 = vsub.s32 %v231_v16, %v314_v12  ;;  %v15515_v16 = vmov 0  ;;  %v391_v14 = vmul.u32 18, %v390_v1 }
 0x28a   : > { %v15516_v16 = vsel %vm12804_vm3, 4294967295, %v15515_v16  ;;  %v358_v31 = vmul.u32 18, %v357_v58  ;;  %v401_v58 = vshrl.u32 %v12821_v13, 4 }
 0x28b   : > { %15505 = vst [vmem:[#allocation4_spill] sm:$0xff] %v12737_v51  ;;  %vm663_vm9 = vcmp.ne.s32.totalorder %v12737_v51, 0  ;;  %vm699_vm10 = vcmp.lt.s32.totalorder %v12737_v51, 0  ;;  %v12832_v29 = vadd.s32 18, %v12737_v51  ;;  %v12936_v13 = vsub.s32 %v12714_v53, %v391_v14 }
 0x28c   : > { %vm12827_vm14 = vmand %vm699_vm10, %vm663_vm9  ;;  %v12893_v63 = vsub.s32 %v12685_v11, %v358_v31  ;;  %v12909_v11 = vadd.s32 128, %v12634_v17  ;;  %v402_v1 = vmul.u32 18, %v401_v58 }
 0x28d   : > { %v15521_v27 = vsel %vm12827_vm14, 4294967295, %v15520_v27  ;;  %15523 = vst [vmem:[#allocation10_spill] sm:$0xff] %v12832_v29  ;;  %15535 = vst [vmem:[#allocation18_spill] sm:$0xff] %v12936_v13 }
 0x28e   : > { %10540 = vmatmul.mubr.msk.bf16.gmra.mrb[24].mxu0 %vm15391_vm0, %v4142_v43  ;;  %v12718_v43 = vadd.s32 18, %v12688_v38  ;;  %15522 = vst [vmem:[#allocation9_spill] sm:$0xff] %v15521_v27  ;;  %15533 = vst [vmem:[#allocation16_spill] sm:$0xff] %v12893_v63  ;;  %vm667_vm9 = vcmp.ne.s32.totalorder %v12893_v63, 0  ;;  %v12928_v31 = vmul.u32.u64.low 3817748708, %v12909_v11  ;;  %v12929_v56 = vmul.u32.u64.high 3817748708, %v12909_v11, %v12928_v31 }
 0x28f   : > { %10543 = vmatprep.mubr.msk.bf16.mxu0 %vm15391_vm0, %v4144_v18  ;;  %v325_v18 = vmul.u32 18, %v324_v42  ;;  %vm703_vm10 = vcmp.lt.s32.totalorder %v12893_v63, 0  ;;  %v12949_v37 = vadd.s32 18, %v12893_v63 }
 0x291   : > { %v12745_v30 = vsub.s32 %v232_v21, %v325_v18  ;;  %v15517_v21 = vmov 0  ;;  %15539 = vst [vmem:[#allocation20_spill] sm:$0xff] %v12949_v37  ;;  %v468_v18 = vmul.u32 18, %v467_v23 }
 0x292   : > { %v15518_v21 = vsel %vm12815_vm1, 4294967295, %v15517_v21 }
 0x293   : > { %15507 = vst [vmem:[#allocation6_spill] sm:$0xff] %v12745_v30  ;;  %vm664_vm13 = vcmp.ne.s32.totalorder %v12745_v30, 0  ;;  %15519 = vst [vmem:[#allocation8_spill] sm:$0xff] %v15518_v21  ;;  %v12853_v33 = vadd.s32 18, %v12745_v30 }
 0x295   : > { %15528 = vst [vmem:[#allocation13_spill] sm:$0xff] %v12853_v33 }
 0x296   : > { %10544 = vmatmul.mubr.msk.bf16.gmra.mrb[28].mxu0 %vm15391_vm0, %v4146_v15  ;;  %v12731_v15 = vadd.s32 18, %v12701_v6 }
 0x297   : > { %10547 = vmatprep.mubr.msk.bf16.mxu0 %vm15391_vm0, %v4148_v25  ;;  %v12735_v25 = vadd.s32 112, %v12634_v17 }
 0x299   : > { %v12780_v0 = vmul.u32.u64.low 3817748708, %v12735_v25  ;;  %v12781_v2 = vmul.u32.u64.high 3817748708, %v12735_v25, %v12780_v0 }
 0x29a   : > { %v434_v0 = vshrl.u32 %v12825_v44, 4 }
 0x29b   : > { %v423_v12 = vshrl.u32 %v12781_v2, 4 }
 0x29d   : > { %v424_v2 = vmul.u32 18, %v423_v12  ;;  %v12952_v12 = vadd.s32 160, %v12634_v17 }
 0x29e   : > { %10548 = vmatmul.mubr.msk.bf16.gmra.mrb[32].mxu0 %vm15391_vm0, %v4150_v9  ;;  %v12739_v9 = vsub.s32 %v234_v19, %v347_v47  ;;  %vm700_vm0 = vcmp.lt.s32.totalorder %v12745_v30, 0  ;;  %v380_v19 = vmul.u32 18, %v379_v34  ;;  %v369_v34 = vmul.u32 18, %v368_v8 }
 0x29f   : > { %vm12863_vm6 = vmand %vm700_vm0, %vm664_vm13  ;;  %v435_v8 = vmul.u32 18, %v434_v0  ;;  %v12962_v28 = vsub.s32 %v12735_v25, %v424_v2  ;;  %v12965_v47 = vmul.u32.u64.low 3817748708, %v12932_v32  ;;  %v12966_v26 = vmul.u32.u64.high 3817748708, %v12932_v32, %v12965_v47  ;;  %v5140_v0 = vld [vmem:[#allocation2] sm:$0xf] }
 0x2a0   : > { %15506 = vst [vmem:[#allocation5_spill] sm:$0xff] %v12739_v9  ;;  %vm666_vm11 = vcmp.ne.s32.totalorder %v12739_v9, 0  ;;  %vm702_vm12 = vcmp.lt.s32.totalorder %v12739_v9, 0  ;;  %v12850_v62 = vadd.s32 18, %v12739_v9  ;;  %v15530_v55 = vsel %vm12863_vm6, 4294967295, %v15529_v55 }
 0x2a1   : > { %vm12845_vm5 = vmand %vm702_vm12, %vm666_vm11  ;;  %15531 = vst [vmem:[#allocation14_spill] sm:$0xff] %v15530_v55  ;;  %v12868_v54 = vsub.s32 %v12680_v35, %v380_v19  ;;  %v412_v19 = vshrl.u32 %v12836_v39, 4  ;;  %v12939_v44 = vmul.u32.u64.low 3817748708, %v12913_v46  ;;  %v12940_v39 = vmul.u32.u64.high 3817748708, %v12913_v46, %v12939_v44  ;;  %v5141_v47 = vld [vmem:[#allocation2 + $0x4] sm:$0xf] }
 0x2a2   : > { %v15525_v40 = vsel %vm12845_vm5, 4294967295, %v15524_v40  ;;  %15527 = vst [vmem:[#allocation12_spill] sm:$0xff] %v12850_v62  ;;  %v12955_v53 = vsub.s32 %v12721_v59, %v369_v34  ;;  %v12958_v31 = vmul.u32.u64.low 3817748708, %v12924_v7  ;;  %v12959_v44 = vmul.u32.u64.high 3817748708, %v12924_v7, %v12958_v31  ;;  %15541 = vst [vmem:[#allocation22_spill] sm:$0xff] %v12962_v28 }
 0x2a3   : > { %15526 = vst [vmem:[#allocation11_spill] sm:$0xff] %v15525_v40  ;;  %15532 = vst [vmem:[#allocation15_spill] sm:$0xff] %v12868_v54  ;;  %vm669_vm0 = vcmp.ne.s32.totalorder %v12868_v54, 0  ;;  %vm705_vm15 = vcmp.lt.s32.totalorder %v12868_v54, 0  ;;  %v12917_v48 = vadd.s32 18, %v12868_v54  ;;  %v413_v14 = vmul.u32 18, %v412_v19 }
 0x2a4   : > { %vm12944_vm11 = vmand %vm705_vm15, %vm669_vm0  ;;  %15540 = vst [vmem:[#allocation21_spill] sm:$0xff] %v12955_v53  ;;  %vm670_vm12 = vcmp.ne.s32.totalorder %v12936_v13, 0  ;;  %v12975_v59 = vadd.s32 18, %v12936_v13  ;;  %v12978_v25 = vsub.s32 %v12765_v41, %v402_v1  ;;  %v12981_v34 = vsub.s32 %v12768_v57, %v435_v8 }
 0x2a5   : > { %15534 = vst [vmem:[#allocation17_spill] sm:$0xff] %v12917_v48  ;;  %v15537_v50 = vsel %vm12944_vm11, 4294967295, %v15536_v50  ;;  %v12984_v2 = vmul.u32.u64.low 3817748708, %v12952_v12  ;;  %v12985_v19 = vmul.u32.u64.high 3817748708, %v12952_v12, %v12984_v2  ;;  %v12990_v23 = vadd.s32 18, %v12955_v53  ;;  %vm13005_vm15 = vmand %vm703_vm10, %vm667_vm9 }
 0x2a6   : > { %15538 = vst [vmem:[#allocation19_spill] sm:$0xff] %v15537_v50  ;;  %15542 = vst [vmem:[#allocation23_spill] sm:$0xff] %v12975_v59  ;;  %v12993_v31 = vsub.s32 %v12784_v10, %v413_v14  ;;  %v12998_v41 = vsub.s32 %v12798_v36, %v468_v18  ;;  %v445_v57 = vshrl.u32 %v12929_v56, 4  ;;  %v15548_v1 = vmov 0 }
 0x2a7   : > { %15543 = vst [vmem:[#allocation24_spill] sm:$0xff] %v12978_v25  ;;  %15544 = vst [vmem:[#allocation25_spill] sm:$0xff] %v12981_v34  ;;  %v15549_v1 = vsel %vm13005_vm15, 4294967295, %v15548_v1  ;;  %v13010_v10 = vadd.s32 18, %v12962_v28  ;;  %v13012_v8 = vcombine.low %v5140_v0, %v5141_v47  ;;  %v478_v14 = vshrl.u32 %v12940_v39, 4 }
 0x2a8   : > { %15545 = vst [vmem:[#allocation26_spill] sm:$0xff] %v12990_v23  ;;  %15546 = vst [vmem:[#allocation27_spill] sm:$0xff] %v12993_v31  ;;  %v13016_v36 = vadd.s32 184, %v12634_v17  ;;  %vm15553_vm13 = vcmp.lt.s32.totalorder %v12936_v13, 0  ;;  %v15554_v18 = vmov 0  ;;  %vm707_vm10 = vcmp.lt.s32.totalorder %v12978_v25, 0 }
 0x2a9   : > { %15547 = vst [vmem:[#allocation28_spill] sm:$0xff] %v12998_v41  ;;  %15550 = vst [vmem:[#allocation29_spill] sm:$0xff] %v15549_v1  ;;  %v13029_v56 = vadd.s32 18, %v12978_v25  ;;  %vm15558_vm11 = vcmp.ne.s32.totalorder %v12955_v53, 0  ;;  %vm15559_vm6 = vcmp.lt.s32.totalorder %v12955_v53, 0  ;;  %v15560_v39 = vmov 0 }
 0x2aa   : > { %15551 = vst [vmem:[#allocation30_spill] sm:$0xff] %v13010_v10  ;;  %15552 = vst [vmem:[#allocation31_spill] sm:$0xff] %v13012_v8  ;;  %v13042_v0 = vadd.s32 18, %v12981_v34  ;;  %v456_v47 = vshrl.u32 %v12959_v44, 4  ;;  %vm15564_vm9 = vcmp.ne.s32.totalorder %v12962_v28, 0  ;;  %vm15565_vm0 = vcmp.lt.s32.totalorder %v12962_v28, 0 }
 0x2ab   : > { %vm13022_vm7 = vmand %vm15553_vm13, %vm670_vm12  ;;  %15557 = vst [vmem:[#allocation33_spill] sm:$0xff] %v13029_v56  ;;  %vm710_vm12 = vcmp.lt.s32.totalorder %v12981_v34, 0  ;;  %v15566_v2 = vmov 0  ;;  %v446_v58 = vmul.u32 18, %v445_v57  ;;  %v511_v4 = vshrl.u32 %v12966_v26, 4  ;;  %v15715_v52 = vld [vmem:[#allocation11_spill] sm:$0xff] }
 0x2ac   : > { %v15555_v18 = vsel %vm13022_vm7, 4294967295, %v15554_v18  ;;  %vm13036_vm5 = vmand %vm15559_vm6, %vm15558_vm11  ;;  %15563 = vst [vmem:[#allocation35_spill] sm:$0xff] %v13042_v0  ;;  %vm708_vm6 = vcmp.lt.s32.totalorder %v12993_v31, 0  ;;  %vm677_vm11 = vcmp.ne.s32.totalorder %v12998_v41, 0  ;;  %vm15569_vm1 = vcmp.ne.s32.totalorder %v12978_v25, 0 }
 0x2ad   : > { %15556 = vst [vmem:[#allocation32_spill] sm:$0xff] %v15555_v18  ;;  %v15561_v39 = vsel %vm13036_vm5, 4294967295, %v15560_v39  ;;  %vm13050_vm14 = vmand %vm15565_vm0, %vm15564_vm9  ;;  %v15570_v35 = vmov 0  ;;  %vm713_vm3 = vcmp.lt.s32.totalorder %v12998_v41, 0  ;;  %v479_v44 = vmul.u32 18, %v478_v14 }
 0x2ae   : > { %15562 = vst [vmem:[#allocation34_spill] sm:$0xff] %v15561_v39  ;;  %v15567_v2 = vsel %vm13050_vm14, 4294967295, %v15566_v2  ;;  %vm13059_vm13 = vmand %vm707_vm10, %vm15569_vm1  ;;  %v13065_v60 = vmul.u32.u64.low 3817748708, %v13016_v36  ;;  %v13066_v42 = vmul.u32.u64.high 3817748708, %v13016_v36, %v13065_v60  ;;  %vm15573_vm0 = vcmp.ne.s32.totalorder %v12981_v34, 0 }
 0x2af   : > { %15568 = vst [vmem:[#allocation36_spill] sm:$0xff] %v15567_v2  ;;  %v15571_v35 = vsel %vm13059_vm13, 4294967295, %v15570_v35  ;;  %vm13074_vm9 = vmand %vm710_vm12, %vm15573_vm0  ;;  %v15574_v26 = vmov 0  ;;  %v13079_v54 = vadd.s32 18, %v12993_v31  ;;  %v5282_v14 = vshll.u32 %v13012_v8, 16 }
 0x2b0   : > { %15572 = vst [vmem:[#allocation37_spill] sm:$0xff] %v15571_v35  ;;  %v15575_v26 = vsel %vm13074_vm9, 4294967295, %v15574_v26  ;;  %v489_v48 = vshrl.u32 %v12985_v19, 4  ;;  %vm15578_vm1 = vcmp.ne.s32.totalorder %v12993_v31, 0  ;;  %v15579_v57 = vmov 0  ;;  %vm13111_vm12 = vmand %vm713_vm3, %vm677_vm11 }
 0x2b1   : > { %15576 = vst [vmem:[#allocation38_spill] sm:$0xff] %v15575_v26  ;;  %15577 = vst [vmem:[#allocation39_spill] sm:$0xff] %v13079_v54  ;;  %v13094_v63 = vadd.s32 18, %v12998_v41  ;;  %v457_v37 = vmul.u32 18, %v456_v47  ;;  %v13097_v1 = vadd.s32 168, %v12634_v17  ;;  %v15583_v13 = vmov 0 }
 0x2b2   : > { %vm13089_vm10 = vmand %vm708_vm6, %vm15578_vm1  ;;  %v15584_v13 = vsel %vm13111_vm12, 4294967295, %v15583_v13  ;;  %v13116_v47 = vsub.s32 %v12909_v11, %v446_v58  ;;  %v512_v59 = vmul.u32 18, %v511_v4  ;;  %v13128_v10 = vsub.s32 %v12913_v46, %v479_v44 }
 0x2b3   : > { %v15580_v57 = vsel %vm13089_vm10, 4294967295, %v15579_v57  ;;  %15582 = vst [vmem:[#allocation41_spill] sm:$0xff] %v13094_v63  ;;  %15585 = vst [vmem:[#allocation42_spill] sm:$0xff] %v15584_v13  ;;  %v13134_v11 = vrot.slane %v5282_v14, 1  ;;  %v490_v58 = vmul.u32 18, %v489_v48  ;;  %v13137_v19 = vadd.s32 208, %v12634_v17 }
 0x2b4   : > { %15581 = vst [vmem:[#allocation40_spill] sm:$0xff] %v15580_v57  ;;  %v13144_v28 = vsub.s32 %v12924_v7, %v457_v37  ;;  %v13147_v46 = vmul.u32.u64.low 3817748708, %v13097_v1  ;;  %v13148_v44 = vmul.u32.u64.high 3817748708, %v13097_v1, %v13147_v46  ;;  %vm675_vm3 = vcmp.ne.s32.totalorder %v13116_v47, 0 }
 0x2b5   : > { %v13153_v48 = vadd.s32 18, %v13116_v47  ;;  %v13156_v14 = vsub.s32 %v12932_v32, %v512_v59  ;;  %v13159_v4 = vadd.s32 192, %v12634_v17  ;;  %v13164_v7 = vadd.s32 18, %v13128_v10 }
 0x2b6   : > { %v522_v37 = vshrl.u32 %v13066_v42, 4  ;;  %v13168_v46 = vsub.s32 %v12952_v12, %v490_v58  ;;  %v13171_v60 = vmul.u32.u64.low 3817748708, %v13137_v19  ;;  %v13172_v41 = vmul.u32.u64.high 3817748708, %v13137_v19, %v13171_v60 }
 0x2b7   : > { %v13175_v32 = vadd.s32 216, %v12634_v17  ;;  %v13180_v59 = vadd.s32 18, %v13144_v28  ;;  %v13183_v63 = vadd.s32 200, %v12634_v17  ;;  %v13191_v60 = vadd.s32 240, %v12634_v17 }
 0x2b8   : > { %v13187_v42 = vmul.u32.u64.low 3817748708, %v13159_v4  ;;  %v13188_v12 = vmul.u32.u64.high 3817748708, %v13159_v4, %v13187_v42  ;;  %v13195_v58 = vadd.s32 18, %v13156_v14  ;;  %v523_v13 = vmul.u32 18, %v522_v37 }
 0x2b9   : > { %v13198_v31 = vadd.s32 224, %v12634_v17  ;;  %v13202_v54 = vmul.u32.u64.low 3817748708, %v13175_v32  ;;  %v13203_v57 = vmul.u32.u64.high 3817748708, %v13175_v32, %v13202_v54  ;;  %v13206_v42 = vadd.s32 248, %v12634_v17 }
 0x2ba   : > { %v500_v34 = vshrl.u32 %v13148_v44, 4  ;;  %v13210_v0 = vmul.u32.u64.low 3817748708, %v13183_v63  ;;  %v13211_v26 = vmul.u32.u64.high 3817748708, %v13183_v63, %v13210_v0  ;;  %v13214_v37 = vadd.s32 232, %v12634_v17 }
 0x2bb   : > { %v13218_v25 = vmul.u32.u64.low 3817748708, %v13191_v60  ;;  %v13219_v56 = vmul.u32.u64.high 3817748708, %v13191_v60, %v13218_v25  ;;  %v13222_v54 = vadd.s32 272, %v12634_v17  ;;  %v13225_v35 = vsub.s32 %v13016_v36, %v523_v13 }
 0x2bc   : > { %v13228_v44 = vmul.u32.u64.low 3817748708, %v13198_v31  ;;  %v13229_v2 = vmul.u32.u64.high 3817748708, %v13198_v31, %v13228_v44  ;;  %v13232_v0 = vadd.s32 256, %v12634_v17  ;;  %v555_v53 = vshrl.u32 %v13172_v41, 4 }
 0x2bd   : > { %v13236_v23 = vmul.u32.u64.low 3817748708, %v13206_v42  ;;  %v13237_v39 = vmul.u32.u64.high 3817748708, %v13206_v42, %v13236_v23  ;;  %v13240_v25 = vadd.s32 280, %v12634_v17  ;;  %vm15586_vm6 = vcmp.lt.s32.totalorder %v13116_v47, 0 }
 0x2be   : > { %vm13246_vm11 = vmand %vm15586_vm6, %vm675_vm3  ;;  %v15587_v13 = vmov 0  ;;  %v13251_v36 = vadd.s32 18, %v13168_v46  ;;  %v501_v44 = vmul.u32 18, %v500_v34  ;;  %vm15589_vm0 = vcmp.ne.s32.totalorder %v13128_v10, 0 }
 0x2bf   : > { %v15588_v13 = vsel %vm13246_vm11, 4294967295, %v15587_v13  ;;  %v13254_v41 = vmul.u32.u64.low 3817748708, %v13214_v37  ;;  %v13255_v18 = vmul.u32.u64.high 3817748708, %v13214_v37, %v13254_v41  ;;  %vm15590_vm1 = vcmp.lt.s32.totalorder %v13128_v10, 0 }
 0x2c0   : > { %vm13261_vm12 = vmand %vm15590_vm1, %vm15589_vm0  ;;  %v15591_v23 = vmov 0  ;;  %v533_v50 = vshrl.u32 %v13188_v12, 4  ;;  %v13267_v30 = vmul.u32.u64.low 3817748708, %v13222_v54  ;;  %v13268_v33 = vmul.u32.u64.high 3817748708, %v13222_v54, %v13267_v30 }
 0x2c1   : > { %v15592_v23 = vsel %vm13261_vm12, 4294967295, %v15591_v23  ;;  %v13271_v34 = vadd.s32 264, %v12634_v17  ;;  %vm15593_vm3 = vcmp.ne.s32.totalorder %v13144_v28, 0  ;;  %vm15594_vm6 = vcmp.lt.s32.totalorder %v13144_v28, 0 }
 0x2c2   : > { %vm13277_vm10 = vmand %vm15594_vm6, %vm15593_vm3  ;;  %v15595_v41 = vmov 0  ;;  %vm718_vm1 = vcmp.lt.s32.totalorder %v13225_v35, 0  ;;  %v13284_v12 = vmul.u32.u64.low 3817748708, %v13232_v0  ;;  %v13285_v55 = vmul.u32.u64.high 3817748708, %v13232_v0, %v13284_v12 }
 0x2c3   : > { %v15596_v41 = vsel %vm13277_vm10, 4294967295, %v15595_v41  ;;  %vm15597_vm9 = vcmp.ne.s32.totalorder %v13156_v14, 0  ;;  %vm15598_vm13 = vcmp.lt.s32.totalorder %v13156_v14, 0  ;;  %v15599_v17 = vmov 0 }
 0x2c4   : > { %vm13291_vm14 = vmand %vm15598_vm13, %vm15597_vm9  ;;  %v556_v30 = vmul.u32 18, %v555_v53  ;;  %v566_v9 = vshrl.u32 %v13203_v57, 4  ;;  %v13297_v62 = vmul.u32.u64.low 3817748708, %v13240_v25  ;;  %v13298_v40 = vmul.u32.u64.high 3817748708, %v13240_v25, %v13297_v62 }
 0x2c5   : > { %v15600_v17 = vsel %vm13291_vm14, 4294967295, %v15599_v17  ;;  %vm15601_vm3 = vcmp.ne.s32.totalorder %v13168_v46, 0  ;;  %vm15602_vm6 = vcmp.lt.s32.totalorder %v13168_v46, 0  ;;  %v15603_v12 = vmov 0 }
 0x2c6   : > { %vm13304_vm0 = vmand %vm15602_vm6, %vm15601_vm3  ;;  %v13309_v51 = vadd.s32 18, %v13225_v35  ;;  %v544_v29 = vshrl.u32 %v13211_v26, 4  ;;  %v13313_v53 = vmul.u32.u64.low 3817748708, %v13271_v34  ;;  %v13314_v57 = vmul.u32.u64.high 3817748708, %v13271_v34, %v13313_v53 }
 0x2c7   : > { %v15604_v12 = vsel %vm13304_vm0, 4294967295, %v15603_v12  ;;  %v15605_v27 = vshrl.u32 %v13012_v8, 16  ;;  %vm15606_vm13 = vcmp.ne.s32.totalorder %v13225_v35, 0  ;;  %v13328_v45 = vsub.s32 %v13097_v1, %v501_v44 }
 0x2c8   : > { %vm13323_vm9 = vmand %vm718_vm1, %vm15606_vm13  ;;  %v534_v21 = vmul.u32 18, %v533_v50  ;;  %v599_v26 = vshrl.u32 %v13219_v56, 4  ;;  %v577_v1 = vshrl.u32 %v13229_v2, 4  ;;  %v13349_v56 = vsub.s32 %v13137_v19, %v556_v30 }
 0x2c9   : > { %v13319_v62 = vor.u32 %v13134_v11, %v15605_v27  ;;  %v15608_v24 = vsel %vm13323_vm9, 4294967295, %v15607_v24  ;;  %v567_v44 = vmul.u32 18, %v566_v9  ;;  %v610_v53 = vshrl.u32 %v13237_v39, 4 }
 0x2ca   : > { %v545_v11 = vmul.u32 18, %v544_v29  ;;  %v588_v8 = vshrl.u32 %v13255_v18, 4  ;;  %vm680_vm1 = vcmp.ne.s32.totalorder %v13328_v45, 0  ;;  %v13363_v19 = vsub.s32 %v13159_v4, %v534_v21 }
 0x2cb   : > { %v600_v9 = vmul.u32 18, %v599_v26  ;;  %v643_v39 = vshrl.u32 %v13268_v33, 4  ;;  %v13368_v30 = vadd.s32 18, %v13328_v45  ;;  %v578_v27 = vmul.u32 18, %v577_v1 }
 0x2cc   : > { %v621_v50 = vshrl.u32 %v13285_v55, 4  ;;  %v13373_v29 = vsub.s32 %v13175_v32, %v567_v44  ;;  %v611_v18 = vmul.u32 18, %v610_v53  ;;  %v654_v21 = vshrl.u32 %v13298_v40, 4 }
 0x2cd   : > { %v13378_v33 = vsub.s32 %v13183_v63, %v545_v11  ;;  %v589_v4 = vmul.u32 18, %v588_v8  ;;  %v632_v26 = vshrl.u32 %v13314_v57, 4  ;;  %v13382_v1 = vadd.s32 18, %v13349_v56 }
 0x2ce   : > { %15609 = vst [vmem:[#allocation43_spill] sm:$0xff] %v13373_v29  ;;  %v13386_v55 = vsub.s32 %v13191_v60, %v600_v9  ;;  %v644_v32 = vmul.u32 18, %v643_v39  ;;  %vm15612_vm6 = vcmp.lt.s32.totalorder %v13328_v45, 0  ;;  %v15613_v40 = vmov 0 }
 0x2cf   : > { %15610 = vst [vmem:[#allocation44_spill] sm:$0xff] %v13378_v33  ;;  %vm13392_vm13 = vmand %vm15612_vm6, %vm680_vm1  ;;  %v13398_v63 = vadd.s32 18, %v13363_v19  ;;  %v13401_v8 = vsub.s32 %v13198_v31, %v578_v27  ;;  %v622_v57 = vmul.u32 18, %v621_v50  ;;  %v13406_v60 = vsub.s32 %v13206_v42, %v611_v18 }
 0x2d0   : > { %15611 = vst [vmem:[#allocation45_spill] sm:$0xff] %v13386_v55  ;;  %v15614_v40 = vsel %vm13392_vm13, 4294967295, %v15613_v40  ;;  %v655_v53 = vmul.u32 18, %v654_v21  ;;  %vm15617_vm1 = vcmp.ne.s32.totalorder %v13349_v56, 0  ;;  %vm15618_vm6 = vcmp.lt.s32.totalorder %v13349_v56, 0 }
 0x2d1   : > { %15615 = vst [vmem:[#allocation46_spill] sm:$0xff] %v13401_v8  ;;  %15616 = vst [vmem:[#allocation47_spill] sm:$0xff] %v13406_v60  ;;  %v15619_v11 = vmov 0  ;;  %v13419_v31 = vsub.s32 %v13214_v37, %v589_v4  ;;  %v633_v27 = vmul.u32 18, %v632_v26  ;;  %v15622_v42 = vsel %vm12756_vm2, %v12704_v22, %v12682_v3 }
 0x2d2   : > { %vm13412_vm9 = vmand %vm15618_vm6, %vm15617_vm1  ;;  %vm13426_vm0 = vcmp.lt.s32.totalorder %v15622_v42, 16  ;;  %vm15625_vm1 = vcmp.ne.s32.totalorder %v13363_v19, 0  ;;  %vm15626_vm6 = vcmp.lt.s32.totalorder %v13363_v19, 0  ;;  %v15627_v37 = vmov 0 }
 0x2d3   : > { %v15620_v11 = vsel %vm13412_vm9, 4294967295, %v15619_v11  ;;  %15621 = vst [vmem:[#allocation48_spill] sm:$0xff] %v13419_v31  ;;  %vm13438_vm10 = vmand %vm15626_vm6, %vm15625_vm1  ;;  %v13445_v3 = vsub.s32 %v13222_v54, %v644_v32  ;;  %v15630_v22 = vsel %vm12774_vm4, %v12718_v43, %v12688_v38  ;;  %vm15633_vm1 = vcmp.ne.s32.totalorder %v13373_v29, 0 }
 0x2d4   : > { %v15628_v37 = vsel %vm13438_vm10, 4294967295, %v15627_v37  ;;  %vm13452_vm3 = vcmp.lt.s32.totalorder %v15630_v22, 16  ;;  %vm15634_vm6 = vcmp.lt.s32.totalorder %v13373_v29, 0  ;;  %v15635_v9 = vmov 0 }
 0x2d5   : > { %15629 = vst [vmem:[#allocation49_spill] sm:$0xff] %v13445_v3  ;;  %vm13460_vm13 = vmand %vm15634_vm6, %vm15633_vm1  ;;  %v13465_v54 = vadd.s32 18, %v13373_v29  ;;  %v13470_v38 = vsub.s32 %v13232_v0, %v622_v57  ;;  %v15640_v43 = vsel %vm12790_vm8, %v12726_v49, %v12699_v20  ;;  %vm15643_vm1 = vcmp.ne.s32.totalorder %v13378_v33, 0 }
 0x2d6   : > { %v15636_v9 = vsel %vm13460_vm13, 4294967295, %v15635_v9  ;;  %vm13477_vm4 = vcmp.lt.s32.totalorder %v15640_v43, 16  ;;  %vm15644_vm6 = vcmp.lt.s32.totalorder %v13378_v33, 0  ;;  %v15645_v0 = vmov 0 }
 0x2d7   : > { %15637 = vst [vmem:[#allocation50_spill] sm:$0xff] %v15636_v9  ;;  %15638 = vst [vmem:[#allocation51_spill] sm:$0xff] %v13465_v54  ;;  %v13496_v20 = vsub.s32 %v13240_v25, %v655_v53  ;;  %vm15649_vm12 = vnez %v15516_v16  ;;  %v15655_v25 = vmov 0  ;;  %v13530_v16 = vadd.s32 18, %v13378_v33  ;;  %v15691_v33 = vld [vmem:[#allocation8_spill] sm:$0xff] }
 0x2d8   : > { %15639 = vst [vmem:[#allocation52_spill] sm:$0xff] %v13470_v38  ;;  %vm13489_vm14 = vmand %vm15644_vm6, %vm15643_vm1  ;;  %v15650_v49 = vsel %vm15649_vm12, %v12731_v15, %v12701_v6  ;;  %vm15653_vm1 = vcmp.ne.s32.totalorder %v13386_v55, 0  ;;  %vm15654_vm6 = vcmp.lt.s32.totalorder %v13386_v55, 0  ;;  %v13522_v6 = vsub.s32 %v13271_v34, %v633_v27  ;;  %v13527_v15 = vld [vmem:[%s15382_s2] ss:$0 sm:$0xff] }
 0x2d9   : > { %v15646_v0 = vsel %vm13489_vm14, 4294967295, %v15645_v0  ;;  %15648 = vst [vmem:[#allocation54_spill] sm:$0xff] %v13496_v20  ;;  %vm13503_vm9 = vcmp.lt.s32.totalorder %v15650_v49, 16  ;;  %vm13515_vm8 = vmand %vm15654_vm6, %vm15653_vm1  ;;  %v13533_v21 = vadd.s32 18, %v13386_v55  ;;  %vm15661_vm1 = vcmp.ne.s32.totalorder %v13401_v8, 0 }
 0x2da   : > { %15647 = vst [vmem:[#allocation53_spill] sm:$0xff] %v15646_v0  ;;  %v15652_v5 = vsel %vm13503_vm9, 4294967295, %v15651_v5  ;;  %v15656_v25 = vsel %vm13515_vm8, 4294967295, %v15655_v25  ;;  %15658 = vst [vmem:[#allocation56_spill] sm:$0xff] %v13522_v6  ;;  %vm15662_vm6 = vcmp.lt.s32.totalorder %v13401_v8, 0  ;;  %v15663_v4 = vmov 0 }
 0x2db   : > { %15657 = vst [vmem:[#allocation55_spill] sm:$0xff] %v15656_v25  ;;  %15659 = vst [vmem:[#allocation57_spill] sm:$0xff] %v13530_v16  ;;  %v13550_v26 = vadd.s32 18, %v13401_v8  ;;  %vm15667_vm11 = vcmp.ne.s32.totalorder %v13406_v60, 0  ;;  %vm15668_vm5 = vcmp.lt.s32.totalorder %v13406_v60, 0  ;;  %v15669_v32 = vmov 0 }
 0x2dc   : > { %15660 = vst [vmem:[#allocation58_spill] sm:$0xff] %v13533_v21  ;;  %vm13539_vm2 = vmand %vm15662_vm6, %vm15661_vm1  ;;  %v13563_v53 = vadd.s32 18, %v13406_v60  ;;  %vm15673_vm12 = vcmp.ne.s32.totalorder %v13419_v31, 0  ;;  %vm15674_vm13 = vcmp.lt.s32.totalorder %v13419_v31, 0  ;;  %v15675_v27 = vmov 0  ;;  %v15693_v16 = vld [vmem:[#allocation7_spill] sm:$0xff] }
 0x2dd   : > { %v15664_v4 = vsel %vm13539_vm2, 4294967295, %v15663_v4  ;;  %15666 = vst [vmem:[#allocation60_spill] sm:$0xff] %v13550_v26  ;;  %vm13556_vm1 = vmand %vm15668_vm5, %vm15667_vm11  ;;  %v13574_v42 = vadd.s32 18, %v13419_v31  ;;  %vm694_vm5 = vcmp.ne.s32.totalorder %v13496_v20, 0  ;;  %vm15679_vm15 = vcmp.ne.s32.totalorder %v13445_v3, 0  ;;  %v15694_v25 = vld [vmem:[#allocation3_spill] sm:$0xff] }
 0x2de   : > { %15665 = vst [vmem:[#allocation59_spill] sm:$0xff] %v15664_v4  ;;  %v15670_v32 = vsel %vm13556_vm1, 4294967295, %v15669_v32  ;;  %15672 = vst [vmem:[#allocation62_spill] sm:$0xff] %v13563_v53  ;;  %vm15680_vm9 = vcmp.lt.s32.totalorder %v13445_v3, 0  ;;  %v15681_v49 = vmov 0  ;;  %v13588_v34 = vadd.s32 18, %v13445_v3 }
 0x2df   : > { %15671 = vst [vmem:[#allocation61_spill] sm:$0xff] %v15670_v32  ;;  %vm13569_vm7 = vmand %vm15674_vm13, %vm15673_vm12  ;;  %vm692_vm12 = vcmp.ne.s32.totalorder %v13522_v6, 0  ;;  %v15687_v2 = vmov 0  ;;  %vm15692_vm10 = vnez %v15691_v33  ;;  %v15699_v21 = vmov 0  ;;  %v15710_v31 = vld [vmem:[#allocation10_spill] sm:$0xff] }
 0x2e0   : > { %v15676_v27 = vsel %vm13569_vm7, 4294967295, %v15675_v27  ;;  %15678 = vst [vmem:[#allocation64_spill] sm:$0xff] %v13574_v42  ;;  %vm13583_vm13 = vmand %vm15680_vm9, %vm15679_vm15  ;;  %vm15685_vm15 = vcmp.ne.s32.totalorder %v13470_v38, 0  ;;  %vm15686_vm9 = vcmp.lt.s32.totalorder %v13470_v38, 0  ;;  %v15695_v44 = vsel %vm15692_vm10, %v15693_v16, %v15694_v25  ;;  %v15708_v25 = vld [vmem:[#allocation9_spill] sm:$0xff]  ;;  %v15711_v42 = vld [vmem:[#allocation4_spill] sm:$0xff] }
 0x2e1   : > { %15677 = vst [vmem:[#allocation63_spill] sm:$0xff] %v15676_v27  ;;  %v15682_v49 = vsel %vm13583_vm13, 4294967295, %v15681_v49  ;;  %15684 = vst [vmem:[#allocation66_spill] sm:$0xff] %v13588_v34  ;;  %vm13618_vm6 = vcmp.lt.s32.totalorder %v15695_v44, 16  ;;  %v13634_v33 = vadd.s32 18, %v13522_v6  ;;  %vm15704_vm10 = vcmp.lt.s32.totalorder %v13522_v6, 0 }
 0x2e2   : > { %15683 = vst [vmem:[#allocation65_spill] sm:$0xff] %v15682_v49  ;;  %vm13605_vm11 = vmand %vm15686_vm9, %vm15685_vm15  ;;  %vm15698_vm15 = vcmp.lt.s32.totalorder %v13496_v20, 0  ;;  %v15705_v54 = vmov 0  ;;  %vm15742_vm13 = vsmask.f32 1280  ;;  %v15745_v34 = vld [vmem:[#allocation29_spill] sm:$0xff] }
 0x2e3   : > { %v15688_v2 = vsel %vm13605_vm11, 4294967295, %v15687_v2  ;;  %vm13626_vm9 = vmand %vm15698_vm15, %vm694_vm5  ;;  %15703 = vst [vmem:[#allocation3_spill] sm:$0xff] %v13634_v33 }
 0x2e4   : > { %15689 = vst [vmem:[#allocation67_spill] sm:$0xff] %v15688_v2  ;;  %v15700_v21 = vsel %vm13626_vm9, 4294967295, %v15699_v21  ;;  %vm13649_vm5 = vmand %vm15704_vm10, %vm692_vm12  ;;  %vm15738_vm9 = vcmask 257025  }
 0x2e5   : > { %15701 = vst [vmem:[#allocation8_spill] sm:$0xff] %v15700_v21  ;;  %v15706_v54 = vsel %vm13649_vm5, 4294967295, %v15705_v54  ;;  %vm15737_vm5 = vsmask.f32 7942 }
 0x2e6   : > { %15707 = vst [vmem:[#allocation69_spill] sm:$0xff] %v15706_v54  ;;  %vm13720_vm11 = vmand %vm15738_vm9, %vm15737_vm5 }
 0x331   : > { %v10517_v57 = vpop.f32.mrb[0].mxu0 }
 0x332   : > { %v4439_v22 = vadd.f32 %v10517_v57, %v13527_v15  ;;  %v4251_v43 = vpop.f32.mrb[1].mxu0 }
 0x333   : > { %v4437_v57 = vadd.f32 %v13527_v15, %v4251_v43  ;;  %v10518_v18 = vpop.f32.mrb[2].mxu0  ;;  %v13610_v43 = vadd.s32 18, %v13470_v38 }
 0x334   : > { %v4475_v29 = vmax.f32 %v4439_v22, 0.0  ;;  %v4440_v0 = vadd.f32 %v10518_v18, %v13527_v15  ;;  %v4254_v39 = vpop.f32.mrb[3].mxu0  ;;  %v13631_v18 = vadd.s32 18, %v13496_v20 }
 0x335   : > { %15690 = vst [vmem:[#allocation68_spill] sm:$0xff] %v13610_v43  ;;  %v4473_v22 = vmax.f32 %v4437_v57, 0.0  ;;  %v4438_v44 = vadd.f32 %v13527_v15, %v4254_v39 }
 0x336   : > { %15702 = vst [vmem:[#allocation7_spill] sm:$0xff] %v13631_v18  ;;  %v4511_v39 = vsel %vm13426_vm0, %v4475_v29, 0.0  ;;  %v4476_v57 = vmax.f32 %v4440_v0, 0.0  ;;  %vm15709_vm0 = vnez %v15708_v25 }
 0x337   : > { %v9712_v60 = vpack.c.bf16 %v4511_v39, %v4511_v39  ;;  %v4509_v53 = vsel %vm13452_vm3, %v4473_v22, 0.0  ;;  %v4474_v32 = vmax.f32 %v4438_v44, 0.0  ;;  %v15712_v49 = vsel %vm15709_vm0, %v15710_v31, %v15711_v42  ;;  %v15717_v22 = vld [vmem:[#allocation12_spill] sm:$0xff]  ;;  %v15718_v44 = vld [vmem:[#allocation5_spill] sm:$0xff] }
 0x338   : > { %v9710_v50 = vpack.c.bf16 %v4509_v53, %v4509_v53  ;;  %v4512_v0 = vsel %vm13477_vm4, %v4476_v57, 0.0  ;;  %vm13676_vm12 = vcmp.lt.s32.totalorder %v15712_v49, 16  ;;  %vm15716_vm3 = vnez %v15715_v52 }
 0x339   : > { %v15719_v16 = vsel %vm15716_vm3, %v15717_v22, %v15718_v44  ;;  %v4718_v53 = vshrl.u32 %v9712_v60, 16  ;;  %v4721_v42 = vshll.u32 %v9712_v60, 16  ;;  %v9713_v49 = vpack.c.bf16 %v4512_v0, %v4512_v0  ;;  %v15723_v0 = vld [vmem:[#allocation14_spill] sm:$0xff] }
 0x33a   : > { %vm13685_vm15 = vcmp.lt.s32.totalorder %v15719_v16, 16  ;;  %vm15722_vm4 = vnez %v15652_v5  ;;  %v10521_v16 = vpop.f32.mrb[4].mxu0  ;;  %v4699_v57 = vshrl.u32 %v9710_v50, 16  ;;  %v4702_v52 = vshll.u32 %v9710_v50, 16  ;;  %v15725_v5 = vld [vmem:[#allocation13_spill] sm:$0xff] }
 0x33b   : > { %v4510_v25 = vsel %vm15722_vm4, %v4474_v32, 0.0  ;;  %v4443_v44 = vadd.f32 %v10521_v16, %v13527_v15  ;;  %v4267_v38 = vpop.f32.mrb[5].mxu0  ;;  %v4720_v21 = vrot.slane %v4718_v53, 6  ;;  %v4723_v61 = vrot.slane %v4721_v42, 7  ;;  %v15726_v32 = vld [vmem:[#allocation6_spill] sm:$0xff]  ;;  %v15730_v16 = vld [vmem:[#allocation19_spill] sm:$0xff] }
 0x33c   : > { %v9711_v22 = vpack.c.bf16 %v4510_v25, %v4510_v25  ;;  %v4728_v20 = vshrl.u32 %v9713_v49, 16  ;;  %v4731_v18 = vshll.u32 %v9713_v49, 16  ;;  %v10522_v43 = vpop.f32.mrb[6].mxu0  ;;  %v4701_v54 = vrot.slane %v4699_v57, 6  ;;  %v15732_v53 = vld [vmem:[#allocation17_spill] sm:$0xff]  ;;  %v15733_v42 = vld [vmem:[#allocation15_spill] sm:$0xff] }
 0x33d   : > { %v4704_v31 = vrot.slane %v4702_v52, 7  ;;  %vm15724_vm10 = vnez %v15723_v0  ;;  %v4270_v25 = vpop.f32.mrb[7].mxu0  ;;  %vm15731_vm3 = vnez %v15730_v16  ;;  %v4724_v52 = vor.u32 %v4723_v61, %v4720_v21  ;;  %v15771_v57 = vld [vmem:[#allocation30_spill] sm:$0xff] }
 0x33e   : > { %v4708_v6 = vshrl.u32 %v9711_v22, 16  ;;  %v4711_v60 = vshll.u32 %v9711_v22, 16  ;;  %v15727_v33 = vsel %vm15724_vm10, %v15725_v5, %v15726_v32  ;;  %v15734_v49 = vsel %vm15731_vm3, %v15732_v53, %v15733_v42 }
 0x33f   : > { %vm13705_vm0 = vcmp.lt.s32.totalorder %v15727_v33, 16  ;;  %vm13714_vm4 = vcmp.lt.s32.totalorder %v15734_v49, 16  ;;  %v5097_v33 = vld [vmem:[#allocation2 + $0x8] sm:$0xe]  ;;  %v4730_v0 = vrot.slane %v4728_v20, 6  ;;  %v4733_v5 = vrot.slane %v4731_v18, 7 }
 0x340   : > { %v4479_v32 = vmax.f32 %v4443_v44, 0.0  ;;  %v4705_v2 = vor.u32 %v4704_v31, %v4701_v54  ;;  %vm15741_vm10 = vsmask.f32 5392  ;;  %v4710_v53 = vrot.slane %v4708_v6, 6  ;;  %v15747_v6 = vld [vmem:[#allocation20_spill] sm:$0xff] }
 0x341   : > { %vm13726_vm7 = vmor %vm15742_vm13, %vm15741_vm10  ;;  %v4713_v42 = vrot.slane %v4711_v60, 7  ;;  %v4441_v21 = vadd.f32 %v13527_v15, %v4267_v38  ;;  %v4726_v61 = vrot.slane %v4724_v52, 4  ;;  %v13731_v49 = vor.u32 %v4733_v5, %v4730_v0  ;;  %v15748_v60 = vld [vmem:[#allocation16_spill] sm:$0xff] }
 0x342   : > { %v4515_v3 = vsel %vm13618_vm6, %v4479_v32, 0.0  ;;  %v4444_v20 = vadd.f32 %v10522_v43, %v13527_v15  ;;  %v4706_v18 = vrot.slane %v4705_v2, 4  ;;  %v5098_v54 = vsel %vm13720_vm11, %v4705_v2, %v5097_v33  ;;  %v10525_v33 = vpop.f32.mrb[8].mxu0 }
 0x343   : > { %v4714_v31 = vor.u32 %v4713_v42, %v4710_v53  ;;  %v9716_v44 = vpack.c.bf16 %v4515_v3, %v4515_v3  ;;  %vm15746_vm13 = vnez %v15745_v34  ;;  %5099 = vst [vmem:[#allocation2 + $0x8] sm:$0xe] %v5098_v54  ;;  %v4735_v55 = vsel %vm13726_vm7, %v4726_v61, %v13731_v49  ;;  %v4283_v5 = vpop.f32.mrb[9].mxu0  ;;  %v15754_v61 = vld [vmem:[#allocation32_spill] sm:$0xff] }
 0x344   : > { %v15749_v27 = vsel %vm15746_vm13, %v15747_v6, %v15748_v60  ;;  %v4736_v43 = vrot.slane %v13731_v49, 4  ;;  %v4477_v22 = vmax.f32 %v4441_v21, 0.0  ;;  %v4480_v2 = vmax.f32 %v4444_v20, 0.0  ;;  %v15756_v49 = vld [vmem:[#allocation23_spill] sm:$0xff]  ;;  %v15757_v20 = vld [vmem:[#allocation18_spill] sm:$0xff] }
 0x345   : > { %vm13743_vm9 = vcmp.lt.s32.totalorder %v15749_v27, 16  ;;  %vm15752_vm6 = vcmask 257024   ;;  %v4715_v3 = vsel %vm13726_vm7, %v4706_v18, %v4714_v31  ;;  %v4716_v34 = vrot.slane %v4714_v31, 4  ;;  %v10526_v31 = vpop.f32.mrb[10].mxu0 }
 0x346   : > { %5102 = vst.msk [vmem:[#allocation2 + $0x14] sm:$0xf] %vm15752_vm6, %v4735_v55  ;;  %v4758_v27 = vshrl.u32 %v9716_v44, 16  ;;  %v4761_v0 = vshll.u32 %v9716_v44, 16  ;;  %vm15753_vm11 = vmmov %vm15752_vm6  ;;  %v4513_v32 = vsel %vm13676_vm12, %v4477_v22, 0.0  ;;  %v4516_v53 = vsel %vm13685_vm15, %v4480_v2, 0.0 }
 0x347   : > { %5100 = vst.msk [vmem:[#allocation2 + $0xc] sm:$0xf] %vm15753_vm11, %v4715_v3  ;;  %v4442_v42 = vadd.f32 %v13527_v15, %v4270_v25  ;;  %v4447_v21 = vadd.f32 %v10525_v33, %v13527_v15  ;;  %vm15755_vm5 = vnez %v15754_v61  ;;  %v4725_v39 = vsel %vm13726_vm7, %v4716_v34, %v4724_v52  ;;  %v4286_v60 = vpop.f32.mrb[11].mxu0  ;;  %vm15761_vm12 = vmmov %vm15752_vm6 }
 0x348   : > { %v15758_v18 = vsel %vm15755_vm5, %v15756_v49, %v15757_v20  ;;  %v4760_v44 = vrot.slane %v4758_v27, 6  ;;  %v4763_v29 = vrot.slane %v4761_v0, 7  ;;  %v9714_v6 = vpack.c.bf16 %v4513_v32, %v4513_v32  ;;  %5101 = vst.msk [vmem:[#allocation2 + $0x10] sm:$0xf] %vm15761_vm12, %v4725_v39  ;;  %vm15783_vm5 = vmmov %vm15753_vm11 }
 0x349   : > { %vm13766_vm3 = vcmp.lt.s32.totalorder %v15758_v18, 16  ;;  %v9717_v25 = vpack.c.bf16 %v4516_v53, %v4516_v53  ;;  %v4478_v55 = vmax.f32 %v4442_v42, 0.0  ;;  %v4483_v22 = vmax.f32 %v4447_v21, 0.0  ;;  %v15762_v42 = vld [vmem:[#allocation34_spill] sm:$0xff]  ;;  %v15765_v21 = vld [vmem:[#allocation21_spill] sm:$0xff] }
 0x34a   : > { %v4445_v2 = vadd.f32 %v13527_v15, %v4283_v5  ;;  %v4764_v33 = vor.u32 %v4763_v29, %v4760_v44  ;;  %v4738_v3 = vshrl.u32 %v9714_v6, 16  ;;  %v4741_v61 = vshll.u32 %v9714_v6, 16  ;;  %v15764_v5 = vld [vmem:[#allocation26_spill] sm:$0xff] }
 0x34b   : > { %v4448_v49 = vadd.f32 %v10526_v31, %v13527_v15  ;;  %v4768_v20 = vshrl.u32 %v9717_v25, 16  ;;  %v4771_v18 = vshll.u32 %v9717_v25, 16  ;;  %v4514_v52 = vsel %vm13705_vm0, %v4478_v55, 0.0  ;;  %v15769_v25 = vld [vmem:[#allocation36_spill] sm:$0xff]  ;;  %v15772_v55 = vld [vmem:[#allocation22_spill] sm:$0xff] }
 0x34c   : > { %v4519_v34 = vsel %vm13714_vm4, %v4483_v22, 0.0  ;;  %v4766_v27 = vrot.slane %v4764_v33, 4  ;;  %v4740_v0 = vrot.slane %v4738_v3, 6  ;;  %v4743_v32 = vrot.slane %v4741_v61, 7  ;;  %v10529_v61 = vpop.f32.mrb[12].mxu0 }
 0x34d   : > { %v9715_v53 = vpack.c.bf16 %v4514_v52, %v4514_v52  ;;  %vm15763_vm15 = vnez %v15762_v42  ;;  %v4770_v31 = vrot.slane %v4768_v20, 6  ;;  %v4773_v29 = vrot.slane %v4771_v18, 7  ;;  %v15778_v20 = vld [vmem:[#allocation33_spill] sm:$0xff]  ;;  %v15779_v18 = vld [vmem:[#allocation24_spill] sm:$0xff] }
 0x34e   : > { %v15766_v39 = vsel %vm15763_vm15, %v15764_v5, %v15765_v21  ;;  %v9720_v50 = vpack.c.bf16 %v4519_v34, %v4519_v34  ;;  %v4481_v6 = vmax.f32 %v4445_v2, 0.0  ;;  %vm15770_vm0 = vnez %v15769_v25  ;;  %v4299_v25 = vpop.f32.mrb[13].mxu0 }
 0x34f   : > { %vm13784_vm10 = vcmp.lt.s32.totalorder %v15766_v39, 16  ;;  %v15773_v22 = vsel %vm15770_vm0, %v15771_v57, %v15772_v55  ;;  %v4744_v52 = vor.u32 %v4743_v32, %v4740_v0  ;;  %v4748_v42 = vshrl.u32 %v9715_v53, 16  ;;  %v15776_v39 = vld [vmem:[#allocation37_spill] sm:$0xff]  ;;  %v10530_v0 = vpop.f32.mrb[14].mxu0  ;;  %vm15798_vm0 = vmmov %vm15783_vm5 }
 0x350   : > { %vm13793_vm4 = vcmp.lt.s32.totalorder %v15773_v22, 16  ;;  %v4751_v5 = vshll.u32 %v9715_v53, 16  ;;  %v4484_v21 = vmax.f32 %v4448_v49, 0.0  ;;  %vm15777_vm13 = vnez %v15776_v39  ;;  %v4302_v26 = vpop.f32.mrb[15].mxu0 }
 0x351   : > { %v15780_v34 = vsel %vm15777_vm13, %v15778_v20, %v15779_v18  ;;  %v4774_v57 = vor.u32 %v4773_v29, %v4770_v31  ;;  %v4798_v55 = vshrl.u32 %v9720_v50, 16  ;;  %v4801_v22 = vshll.u32 %v9720_v50, 16  ;;  %vm15799_vm13 = vmmov %vm15798_vm0 }
 0x352   : > { %vm13802_vm6 = vcmp.lt.s32.totalorder %v15780_v34, 16  ;;  %v4517_v8 = vsel %vm13743_vm9, %v4481_v6, 0.0  ;;  %v4745_v49 = vsel %vm13726_vm7, %v4736_v43, %v4744_v52  ;;  %v4746_v32 = vrot.slane %v4744_v52, 4 }
 0x353   : > { %v4750_v53 = vrot.slane %v4748_v42, 6  ;;  %v4753_v39 = vrot.slane %v4751_v5, 7  ;;  %5103 = vst.msk [vmem:[#allocation2 + $0x18] sm:$0xf] %vm15753_vm11, %v4745_v49  ;;  %v4775_v20 = vsel %vm13726_vm7, %v4766_v27, %v4774_v57  ;;  %v4776_v18 = vrot.slane %v4774_v57, 4  ;;  %v15784_v27 = vld [vmem:[#allocation38_spill] sm:$0xff] }
 0x354   : > { %v4800_v31 = vrot.slane %v4798_v55, 6  ;;  %v4803_v29 = vrot.slane %v4801_v22, 7  ;;  %5106 = vst.msk [vmem:[#allocation2 + $0x24] sm:$0xf] %vm15783_vm5, %v4775_v20  ;;  %v9718_v50 = vpack.c.bf16 %v4517_v8, %v4517_v8  ;;  %v4520_v6 = vsel %vm13766_vm3, %v4484_v21, 0.0  ;;  %v15786_v57 = vld [vmem:[#allocation35_spill] sm:$0xff] }
 0x355   : > { %v4754_v38 = vor.u32 %v4753_v39, %v4750_v53  ;;  %v4446_v43 = vadd.f32 %v13527_v15, %v4286_v60  ;;  %v9721_v42 = vpack.c.bf16 %v4520_v6, %v4520_v6  ;;  %v4451_v5 = vadd.f32 %v10529_v61, %v13527_v15  ;;  %v15787_v55 = vld [vmem:[#allocation25_spill] sm:$0xff]  ;;  %v15791_v53 = vld [vmem:[#allocation40_spill] sm:$0xff]  ;;  %v15793_v61 = vld [vmem:[#allocation39_spill] sm:$0xff] }
 0x356   : > { %v13817_v52 = vor.u32 %v4803_v29, %v4800_v31  ;;  %v4449_v34 = vadd.f32 %v13527_v15, %v4299_v25  ;;  %vm15785_vm9 = vnez %v15784_v27  ;;  %v4778_v60 = vshrl.u32 %v9718_v50, 16  ;;  %v15794_v39 = vld [vmem:[#allocation27_spill] sm:$0xff] }
 0x357   : > { %v15788_v22 = vsel %vm15785_vm9, %v15786_v57, %v15787_v55  ;;  %v4755_v8 = vsel %vm13726_vm7, %v4746_v32, %v4754_v38  ;;  %v4756_v54 = vrot.slane %v4754_v38, 4  ;;  %v4781_v21 = vshll.u32 %v9718_v50, 16  ;;  %v10533_v32 = vpop.f32.mrb[16].mxu0  ;;  %vm15812_vm9 = vmmov %vm15798_vm0  ;;  %v11653_v20 = vld [vmem:[#allocation2 + $0x8] sm:$0xff]  }
 0x358   : > { %vm13826_vm12 = vcmp.lt.s32.totalorder %v15788_v22, 16  ;;  %vm15792_vm3 = vnez %v15791_v53  ;;  %5104 = vst.msk [vmem:[#allocation2 + $0x1c] sm:$0xf] %vm15798_vm0, %v4755_v8  ;;  %v4806_v31 = vrot.slane %v13817_v52, 4  ;;  %v4808_v29 = vshrl.u32 %v9721_v42, 16  ;;  %v4315_v22 = vpop.f32.mrb[17].mxu0 }
 0x359   : > { %v15795_v25 = vsel %vm15792_vm3, %v15793_v61, %v15794_v39  ;;  %v4811_v6 = vshll.u32 %v9721_v42, 16  ;;  %v4482_v27 = vmax.f32 %v4446_v43, 0.0  ;;  %v4765_v38 = vsel %vm13726_vm7, %v4756_v54, %v4764_v33  ;;  %v15802_v42 = vld [vmem:[#allocation41_spill] sm:$0xff]  ;;  %v15803_v43 = vld [vmem:[#allocation28_spill] sm:$0xff]  ;;  %v13857_v33 = vpop.f32.mrb[18].mxu0 }
 0x35a   : > { %vm13837_vm15 = vcmp.lt.s32.totalorder %v15795_v25, 16  ;;  %v4780_v50 = vrot.slane %v4778_v60, 6  ;;  %v4783_v57 = vrot.slane %v4781_v21, 7  ;;  %v4487_v55 = vmax.f32 %v4451_v5, 0.0  ;;  %5105 = vst.msk [vmem:[#allocation2 + $0x20] sm:$0xf] %vm15799_vm13, %v4765_v38  ;;  %vm15818_vm13 = vmmov %vm15798_vm0 }
 0x35b   : > { %v4810_v53 = vrot.slane %v4808_v29, 6  ;;  %v4813_v61 = vrot.slane %v4811_v6, 7  ;;  %v4518_v8 = vsel %vm13784_vm10, %v4482_v27, 0.0  ;;  %v4485_v39 = vmax.f32 %v4449_v34, 0.0  ;;  %v15800_v25 = vld [vmem:[#allocation42_spill] sm:$0xff]  ;;  %v13862_v21 = vpop.f32.mrb[19].mxu0  ;;  %vm15807_vm10 = vmmov %vm15798_vm0 }
 0x35c   : > { %vm15801_vm11 = vnez %v15800_v25  ;;  %v4784_v5 = vor.u32 %v4783_v57, %v4780_v50  ;;  %v9719_v54 = vpack.c.bf16 %v4518_v8, %v4518_v8  ;;  %v4523_v60 = vsel %vm13793_vm4, %v4487_v55, 0.0 }
 0x35d   : > { %v15804_v4 = vsel %vm15801_vm11, %v15802_v42, %v15803_v43  ;;  %v4452_v44 = vadd.f32 %v10530_v0, %v13527_v15  ;;  %v4814_v34 = vor.u32 %v4813_v61, %v4810_v53  ;;  %v9724_v29 = vpack.c.bf16 %v4523_v60, %v4523_v60 }
 0x35e   : > { %vm13853_vm5 = vcmp.lt.s32.totalorder %v15804_v4, 16  ;;  %v4521_v6 = vsel %vm13802_vm6, %v4485_v39, 0.0  ;;  %v4450_v4 = vadd.f32 %v13527_v15, %v4302_v26  ;;  %v4785_v27 = vsel %vm13726_vm7, %v4776_v18, %v4784_v5 }
 0x35f   : > { %v4786_v38 = vrot.slane %v4784_v5, 4  ;;  %v4788_v50 = vshrl.u32 %v9719_v54, 16  ;;  %v4791_v57 = vshll.u32 %v9719_v54, 16  ;;  %5107 = vst.msk [vmem:[#allocation2 + $0x28] sm:$0xf] %vm15807_vm10, %v4785_v27  ;;  %v4815_v3 = vsel %vm13726_vm7, %v4806_v31, %v4814_v34  ;;  %v13883_v5 = vpop.f32.mrb[20].mxu0 }
 0x360   : > { %v4816_v0 = vrot.slane %v4814_v34, 4  ;;  %v4838_v55 = vshrl.u32 %v9724_v29, 16  ;;  %v4841_v53 = vshll.u32 %v9724_v29, 16  ;;  %vm15808_vm4 = vnez %v15588_v13  ;;  %5110 = vst.msk [vmem:[#allocation2 + $0x34] sm:$0xf] %vm15812_vm9, %v4815_v3  ;;  %v13887_v60 = vpop.f32.mrb[21].mxu0 }
 0x361   : > { %v15809_v2 = vsel %vm15808_vm4, %v13153_v48, %v13116_v47  ;;  %v4790_v18 = vrot.slane %v4788_v50, 6  ;;  %v4793_v61 = vrot.slane %v4791_v57, 7  ;;  %v9722_v8 = vpack.c.bf16 %v4521_v6, %v4521_v6 }
 0x362   : > { %vm13877_vm6 = vcmp.lt.s32.totalorder %v15809_v2, 16  ;;  %v4488_v39 = vmax.f32 %v4452_v44, 0.0  ;;  %v4840_v25 = vrot.slane %v4838_v55, 6  ;;  %v4843_v31 = vrot.slane %v4841_v53, 7 }
 0x363   : > { %v4486_v42 = vmax.f32 %v4450_v4, 0.0  ;;  %v4455_v43 = vadd.f32 %v10533_v32, %v13527_v15  ;;  %v4794_v13 = vor.u32 %v4793_v61, %v4790_v18  ;;  %v4818_v54 = vshrl.u32 %v9722_v8, 16  ;;  %v13893_v4 = vpop.f32.mrb[22].mxu0 }
 0x364   : > { %v4821_v47 = vshll.u32 %v9722_v8, 16  ;;  %v4524_v48 = vsel %vm13826_vm12, %v4488_v39, 0.0  ;;  %v13889_v34 = vor.u32 %v4843_v31, %v4840_v25  ;;  %v13897_v3 = vpop.f32.mrb[23].mxu0  ;;  %vm15813_vm12 = vmmov %vm15798_vm0  ;;  %vm15814_vm3 = vnez %v15592_v23 }
 0x365   : > { %v9725_v29 = vpack.c.bf16 %v4524_v48, %v4524_v48  ;;  %v4522_v44 = vsel %vm13837_vm15, %v4486_v42, 0.0  ;;  %v4491_v6 = vmax.f32 %v4455_v43, 0.0  ;;  %v4795_v32 = vsel %vm13726_vm7, %v4786_v38, %v4794_v13 }
 0x366   : > { %v4796_v27 = vrot.slane %v4794_v13, 4  ;;  %v4820_v50 = vrot.slane %v4818_v54, 6  ;;  %v4823_v57 = vrot.slane %v4821_v47, 7  ;;  %5108 = vst.msk [vmem:[#allocation2 + $0x2c] sm:$0xf] %vm15813_vm12, %v4795_v32  ;;  %v4846_v49 = vrot.slane %v13889_v34, 4 }
 0x367   : > { %v4848_v55 = vshrl.u32 %v9725_v29, 16  ;;  %v4851_v53 = vshll.u32 %v9725_v29, 16  ;;  %v9723_v2 = vpack.c.bf16 %v4522_v44, %v4522_v44  ;;  %v15815_v18 = vsel %vm15814_vm3, %v13164_v7, %v13128_v10  ;;  %vm15832_vm3 = vmmov %vm15798_vm0  ;;  %v11729_v44 = vld [vmem:[%s15383_s3] sm:$0xff]  }
 0x368   : > { %vm13906_vm15 = vcmp.lt.s32.totalorder %v15815_v18, 16  ;;  %v4805_v61 = vsel %vm13726_vm7, %v4796_v27, %v13817_v52  ;;  %v4824_v8 = vor.u32 %v4823_v57, %v4820_v50  ;;  %v4527_v39 = vsel %vm13853_vm5, %v4491_v6, 0.0  ;;  %v13938_v6 = vpop.f32.mrb[24].mxu0  ;;  %v11655_v18 = vld [vmem:[#allocation2 + $0x10] sm:$0xff]  }
 0x369   : > { %v4453_v25 = vadd.f32 %v13527_v15, %v4315_v22  ;;  %5109 = vst.msk [vmem:[#allocation2 + $0x30] sm:$0xf] %vm15798_vm0, %v4805_v61  ;;  %v4850_v23 = vrot.slane %v4848_v55, 6  ;;  %v4853_v31 = vrot.slane %v4851_v53, 7  ;;  %v4828_v42 = vshrl.u32 %v9723_v2, 16  ;;  %v13942_v27 = vpop.f32.mrb[25].mxu0 }
 0x36a   : > { %v4831_v10 = vshll.u32 %v9723_v2, 16  ;;  %v4825_v7 = vsel %vm13726_vm7, %v4816_v0, %v4824_v8  ;;  %v4826_v43 = vrot.slane %v4824_v8, 4  ;;  %v9728_v13 = vpack.c.bf16 %v4527_v39, %v4527_v39  ;;  %v13955_v26 = vpop.f32.mrb[26].mxu0 }
 0x36b   : > { %v4489_v54 = vmax.f32 %v4453_v25, 0.0  ;;  %5111 = vst.msk [vmem:[#allocation2 + $0x38] sm:$0xf] %vm15818_vm13, %v4825_v7  ;;  %v4854_v52 = vor.u32 %v4853_v31, %v4850_v23  ;;  %v4830_v47 = vrot.slane %v4828_v42, 6  ;;  %v5287_v48 = vshll.u32 %v11653_v20, 16  ;;  %v13962_v8 = vpop.f32.mrb[27].mxu0 }
 0x36c   : > { %v4833_v9 = vrot.slane %v4831_v10, 7  ;;  %vm15819_vm11 = vnez %v15596_v41  ;;  %vm15823_vm10 = vnez %v15600_v17  ;;  %v4878_v32 = vshrl.u32 %v9728_v13, 16  ;;  %v13969_v42 = vld [vmem:[#allocation2 + $0x18] sm:$0xff]  }
 0x36d   : > { %v15820_v22 = vsel %vm15819_vm11, %v13180_v59, %v13144_v28  ;;  %v15824_v0 = vsel %vm15823_vm10, %v13195_v58, %v13156_v14  ;;  %v4881_v41 = vshll.u32 %v9728_v13, 16  ;;  %v4525_v28 = vsel %vm13877_vm6, %v4489_v54, 0.0  ;;  %vm15831_vm6 = vmmov %vm15798_vm0 }
 0x36e   : > { %vm13925_vm5 = vcmp.lt.s32.totalorder %v15820_v22, 16  ;;  %vm13934_vm4 = vcmp.lt.s32.totalorder %v15824_v0, 16  ;;  %v5291_v59 = vshrl.u32 %v11653_v20, 16  ;;  %v4855_v17 = vsel %vm13726_vm7, %v4846_v49, %v4854_v52  ;;  %vm15835_vm11 = vmmov %vm15832_vm3  ;;  %v13996_v22 = vpop.f32.mrb[28].mxu0 }
 0x36f   : > { %v4856_v50 = vrot.slane %v4854_v52, 4  ;;  %v4834_v57 = vor.u32 %v4833_v9, %v4830_v47  ;;  %v9726_v14 = vpack.c.bf16 %v4525_v28, %v4525_v28  ;;  %vm15827_vm9 = vnez %v15604_v12  ;;  %5114 = vst.msk [vmem:[#allocation2 + $0x44] sm:$0xf] %vm15831_vm6, %v4855_v17 }
 0x370   : > { %v15828_v58 = vsel %vm15827_vm9, %v13251_v36, %v13168_v46  ;;  %v4880_v53 = vrot.slane %v4878_v32, 6  ;;  %v4883_v2 = vrot.slane %v4881_v41, 7  ;;  %v5289_v20 = vrot.slane %v5287_v48, 1  ;;  %v13999_v41 = vpop.f32.mrb[29].mxu0 }
 0x371   : > { %vm13951_vm12 = vcmp.lt.s32.totalorder %v15828_v58, 16  ;;  %v4456_v49 = vadd.f32 %v13857_v33, %v13527_v15  ;;  %v4835_v12 = vsel %vm13726_vm7, %v4826_v43, %v4834_v57  ;;  %v4836_v61 = vrot.slane %v4834_v57, 4  ;;  %v14008_v17 = vpop.f32.mrb[30].mxu0 }
 0x372   : > { %v4858_v46 = vshrl.u32 %v9726_v14, 16  ;;  %v4861_v36 = vshll.u32 %v9726_v14, 16  ;;  %5112 = vst.msk [vmem:[#allocation2 + $0x3c] sm:$0xf] %vm15832_vm3, %v4835_v12  ;;  %v13965_v39 = vor.u32 %v4883_v2, %v4880_v53  ;;  %vm15833_vm0 = vsmask.f32 7424 }
 0x373   : > { %v5290_v25 = vsel %vm15833_vm0, %v13319_v62, %v5289_v20  ;;  %v5293_v23 = vor.u32 %v5291_v59, %v5289_v20  ;;  %v4492_v31 = vmax.f32 %v4456_v49, 0.0  ;;  %v4845_v33 = vsel %vm13726_vm7, %v4836_v61, %v13889_v34  ;;  %vm15841_vm6 = vmmov %vm15833_vm0  ;;  %v14025_v20 = vpop.f32.mrb[31].mxu0 }
 0x374   : > { %v4860_v10 = vrot.slane %v4858_v46, 6  ;;  %v4863_v7 = vrot.slane %v4861_v36, 7  ;;  %vm15834_vm13 = vcmask 261120   ;;  %v4454_v43 = vadd.f32 %v13527_v15, %v13862_v21  ;;  %5113 = vst.msk [vmem:[#allocation2 + $0x40] sm:$0xf] %vm15835_vm11, %v4845_v33 }
 0x375   : > { %10555 = vmatprep.mubr.msk.bf16.mxu1 %vm15834_vm13, %v5290_v25  ;;  %v4886_v13 = vrot.slane %v13965_v39, 4  ;;  %v4528_v62 = vsel %vm13906_vm15, %v4492_v31, 0.0  ;;  %v5295_v54 = vshll.u32 %v11655_v18, 16  ;;  %v4459_v52 = vadd.f32 %v13883_v5, %v13527_v15  ;;  %vm15840_vm15 = vmmov %vm15832_vm3  ;;  %v14038_v31 = vld [vmem:[%s15383_s3 + $0x20] sm:$0xff]  }
 0x376   : > { %vm15836_vm10 = vnez %v15608_v24  ;;  %v13992_v21 = vor.u32 %v4863_v7, %v4860_v10  ;;  %v9729_v9 = vpack.c.bf16 %v4528_v62, %v4528_v62  ;;  %v4490_v48 = vmax.f32 %v4454_v43, 0.0 }
 0x377   : > { %v15837_v34 = vsel %vm15836_vm10, %v13309_v51, %v13225_v35  ;;  %v4457_v38 = vadd.f32 %v13527_v15, %v13887_v60  ;;  %v5297_v0 = vrot.slane %v5295_v54, 1  ;;  %v4495_v5 = vmax.f32 %v4459_v52, 0.0  ;;  %v11664_v51 = vld [vmem:[%s15383_s3 + $0x8] sm:$0xff]   ;;  %vm15853_vm10 = vmmov %vm15840_vm15 }
 0x378   : > { %vm13988_vm9 = vcmp.lt.s32.totalorder %v15837_v34, 16  ;;  %v5299_v32 = vshrl.u32 %v11655_v18, 16  ;;  %v5303_v24 = vshll.u32 %v13969_v42, 16  ;;  %v4865_v35 = vsel %vm13726_vm7, %v4856_v50, %v13992_v21 }
 0x379   : > { %v4866_v28 = vrot.slane %v13992_v21, 4  ;;  %v4888_v60 = vshrl.u32 %v9729_v9, 16  ;;  %v4891_v59 = vshll.u32 %v9729_v9, 16  ;;  %5115 = vst.msk [vmem:[#allocation2 + $0x48] sm:$0xf] %vm15840_vm15, %v4865_v35  ;;  %v4526_v57 = vsel %vm13925_vm5, %v4490_v48, 0.0  ;;  %vm15846_vm5 = vmmov %vm15834_vm13 }
 0x37a   : > { %v5298_v14 = vsel %vm15841_vm6, %v5293_v23, %v5297_v0  ;;  %v4531_v58 = vsel %vm13934_vm4, %v4495_v5, 0.0  ;;  %v4493_v53 = vmax.f32 %v4457_v38, 0.0  ;;  %vm15842_vm3 = vnez %v15614_v40  ;;  %vm15847_vm4 = vmmov %vm15841_vm6  ;;  %v14053_v21 = vpop.f32.mrb[32].mxu0  ;;  %v14062_v5 = vld [vmem:[#allocation2 + $0x20] sm:$0xff]  }
 0x37b   : > { %v15843_v50 = vsel %vm15842_vm3, %v13368_v30, %v13328_v45  ;;  %v4890_v49 = vrot.slane %v4888_v60, 6  ;;  %v4893_v29 = vrot.slane %v4891_v59, 7  ;;  %v9727_v18 = vpack.c.bf16 %v4526_v57, %v4526_v57  ;;  %10556 = vmatmul.mubr.msk.bf16.vlgmr.msra.gmra.mrb[0].mxu1 %vm15846_vm5, %v5298_v14  ;;  %vm15852_vm11 = vmmov %vm15846_vm5  ;;  %v15858_v14 = vld [vmem:[#allocation50_spill] sm:$0xff] }
 0x37c   : > { %vm14021_vm0 = vcmp.lt.s32.totalorder %v15843_v50, 16  ;;  %v9732_v12 = vpack.c.bf16 %v4531_v58, %v4531_v58  ;;  %10592 = vmatpush3.bf16.msra.mxu1 %v11729_v44  ;;  %v4529_v45 = vsel %vm13951_vm12, %v4493_v53, 0.0  ;;  %v5301_v30 = vor.u32 %v5299_v32, %v5297_v0  ;;  %v15860_v58 = vld [vmem:[#allocation51_spill] sm:$0xff]  ;;  %vm15865_vm5 = vmmov %vm15853_vm10 }
 0x37d   : > { %v5305_v40 = vrot.slane %v5303_v24, 1  ;;  %v4460_v61 = vadd.f32 %v13893_v4, %v13527_v15  ;;  %v4894_v46 = vor.u32 %v4893_v29, %v4890_v49  ;;  %v4868_v36 = vshrl.u32 %v9727_v18, 16  ;;  %10593 = vmatprep.subr.bf16.mxu1 %v11664_v51  ;;  %v15861_v53 = vld [vmem:[#allocation43_spill] sm:$0xff] }
 0x37e   : > { %v4871_v25 = vshll.u32 %v9727_v18, 16  ;;  %v4918_v23 = vshrl.u32 %v9732_v12, 16  ;;  %v4921_v33 = vshll.u32 %v9732_v12, 16  ;;  %v9730_v10 = vpack.c.bf16 %v4529_v45, %v4529_v45 }
 0x37f   : > { %v5306_v55 = vsel %vm15847_vm4, %v5301_v30, %v5305_v40  ;;  %v4496_v7 = vmax.f32 %v4460_v61, 0.0  ;;  %vm15848_vm12 = vnez %v15620_v11  ;;  %v4895_v62 = vsel %vm13726_vm7, %v4886_v13, %v4894_v46  ;;  %vm15866_vm4 = vmmov %vm15865_vm5 }
 0x380   : > { %v15849_v4 = vsel %vm15848_vm12, %v13382_v1, %v13349_v56  ;;  %v4896_v54 = vrot.slane %v4894_v46, 4  ;;  %v4870_v52 = vrot.slane %v4868_v36, 6  ;;  %v4873_v34 = vrot.slane %v4871_v25, 7  ;;  %10559 = vmatprep.mubr.msk.bf16.mxu1 %vm15852_vm11, %v5306_v55  ;;  %5118 = vst.msk [vmem:[#allocation2 + $0x54] sm:$0xf] %vm15853_vm10, %v4895_v62  ;;  %v14056_v1 = vpop.f32.mrb[33].mxu0  ;;  %10594 = vmatpush3.bf16.msra.mxu1 %v11664_v51  ;;  %vm15867_vm12 = vmmov %vm15866_vm4 }
 0x381   : > { %vm14046_vm13 = vcmp.lt.s32.totalorder %v15849_v4, 16  ;;  %v4920_v11 = vrot.slane %v4918_v23, 6  ;;  %v4923_v9 = vrot.slane %v4921_v33, 7  ;;  %v4898_v48 = vshrl.u32 %v9730_v10, 16  ;;  %v14074_v51 = vpop.f32.mrb[34].mxu0  ;;  %10631 = vmatprep.subr.bf16.mxu1 %v14038_v31  ;;  %vm15876_vm10 = vmmov %vm15866_vm4 }
 0x382   : > { %v4901_v56 = vshll.u32 %v9730_v10, 16  ;;  %v4874_v38 = vor.u32 %v4873_v34, %v4870_v52  ;;  %v4532_v13 = vsel %vm13988_vm9, %v4496_v7, 0.0  ;;  %v4458_v0 = vadd.f32 %v13527_v15, %v13897_v3  ;;  %v14079_v57 = vpop.f32.mrb[35].mxu0  ;;  %v15869_v7 = vld [vmem:[#allocation57_spill] sm:$0xff] }
 0x383   : > { %v5307_v32 = vshrl.u32 %v13969_v42, 16  ;;  %vm15854_vm15 = vnez %v15628_v37  ;;  %v14077_v47 = vor.u32 %v4923_v9, %v4920_v11  ;;  %v4900_v3 = vrot.slane %v4898_v48, 6 }
 0x384   : > { %v15855_v24 = vsel %vm15854_vm15, %v13398_v63, %v13363_v19  ;;  %v4903_v60 = vrot.slane %v4901_v56, 7  ;;  %v9733_v59 = vpack.c.bf16 %v4532_v13, %v4532_v13  ;;  %v4875_v37 = vsel %vm13726_vm7, %v4866_v28, %v4874_v38  ;;  %v14094_v28 = vld [vmem:[#allocation2 + $0x28] sm:$0xff]  }
 0x385   : > { %vm14070_vm6 = vcmp.lt.s32.totalorder %v15855_v24, 16  ;;  %v4876_v42 = vrot.slane %v4874_v38, 4  ;;  %v4494_v19 = vmax.f32 %v4458_v0, 0.0  ;;  %v5309_v63 = vor.u32 %v5307_v32, %v5305_v40  ;;  %5116 = vst.msk [vmem:[#allocation2 + $0x4c] sm:$0xf] %vm15865_vm5, %v4875_v37 }
 0x386   : > { %vm15859_vm9 = vnez %v15858_v14  ;;  %v4926_v29 = vrot.slane %v14077_v47, 4  ;;  %v4904_v18 = vor.u32 %v4903_v60, %v4900_v3  ;;  %v4928_v12 = vshrl.u32 %v9733_v59, 16 }
 0x387   : > { %v15862_v50 = vsel %vm15859_vm9, %v15860_v58, %v15861_v53  ;;  %v4931_v44 = vshll.u32 %v9733_v59, 16  ;;  %v4885_v45 = vsel %vm13726_vm7, %v4876_v42, %v13965_v39  ;;  %v4530_v30 = vsel %vm14021_vm0, %v4494_v19, 0.0  ;;  %v14139_v53 = vld [vmem:[#allocation2 + $0x30] sm:$0xff]  }
 0x388   : > { %vm14088_vm3 = vcmp.lt.s32.totalorder %v15862_v50, 16  ;;  %v5311_v40 = vshll.u32 %v14062_v5, 16  ;;  %v4463_v61 = vadd.f32 %v13938_v6, %v13527_v15  ;;  %5117 = vst.msk [vmem:[#allocation2 + $0x50] sm:$0xf] %vm15866_vm4, %v4885_v45  ;;  %v4905_v46 = vsel %vm13726_vm7, %v4896_v54, %v4904_v18  ;;  %v15870_v6 = vld [vmem:[#allocation44_spill] sm:$0xff] }
 0x389   : > { %v4906_v36 = vrot.slane %v4904_v18, 4  ;;  %v4930_v25 = vrot.slane %v4928_v12, 6  ;;  %v4933_v23 = vrot.slane %v4931_v44, 7  ;;  %5119 = vst.msk [vmem:[#allocation2 + $0x58] sm:$0xf] %vm15867_vm12, %v4905_v46  ;;  %v9731_v33 = vpack.c.bf16 %v4530_v30, %v4530_v30  ;;  %v15880_v18 = vld [vmem:[#allocation45_spill] sm:$0xff] }
 0x38a   : > { %v5313_v39 = vrot.slane %v5311_v40, 1  ;;  %v4499_v10 = vmax.f32 %v4463_v61, 0.0  ;;  %v4461_v2 = vadd.f32 %v13527_v15, %v13942_v27  ;;  %v15871_v4 = vsel %vm13489_vm14, %v15869_v7, %v15870_v6  ;;  %v15885_v45 = vld [vmem:[#allocation60_spill] sm:$0xff]  ;;  %v15886_v30 = vld [vmem:[#allocation46_spill] sm:$0xff] }
 0x38b   : > { %vm14115_vm0 = vcmp.lt.s32.totalorder %v15871_v4, 16  ;;  %v14119_v54 = vor.u32 %v4933_v23, %v4930_v25  ;;  %v5315_v52 = vshrl.u32 %v14062_v5, 16  ;;  %v5319_v34 = vshll.u32 %v14094_v28, 16  ;;  %v15912_v61 = vld [vmem:[#allocation66_spill] sm:$0xff] }
 0x38c   : > { %v4464_v11 = vadd.f32 %v13955_v26, %v13527_v15  ;;  %v4908_v9 = vshrl.u32 %v9731_v33, 16  ;;  %v4911_v27 = vshll.u32 %v9731_v33, 16  ;;  %vm15874_vm11 = vsmask.f32 7424 }
 0x38d   : > { %v5314_v48 = vsel %vm15874_vm11, %v5309_v63, %v5313_v39  ;;  %v4535_v56 = vsel %vm14046_vm13, %v4499_v10, 0.0  ;;  %v4935_v38 = vsel %vm13726_vm7, %v4926_v29, %v14119_v54  ;;  %v4936_v13 = vrot.slane %v14119_v54, 4  ;;  %vm15877_vm13 = vmmov %vm15874_vm11  ;;  %v15879_v29 = vld [vmem:[#allocation58_spill] sm:$0xff] }
 0x38e   : > { %vm15875_vm14 = vcmask 261120   ;;  %v9736_v0 = vpack.c.bf16 %v4535_v56, %v4535_v56  ;;  %v4497_v32 = vmax.f32 %v4461_v2, 0.0  ;;  %5122 = vst.msk [vmem:[#allocation2 + $0x64] sm:$0xf] %vm15876_vm10, %v4935_v38  ;;  %v4910_v26 = vrot.slane %v4908_v9, 6  ;;  %vm15907_vm12 = vmmov %vm15874_vm11 }
 0x38f   : > { %10560 = vmatmul.mubr.msk.bf16.gmra.mrb[4].mxu1 %vm15875_vm14, %v5314_v48  ;;  %v4913_v24 = vrot.slane %v4911_v27, 7  ;;  %v5317_v3 = vor.u32 %v5315_v52, %v5313_v39  ;;  %v5321_v60 = vrot.slane %v5319_v34, 1  ;;  %v4500_v42 = vmax.f32 %v4464_v11, 0.0  ;;  %vm15890_vm9 = vmmov %vm15875_vm14 }
 0x390   : > { %v4958_v59 = vshrl.u32 %v9736_v0, 16  ;;  %v4961_v37 = vshll.u32 %v9736_v0, 16  ;;  %v4533_v43 = vsel %vm14070_vm6, %v4497_v32, 0.0  ;;  %v4462_v58 = vadd.f32 %v13527_v15, %v13962_v8  ;;  %v14183_v0 = vld [vmem:[#allocation2 + $0x38] sm:$0xff]  }
 0x391   : > { %v4914_v19 = vor.u32 %v4913_v24, %v4910_v26  ;;  %v9734_v63 = vpack.c.bf16 %v4533_v43, %v4533_v43  ;;  %v5322_v14 = vsel %vm15877_vm13, %v5317_v3, %v5321_v60  ;;  %v15881_v12 = vsel %vm13515_vm8, %v15879_v29, %v15880_v18  ;;  %v15894_v26 = vld [vmem:[#allocation62_spill] sm:$0xff]  ;;  %v15895_v24 = vld [vmem:[#allocation47_spill] sm:$0xff] }
 0x392   : > { %vm14146_vm15 = vcmp.lt.s32.totalorder %v15881_v12, 16  ;;  %v15887_v40 = vsel %vm13539_vm2, %v15885_v45, %v15886_v30  ;;  %v4960_v15 = vrot.slane %v4958_v59, 6  ;;  %v4963_v8 = vrot.slane %v4961_v37, 7  ;;  %10563 = vmatprep.mubr.msk.bf16.mxu1 %vm15890_vm9, %v5322_v14  ;;  %vm15891_vm2 = vmmov %vm15866_vm4  ;;  %v14210_v30 = vld [vmem:[#allocation2 + $0x40] sm:$0xff]  }
 0x393   : > { %vm14155_vm6 = vcmp.lt.s32.totalorder %v15887_v40, 16  ;;  %v4536_v46 = vsel %vm14088_vm3, %v4500_v42, 0.0  ;;  %v5323_v25 = vshrl.u32 %v14094_v28, 16  ;;  %v4915_v23 = vsel %vm13726_vm7, %v4906_v36, %v4914_v19  ;;  %vm15892_vm8 = vmmov %vm15891_vm2  ;;  %v15899_v42 = vld [vmem:[#allocation63_spill] sm:$0xff] }
 0x394   : > { %v4916_v33 = vrot.slane %v4914_v19, 4  ;;  %v4938_v39 = vshrl.u32 %v9734_v63, 16  ;;  %v4941_v10 = vshll.u32 %v9734_v63, 16  ;;  %5120 = vst.msk [vmem:[#allocation2 + $0x5c] sm:$0xf] %vm15891_vm2, %v4915_v23  ;;  %v14166_v2 = vor.u32 %v4963_v8, %v4960_v15  ;;  %v15902_v19 = vld [vmem:[#allocation48_spill] sm:$0xff] }
 0x395   : > { %v9737_v55 = vpack.c.bf16 %v4536_v46, %v4536_v46  ;;  %v4498_v7 = vmax.f32 %v4462_v58, 0.0  ;;  %v5325_v6 = vor.u32 %v5323_v25, %v5321_v60  ;;  %v5327_v52 = vshll.u32 %v14139_v53, 16 }
 0x396   : > { %v4925_v49 = vsel %vm13726_vm7, %v4916_v33, %v14077_v47  ;;  %v4940_v4 = vrot.slane %v4938_v39, 6  ;;  %v4943_v54 = vrot.slane %v4941_v10, 7  ;;  %v4966_v36 = vrot.slane %v14166_v2, 4  ;;  %v14179_v47 = vld [vmem:[%s15382_s2] ss:$0 sm:$0xff] }
 0x397   : > { %5121 = vst.msk [vmem:[#allocation2 + $0x60] sm:$0xf] %vm15892_vm8, %v4925_v49  ;;  %v4968_v34 = vshrl.u32 %v9737_v55, 16  ;;  %v4971_v11 = vshll.u32 %v9737_v55, 16  ;;  %v4534_v9 = vsel %vm14115_vm0, %v4498_v7, 0.0  ;;  %v5329_v56 = vrot.slane %v5327_v52, 1  ;;  %vm15908_vm0 = vmmov %vm15890_vm9 }
 0x398   : > { %v4944_v27 = vor.u32 %v4943_v54, %v4940_v4  ;;  %v9735_v48 = vpack.c.bf16 %v4534_v9, %v4534_v9  ;;  %v4467_v38 = vadd.f32 %v14179_v47, %v13996_v22  ;;  %v15896_v3 = vsel %vm13556_vm1, %v15894_v26, %v15895_v24  ;;  %v15901_v22 = vld [vmem:[#allocation64_spill] sm:$0xff]  ;;  %vm15906_vm1 = vmmov %vm15891_vm2  ;;  %v15910_v54 = vld [vmem:[#allocation65_spill] sm:$0xff] }
 0x399   : > { %vm14190_vm3 = vcmp.lt.s32.totalorder %v15896_v3, 16  ;;  %v4970_v60 = vrot.slane %v4968_v34, 6  ;;  %v4973_v59 = vrot.slane %v4971_v11, 7  ;;  %v4465_v37 = vadd.f32 %v14179_v47, %v13999_v41  ;;  %vm15909_vm11 = vmmov %vm15906_vm1  ;;  %v15913_v52 = vld [vmem:[#allocation49_spill] sm:$0xff]  ;;  %v15917_v11 = vld [vmem:[#allocation67_spill] sm:$0xff] }
 0x39a   : > { %v5331_v43 = vshrl.u32 %v14139_v53, 16  ;;  %vm15900_vm5 = vnez %v15899_v42  ;;  %v4945_v58 = vsel %vm13726_vm7, %v4936_v13, %v4944_v27  ;;  %v4946_v50 = vrot.slane %v4944_v27, 4  ;;  %v15919_v9 = vld [vmem:[#allocation68_spill] sm:$0xff]  ;;  %vm15925_vm9 = vmmov %vm15907_vm12 }
 0x39b   : > { %v15903_v63 = vsel %vm15900_vm5, %v15901_v22, %v15902_v19  ;;  %v4948_v29 = vshrl.u32 %v9735_v48, 16  ;;  %v4951_v18 = vshll.u32 %v9735_v48, 16  ;;  %5123 = vst.msk [vmem:[#allocation2 + $0x68] sm:$0xf] %vm15906_vm1, %v4945_v58  ;;  %v4974_v41 = vor.u32 %v4973_v59, %v4970_v60  ;;  %vm15926_vm2 = vmmov %vm15908_vm0 }
 0x39c   : > { %vm14202_vm4 = vcmp.lt.s32.totalorder %v15903_v63, 16  ;;  %v5330_v12 = vsel %vm15907_vm12, %v5325_v6, %v5329_v56  ;;  %v4503_v35 = vmax.f32 %v4467_v38, 0.0  ;;  %v4501_v45 = vmax.f32 %v4465_v37, 0.0  ;;  %vm15927_vm8 = vmmov %vm15906_vm1 }
 0x39d   : > { %v4950_v40 = vrot.slane %v4948_v29, 6  ;;  %v4953_v15 = vrot.slane %v4951_v18, 7  ;;  %10564 = vmatmul.mubr.msk.bf16.gmra.mrb[8].mxu1 %vm15908_vm0, %v5330_v12  ;;  %v5333_v8 = vor.u32 %v5331_v43, %v5329_v56  ;;  %v5335_v46 = vshll.u32 %v14183_v0, 16  ;;  %v15930_v29 = vld [vmem:[#allocation7_spill] sm:$0xff]  ;;  %v15931_v18 = vld [vmem:[#allocation54_spill] sm:$0xff] }
 0x39e   : > { %v4975_v13 = vsel %vm13726_vm7, %v4966_v36, %v4974_v41  ;;  %v4976_v25 = vrot.slane %v4974_v41, 4  ;;  %v4539_v23 = vsel %vm14146_vm15, %v4503_v35, 0.0  ;;  %v4537_v33 = vsel %vm14155_vm6, %v4501_v45, 0.0  ;;  %vm15924_vm6 = vmmov %vm15906_vm1 }
 0x39f   : > { %5126 = vst.msk [vmem:[#allocation2 + $0x74] sm:$0xf] %vm15909_vm11, %v4975_v13  ;;  %v4954_v39 = vor.u32 %v4953_v15, %v4950_v40  ;;  %v9740_v10 = vpack.c.bf16 %v4539_v23, %v4539_v23  ;;  %v9738_v55 = vpack.c.bf16 %v4537_v33, %v4537_v33  ;;  %v5337_v7 = vrot.slane %v5335_v46, 1  ;;  %v14267_v15 = vld [vmem:[#allocation2 + $0x48] sm:$0xff]   ;;  %vm15937_vm12 = vmmov %vm15924_vm6 }
 0x3a0   : > { %v4468_v6 = vadd.f32 %v14179_v47, %v14008_v17  ;;  %v4466_v49 = vadd.f32 %v14179_v47, %v14025_v20  ;;  %v5339_v4 = vshrl.u32 %v14183_v0, 16  ;;  %v5343_v44 = vshll.u32 %v14210_v30, 16  ;;  %v15920_v17 = vld [vmem:[#allocation52_spill] sm:$0xff] }
 0x3a1   : > { %vm15911_vm14 = vnez %v15910_v54  ;;  %vm15918_vm13 = vnez %v15917_v11  ;;  %v4955_v48 = vsel %vm13726_vm7, %v4946_v50, %v4954_v39  ;;  %v4956_v56 = vrot.slane %v4954_v39, 4  ;;  %v15928_v50 = vld [vmem:[#allocation8_spill] sm:$0xff] }
 0x3a2   : > { %v15914_v36 = vsel %vm15911_vm14, %v15912_v61, %v15913_v52  ;;  %v15921_v27 = vsel %vm15918_vm13, %v15919_v9, %v15920_v17  ;;  %v4998_v38 = vshrl.u32 %v9740_v10, 16  ;;  %v5001_v32 = vshll.u32 %v9740_v10, 16  ;;  %5124 = vst.msk [vmem:[#allocation2 + $0x6c] sm:$0xf] %vm15924_vm6, %v4955_v48  ;;  %v15941_v11 = vld [vmem:[#allocation56_spill] sm:$0xff]  ;;  %vm15945_vm13 = vmmov %vm15924_vm6 }
 0x3a3   : > { %vm14232_vm10 = vcmp.lt.s32.totalorder %v15914_v36, 16  ;;  %vm14241_vm15 = vcmp.lt.s32.totalorder %v15921_v27, 16  ;;  %v4978_v26 = vshrl.u32 %v9738_v55, 16  ;;  %v4981_v24 = vshll.u32 %v9738_v55, 16  ;;  %v15938_v36 = vld [vmem:[#allocation69_spill] sm:$0xff] }
 0x3a4   : > { %v5338_v3 = vsel %vm15925_vm9, %v5333_v8, %v5337_v7  ;;  %v4504_v60 = vmax.f32 %v4468_v6, 0.0  ;;  %v4965_v59 = vsel %vm13726_vm7, %v4956_v56, %v14166_v2  ;;  %v5000_v37 = vrot.slane %v4998_v38, 6 }
 0x3a5   : > { %v5003_v43 = vrot.slane %v5001_v32, 7  ;;  %10567 = vmatprep.mubr.msk.bf16.mxu1 %vm15926_vm2, %v5338_v3  ;;  %v4502_v42 = vmax.f32 %v4466_v49, 0.0  ;;  %5125 = vst.msk [vmem:[#allocation2 + $0x70] sm:$0xf] %vm15927_vm8, %v4965_v59  ;;  %v4980_v22 = vrot.slane %v4978_v26, 6  ;;  %v4983_v19 = vrot.slane %v4981_v24, 7 }
 0x3a6   : > { %v4540_v63 = vsel %vm14190_vm3, %v4504_v60, 0.0  ;;  %v5341_v58 = vor.u32 %v5339_v4, %v5337_v7  ;;  %vm15929_vm5 = vnez %v15928_v50  ;;  %v5345_v40 = vrot.slane %v5343_v44, 1  ;;  %vm15935_vm3 = vmmov %vm15925_vm9 }
 0x3a7   : > { %v15932_v41 = vsel %vm15929_vm5, %v15930_v29, %v15931_v18  ;;  %v5004_v12 = vor.u32 %v5003_v43, %v5000_v37  ;;  %v9741_v35 = vpack.c.bf16 %v4540_v63, %v4540_v63  ;;  %v4538_v45 = vsel %vm14202_vm4, %v4502_v42, 0.0  ;;  %vm15936_vm4 = vmmov %vm15908_vm0 }
 0x3a8   : > { %vm14261_vm1 = vcmp.lt.s32.totalorder %v15932_v41, 16  ;;  %v4984_v62 = vor.u32 %v4983_v19, %v4980_v22  ;;  %v9739_v8 = vpack.c.bf16 %v4538_v45, %v4538_v45  ;;  %v4471_v46 = vadd.f32 %v14179_v47, %v14053_v21  ;;  %vm15949_vm9 = vmmov %vm15927_vm8 }
 0x3a9   : > { %v4469_v13 = vadd.f32 %v14179_v47, %v14056_v1  ;;  %v5006_v23 = vrot.slane %v5004_v12, 4  ;;  %v5008_v33 = vshrl.u32 %v9741_v35, 16  ;;  %v5011_v39 = vshll.u32 %v9741_v35, 16 }
 0x3aa   : > { %v5346_v10 = vsel %vm15935_vm3, %v5341_v58, %v5345_v40  ;;  %v4985_v14 = vsel %vm13726_vm7, %v4976_v25, %v4984_v62  ;;  %v4986_v55 = vrot.slane %v4984_v62, 4  ;;  %v4988_v7 = vshrl.u32 %v9739_v8, 16  ;;  %v15940_v25 = vld [vmem:[#allocation3_spill] sm:$0xff] }
 0x3ab   : > { %v4991_v6 = vshll.u32 %v9739_v8, 16  ;;  %10568 = vmatmul.mubr.msk.bf16.gmra.mrb[12].mxu1 %vm15936_vm4, %v5346_v10  ;;  %5127 = vst.msk [vmem:[#allocation2 + $0x78] sm:$0xf] %vm15937_vm12, %v4985_v14  ;;  %v5010_v49 = vrot.slane %v5008_v33, 6  ;;  %v5013_v21 = vrot.slane %v5011_v39, 7  ;;  %v4507_v4 = vmax.f32 %v4471_v46, 0.0 }
 0x3ac   : > { %v4505_v44 = vmax.f32 %v4469_v13, 0.0  ;;  %v4990_v1 = vrot.slane %v4988_v7, 6  ;;  %v5347_v61 = vshrl.u32 %v14210_v30, 16  ;;  %v5351_v52 = vshll.u32 %v14267_v15, 16  ;;  %v14313_v46 = vld [vmem:[#allocation2 + $0x58] sm:$0xff]  }
 0x3ad   : > { %v4993_v54 = vrot.slane %v4991_v6, 7  ;;  %vm15939_vm0 = vnez %v15938_v36  ;;  %v5014_v27 = vor.u32 %v5013_v21, %v5010_v49  ;;  %v4543_v48 = vsel %vm14232_vm10, %v4507_v4, 0.0  ;;  %vm15946_vm10 = vmmov %vm15924_vm6 }
 0x3ae   : > { %v15942_v9 = vsel %vm15939_vm0, %v15940_v25, %v15941_v11  ;;  %v4541_v56 = vsel %vm14241_vm15, %v4505_v44, 0.0  ;;  %v4472_v38 = vadd.f32 %v14179_v47, %v14074_v51  ;;  %v9744_v26 = vpack.c.bf16 %v4543_v48, %v4543_v48  ;;  %v14300_v51 = vld [vmem:[#allocation2 + $0x50] sm:$0xff]   ;;  %vm15947_vm15 = vmmov %vm15935_vm3  ;;  %v14324_v44 = vld [vmem:[#allocation2 + $0x68] sm:$0xff]  }
 0x3af   : > { %vm14285_vm11 = vcmp.lt.s32.totalorder %v15942_v9, 16  ;;  %v4994_v32 = vor.u32 %v4993_v54, %v4990_v1  ;;  %v9742_v24 = vpack.c.bf16 %v4541_v56, %v4541_v56  ;;  %v5349_v3 = vor.u32 %v5347_v61, %v5345_v40  ;;  %vm15948_vm6 = vmmov %vm15926_vm2  ;;  %v5137_v54 = vld [vmem:[#allocation2 + $0x98] sm:$0x3]  ;;  %v14338_v48 = vld [vmem:[#allocation2 + $0x70] sm:$0xff]  }
 0x3b0   : > { %vm5135_vm14 = vcmask 254976   ;;  %v5015_v60 = vsel %vm13726_vm7, %v5006_v23, %v5014_v27  ;;  %v5016_v59 = vrot.slane %v5014_v27, 4  ;;  %v5353_v37 = vrot.slane %v5351_v52, 1  ;;  %vm15950_vm2 = vmmov %vm15927_vm8  ;;  %v6220_v25 = vld [vmem:[#allocation2 + $0x8] sm:$0xe] }
 0x3b1   : > { %v4508_v43 = vmax.f32 %v4472_v38, 0.0  ;;  %5130 = vst.msk [vmem:[#allocation2 + $0x84] sm:$0xf] %vm15945_vm13, %v5015_v60  ;;  %v4995_v34 = vsel %vm13726_vm7, %v4986_v55, %v4994_v32  ;;  %v4996_v20 = vrot.slane %v4994_v32, 4  ;;  %v5038_v42 = vshrl.u32 %v9744_v26, 16  ;;  %v14317_v55 = vld [vmem:[#allocation2 + $0x60] sm:$0xff]   ;;  %vm15951_vm8 = vmmov %vm15935_vm3 }
 0x3b2   : > { %v5041_v22 = vshll.u32 %v9744_v26, 16  ;;  %5128 = vst.msk [vmem:[#allocation2 + $0x7c] sm:$0xf] %vm15946_vm10, %v4995_v34  ;;  %v5018_v19 = vshrl.u32 %v9742_v24, 16  ;;  %v5021_v63 = vshll.u32 %v9742_v24, 16  ;;  %v5354_v58 = vsel %vm15947_vm15, %v5349_v3, %v5353_v37  ;;  %vm15955_vm3 = vmmov %vm15936_vm4 }
 0x3b3   : > { %v4544_v50 = vsel %vm14261_vm1, %v4508_v43, 0.0  ;;  %v5005_v29 = vsel %vm13726_vm7, %v4996_v20, %v5004_v12  ;;  %v5040_v18 = vrot.slane %v5038_v42, 6  ;;  %10571 = vmatprep.mubr.msk.bf16.mxu1 %vm15948_vm6, %v5354_v58  ;;  %v4470_v62 = vadd.f32 %v14179_v47, %v14079_v57  ;;  %vm15956_vm4 = vmmov %vm15950_vm2 }
 0x3b4   : > { %v5043_v41 = vrot.slane %v5041_v22, 7  ;;  %v9745_v35 = vpack.c.bf16 %v4544_v50, %v4544_v50  ;;  %5129 = vst.msk [vmem:[#allocation2 + $0x80] sm:$0xf] %vm15949_vm9, %v5005_v29  ;;  %v5020_v45 = vrot.slane %v5018_v19, 6  ;;  %v5023_v40 = vrot.slane %v5021_v63, 7  ;;  %vm15957_vm12 = vmmov %vm15951_vm8 }
 0x3b5   : > { %v5355_v8 = vshrl.u32 %v14267_v15, 16  ;;  %v5359_v12 = vshll.u32 %v14300_v51, 16  ;;  %v4506_v39 = vmax.f32 %v4470_v62, 0.0  ;;  %v5363_v14 = vshrl.u32 %v14300_v51, 16  ;;  %vm15958_vm0 = vmmov %vm15955_vm3 }
 0x3b6   : > { %v5044_v2 = vor.u32 %v5043_v41, %v5040_v18  ;;  %v5048_v13 = vshrl.u32 %v9745_v35, 16  ;;  %v5051_v23 = vshll.u32 %v9745_v35, 16  ;;  %v5024_v33 = vor.u32 %v5023_v40, %v5020_v45  ;;  %vm15961_vm13 = vmmov %vm15950_vm2 }
 0x3b7   : > { %v5357_v10 = vor.u32 %v5355_v8, %v5353_v37  ;;  %v5361_v57 = vrot.slane %v5359_v12, 1  ;;  %v4542_v21 = vsel %vm14285_vm11, %v4506_v39, 0.0  ;;  %v5367_v4 = vshll.u32 %v14313_v46, 16  ;;  %vm15959_vm11 = vmmov %vm15951_vm8 }
 0x3b8   : > { %v5046_v7 = vrot.slane %v5044_v2, 4  ;;  %v5050_v6 = vrot.slane %v5048_v13, 6  ;;  %v5053_v49 = vrot.slane %v5051_v23, 7  ;;  %v5025_v47 = vsel %vm13726_vm7, %v5016_v59, %v5024_v33  ;;  %vm15962_vm10 = vmmov %vm15958_vm0 }
 0x3b9   : > { %5131 = vst.msk [vmem:[#allocation2 + $0x88] sm:$0xf] %vm15950_vm2, %v5025_v47  ;;  %v9743_v61 = vpack.c.bf16 %v4542_v21, %v4542_v21  ;;  %v5362_v52 = vsel %vm15951_vm8, %v5357_v10, %v5361_v57  ;;  %v5365_v36 = vor.u32 %v5363_v14, %v5361_v57  ;;  %vm15952_vm5 = vsmask.f32 1280  ;;  %v14342_v24 = vld [vmem:[#allocation2 + $0x78] sm:$0xff]   ;;  %vm15963_vm15 = vmmov %vm15958_vm0 }
 0x3ba   : > { %v5054_v1 = vor.u32 %v5053_v49, %v5050_v6  ;;  %vm14330_vm1 = vmand %vm5135_vm14, %vm15952_vm5  ;;  %10572 = vmatmul.mubr.msk.bf16.gmra.mrb[16].mxu1 %vm15955_vm3, %v5362_v52  ;;  %v5369_v11 = vrot.slane %v5367_v4, 1  ;;  %v5371_v9 = vshrl.u32 %v14313_v46, 16  ;;  %v5375_v17 = vshll.u32 %v14317_v55, 16  ;;  %v14381_v52 = vld [vmem:[#allocation2 + $0xc] sm:$0xf] }
 0x3bb   : > { %v5379_v27 = vshrl.u32 %v14317_v55, 16  ;;  %v5028_v32 = vshrl.u32 %v9743_v61, 16  ;;  %v5031_v26 = vshll.u32 %v9743_v61, 16  ;;  %v5383_v37 = vshll.u32 %v14324_v44, 16  ;;  %vm15960_vm14 = vmmov %vm15951_vm8  ;;  %v14359_v62 = vld [vmem:[#allocation2 + $0x80] sm:$0xff]  }
 0x3bc   : > { %v5055_v56 = vsel %vm13726_vm7, %v5046_v7, %v5054_v1  ;;  %v5056_v38 = vrot.slane %v5054_v1, 4  ;;  %v5370_v3 = vsel %vm15957_vm12, %v5365_v36, %v5369_v11  ;;  %v5373_v60 = vor.u32 %v5371_v9, %v5369_v11  ;;  %vm15964_vm6 = vmmov %vm15950_vm2 }
 0x3bd   : > { %5134 = vst.msk [vmem:[#allocation2 + $0x94] sm:$0xf] %vm15956_vm4, %v5055_v56  ;;  %v5377_v59 = vrot.slane %v5375_v17, 1  ;;  %v5026_v43 = vrot.slane %v5024_v33, 4  ;;  %v5030_v20 = vrot.slane %v5028_v32, 6  ;;  %v5033_v42 = vrot.slane %v5031_v26, 7  ;;  %10575 = vmatprep.mubr.msk.bf16.mxu1 %vm15958_vm0, %v5370_v3  ;;  %vm15965_vm9 = vmmov %vm15951_vm8 }
 0x3be   : > { %v5138_v34 = vsel %vm14330_vm1, %v5056_v38, %v5137_v54  ;;  %v5385_v19 = vrot.slane %v5383_v37, 1  ;;  %v5391_v63 = vshll.u32 %v14338_v48, 16  ;;  %v5399_v18 = vshll.u32 %v14342_v24, 16  ;;  %vm15966_vm2 = vmmov %vm15951_vm8  ;;  %v14391_v56 = vld [vmem:[#allocation2 + $0x18] sm:$0xff]   ;;  %v14393_v38 = vld [vmem:[#allocation2 + $0x20] sm:$0xff]  }
 0x3bf   : > { %5139 = vst [vmem:[#allocation2 + $0x98] sm:$0x3] %v5138_v34  ;;  %v5381_v22 = vor.u32 %v5379_v27, %v5377_v59  ;;  %v5034_v58 = vor.u32 %v5033_v42, %v5030_v20  ;;  %v5378_v50 = vsel %vm15959_vm11, %v5373_v60, %v5377_v59  ;;  %v5387_v45 = vshrl.u32 %v14324_v44, 16  ;;  %vm15968_vm8 = vmmov %vm15958_vm0  ;;  %v14389_v27 = vld [vmem:[#allocation2 + $0x10] sm:$0xff]   ;;  %v14396_v26 = vld [vmem:[#allocation2 + $0x28] sm:$0xff]  }
 0x3c0   : > { %v5393_v40 = vrot.slane %v5391_v63, 1  ;;  %v5395_v23 = vshrl.u32 %v14338_v48, 16  ;;  %v5401_v12 = vrot.slane %v5399_v18, 1  ;;  %v5407_v39 = vshll.u32 %v14359_v62, 16  ;;  %vm15969_vm5 = vmmov %vm15966_vm2  ;;  %v14399_v60 = vld [vmem:[#allocation2 + $0x8] sm:$0xc] }
 0x3c1   : > { %v5386_v29 = vsel %vm15960_vm14, %v5381_v22, %v5385_v19  ;;  %v5035_v41 = vsel %vm13726_vm7, %v5026_v43, %v5034_v58  ;;  %v5036_v35 = vrot.slane %v5034_v58, 4  ;;  %v5389_v13 = vor.u32 %v5387_v45, %v5385_v19  ;;  %vm15970_vm1 = vmmov %vm15966_vm2  ;;  %v14407_v42 = vld [vmem:[#allocation2 + $0x30] sm:$0xff]  }
 0x3c2   : > { %5132 = vst.msk [vmem:[#allocation2 + $0x8c] sm:$0xf] %vm15961_vm13, %v5035_v41  ;;  %10576 = vmatmul.mubr.msk.bf16.gmra.mrb[20].mxu1 %vm15962_vm10, %v5378_v50  ;;  %v5397_v33 = vor.u32 %v5395_v23, %v5393_v40  ;;  %v5403_v7 = vshrl.u32 %v14342_v24, 16  ;;  %v5409_v16 = vrot.slane %v5407_v39, 1  ;;  %v5411_v47 = vshrl.u32 %v14359_v62, 16  ;;  %vm15971_vm3 = vmmov %vm15958_vm0  ;;  %v15974_v50 = vld [vmem:[#allocation31_spill] sm:$0xff] }
 0x3c3   : > { %v5045_v8 = vsel %vm13726_vm7, %v5036_v35, %v5044_v2  ;;  %10579 = vmatprep.mubr.msk.bf16.mxu1 %vm15963_vm15, %v5386_v29  ;;  %v5394_v10 = vsel %vm15965_vm9, %v5389_v13, %v5393_v40  ;;  %vm15967_vm7 = vmmov %vm15958_vm0  ;;  %v14387_v17 = vcombine.low %v6220_v25, %v14381_v52  ;;  %v6689_v34 = vshrl.u32 %v14389_v27, 16  ;;  %v14415_v29 = vld [vmem:[#allocation2 + $0x38] sm:$0xff]  }
 0x3c4   : > { %5133 = vst.msk [vmem:[#allocation2 + $0x90] sm:$0xf] %vm15964_vm6, %v5045_v8  ;;  %v5402_v14 = vsel %vm15966_vm2, %v5397_v33, %v5401_v12  ;;  %v5405_v2 = vor.u32 %v5403_v7, %v5401_v12  ;;  %v5413_v4 = vor.u32 %v5411_v47, %v5409_v16  ;;  %vm15972_vm4 = vmmov %vm15958_vm0  ;;  %v6692_v20 = vshll.u32 %v14389_v27, 16  ;;  %v14418_v12 = vld [vmem:[#allocation2 + $0x40] sm:$0xff]   ;;  %v14421_v7 = vld [vmem:[#allocation2 + $0x48] sm:$0xff]  }
 0x3c5   : > { %vm15973_vm12 = vmmov %vm15970_vm1  ;;  %v6681_v3 = vshrl.u32 %v14387_v17, 16  ;;  %v6684_v43 = vshll.u32 %v14387_v17, 16  ;;  %v6698_v22 = vshrl.u32 %v14391_v56, 16  ;;  %v6701_v19 = vshll.u32 %v14391_v56, 16 }
 0x3c6   : > { %v5410_v1 = vsel %vm15969_vm5, %v5405_v2, %v5409_v16  ;;  %v6707_v63 = vshrl.u32 %v14393_v38, 16  ;;  %v6710_v58 = vshll.u32 %v14393_v38, 16  ;;  %vm15975_vm11 = vmmov %vm15958_vm0  ;;  %v6691_v41 = vrot.slane %v6689_v34, 1 }
 0x3c7   : > { %v6683_v37 = vrot.slane %v6681_v3, 1  ;;  %v6686_v18 = vrot.slane %v6684_v43, 2  ;;  %v6694_v35 = vrot.slane %v6692_v20, 2  ;;  %v6716_v45 = vshrl.u32 %v14396_v26, 16  ;;  %v14441_v3 = vld [vmem:[#allocation2 + $0x58] sm:$0xff]   ;;  %vm15982_vm15 = vmmov %vm15958_vm0 }
 0x3c8   : > { %v6700_v40 = vrot.slane %v6698_v22, 1  ;;  %v6703_v8 = vrot.slane %v6701_v19, 2  ;;  %v6709_v13 = vrot.slane %v6707_v63, 1  ;;  %v6712_v23 = vrot.slane %v6710_v58, 2  ;;  %v14444_v22 = vld [vmem:[#allocation2 + $0x8] sm:$0xff]   ;;  %v14448_v19 = vld [vmem:[#allocation2 + $0x60] sm:$0xff]   ;;  %vm15984_vm6 = vmmov %vm15958_vm0 }
 0x3c9   : > { %v14370_v6 = vld [vmem:[#allocation2 + $0x88] sm:$0xff]   ;;  %v6687_v33 = vor.u32 %v6686_v18, %v6683_v37  ;;  %v6695_v39 = vor.u32 %v6694_v35, %v6691_v41  ;;  %v6728_v47 = vshll.u32 %v14407_v42, 16  ;;  %vm15976_vm14 = vsmask.f32 6400  ;;  %15983 = vst [vmem:[#allocation11_spill] sm:$0xff] %v14448_v19  ;;  %v14454_v41 = vld [vmem:[#allocation2 + $0x10] sm:$0xff]  }
 0x3ca   : > { %10580 = vmatmul.mubr.msk.bf16.gmra.mrb[24].mxu1 %vm15967_vm7, %v5394_v10  ;;  %v5415_v49 = vshll.u32 %v14370_v6, 16  ;;  %v5419_v36 = vshrl.u32 %v14370_v6, 16  ;;  %v6718_v10 = vrot.slane %v6716_v45, 1  ;;  %v6704_v16 = vor.u32 %v6703_v8, %v6700_v40  ;;  %vm15978_vm13 = vmmov %vm15976_vm14  ;;  %v14458_v35 = vld [vmem:[#allocation2 + $0x68] sm:$0xff]  }
 0x3cb   : > { %10583 = vmatprep.mubr.msk.bf16.mxu1 %vm15968_vm8, %v5402_v14  ;;  %v14375_v57 = vld [vmem:[#allocation2 + $0x90] ss:$0 sps:$4 sm:$0x11]   ;;  %v6719_v14 = vshll.u32 %v14396_v26, 16  ;;  %v6713_v2 = vor.u32 %v6712_v23, %v6709_v13  ;;  %vm15980_vm10 = vmmov %vm15978_vm13  ;;  %v6743_v20 = vshrl.u32 %v14418_v12, 16  ;;  %v6746_v58 = vshll.u32 %v14418_v12, 16 }
 0x3cc   : > { %v5417_v21 = vrot.slane %v5415_v49, 1  ;;  %v5423_v54 = vshll.u32 %v14375_v57, 16  ;;  %v6725_v49 = vshrl.u32 %v14407_v42, 16  ;;  %v14436_v25 = vsel %vm15978_vm13, %v6695_v39, %v6704_v16  ;;  %15985 = vst [vmem:[#allocation12_spill] sm:$0xff] %v14458_v35  ;;  %vm15986_vm9 = vmmov %vm15980_vm10  ;;  %v14467_v23 = vld [vmem:[%s15383_s3 + $0x30] sm:$0xff]  }
 0x3cd   : > { %15979 = vst [vmem:[#allocation10_spill] sm:$0xff] %v14436_v25  ;;  %v6755_v18 = vshll.u32 %v14421_v7, 16  ;;  %v6745_v8 = vrot.slane %v6743_v20, 1  ;;  %vm15988_vm2 = vmmov %vm15986_vm9  ;;  %v6788_v20 = vshrl.u32 %v14458_v35, 16 }
 0x3ce   : > { %v5418_v61 = vsel %vm15970_vm1, %v5413_v4, %v5417_v21  ;;  %v5421_v11 = vor.u32 %v5419_v36, %v5417_v21  ;;  %v5425_v9 = vrot.slane %v5423_v54, 1  ;;  %v14425_v21 = vld [vmem:[#allocation2 + $0x50] sm:$0xff]   ;;  %v14428_v4 = vsel %vm15976_vm14, %v6687_v33, %v6695_v39  ;;  %v11674_v36 = vld [vmem:[%s15383_s3 + $0x28] sm:$0xff]   ;;  %vm15990_vm7 = vmmov %vm15988_vm2 }
 0x3cf   : > { %15977 = vst [vmem:[#allocation9_spill] sm:$0xff] %v14428_v4  ;;  %v6734_v54 = vshrl.u32 %v14415_v29, 16  ;;  %v6761_v13 = vshrl.u32 %v14425_v21, 16  ;;  %v6748_v33 = vrot.slane %v6746_v58, 2  ;;  %vm15994_vm8 = vmmov %vm15988_vm2 }
 0x3d0   : > { %v5426_v32 = vsel %vm15973_vm12, %v5421_v11, %v5425_v9  ;;  %v14439_v11 = vsel %vm15980_vm10, %v6704_v16, %v6713_v2  ;;  %v6727_v9 = vrot.slane %v6725_v49, 1  ;;  %v6770_v49 = vshrl.u32 %v14441_v3, 16  ;;  %vm15996_vm5 = vmmov %vm15988_vm2 }
 0x3d1   : > { %15981 = vst [vmem:[#allocation4_spill] sm:$0xff] %v14439_v11  ;;  %v6736_v43 = vrot.slane %v6734_v54, 1  ;;  %v6763_v16 = vrot.slane %v6761_v13, 1  ;;  %v6749_v54 = vor.u32 %v6748_v33, %v6745_v8  ;;  %v14492_v8 = vld [vmem:[#allocation2 + $0x80] sm:$0xff]   ;;  %v6790_v33 = vrot.slane %v6788_v20, 1  ;;  %vm15999_vm1 = vmmov %vm15958_vm0 }
 0x3d2   : > { %10584 = vmatmul.mubr.msk.bf16.gmra.mrb[28].mxu1 %vm15971_vm3, %v5410_v1  ;;  %v6721_v1 = vrot.slane %v6719_v14, 2  ;;  %15998 = vst [vmem:[#allocation29_spill] sm:$0xff] %v14492_v8  ;;  %vm16001_vm3 = vmmov %vm15958_vm0 }
 0x3d3   : > { %10587 = vmatprep.mubr.msk.bf16.mxu1 %vm15972_vm4, %v5418_v61  ;;  %v6737_v61 = vshll.u32 %v14415_v29, 16  ;;  %vm16003_vm4 = vmmov %vm15988_vm2 }
 0x3d4   : > { %v6722_v37 = vor.u32 %v6721_v1, %v6718_v10  ;;  %v6757_v10 = vrot.slane %v6755_v18, 2  ;;  %v14479_v1 = vld [vmem:[#allocation2 + $0x78] sm:$0xff]   ;;  %vm16005_vm12 = vmmov %vm15988_vm2 }
 0x3d5   : > { %v6739_v34 = vrot.slane %v6737_v61, 2  ;;  %15993 = vst [vmem:[#allocation19_spill] sm:$0xff] %v14479_v1  ;;  %v6809_v20 = vshll.u32 %v14479_v1, 16  ;;  %vm16015_vm10 = vmmov %vm15999_vm1 }
 0x3d6   : > { %v14461_v45 = vsel %vm15986_vm9, %v6713_v2, %v6722_v37  ;;  %v6764_v2 = vshll.u32 %v14425_v21, 16 }
 0x3d7   : > { %15987 = vst [vmem:[#allocation5_spill] sm:$0xff] %v14461_v45  ;;  %v6740_v40 = vor.u32 %v6739_v34, %v6736_v43  ;;  %v6772_v43 = vrot.slane %v6770_v49, 1  ;;  %v6782_v34 = vshll.u32 %v14448_v19, 16 }
 0x3da   : > { %10588 = vmatmul.mubr.msk.bf16.gmra.mrb[32].mxu1 %vm15958_vm0, %v5426_v32  ;;  %v6730_v32 = vrot.slane %v6728_v47, 2  ;;  %v14477_v47 = vld [vmem:[#allocation2 + $0x70] sm:$0xff]   ;;  %vm16007_vm0 = vmmov %vm15988_vm2 }
 0x3db   : > { %10595 = vmatprep.mubr.msk.bf16.mxu1 %vm15975_vm11, %v15974_v50  ;;  %v6752_v50 = vshrl.u32 %v14421_v7, 16  ;;  %15992 = vst [vmem:[#allocation6_spill] sm:$0xff] %v14477_v47  ;;  %v6797_v49 = vshrl.u32 %v14477_v47, 16  ;;  %vm16009_vm11 = vmmov %vm16007_vm0 }
 0x3dc   : > { %v6731_v63 = vor.u32 %v6730_v32, %v6727_v9  ;;  %v6773_v9 = vshll.u32 %v14441_v3, 16  ;;  %v6779_v32 = vshrl.u32 %v14448_v19, 16  ;;  %vm16011_vm14 = vmmov %vm16007_vm0 }
 0x3dd   : > { %v6754_v39 = vrot.slane %v6752_v50, 1  ;;  %vm16013_vm13 = vmmov %vm16007_vm0 }
 0x3de   : > { %v14473_v14 = vsel %vm15990_vm7, %v6731_v63, %v6740_v40  ;;  %v6775_v50 = vrot.slane %v6773_v9, 2  ;;  %v6781_v18 = vrot.slane %v6779_v32, 1  ;;  %v6806_v9 = vshrl.u32 %v14479_v1, 16  ;;  %vm16020_vm9 = vmmov %vm16007_vm0 }
 0x3df   : > { %15991 = vst [vmem:[#allocation13_spill] sm:$0xff] %v14473_v14  ;;  %v6758_v61 = vor.u32 %v6757_v10, %v6754_v39  ;;  %v6791_v39 = vshll.u32 %v14458_v35, 16  ;;  %v14495_v10 = vld [vmem:[#allocation2 + $0x18] sm:$0xff]  }
 0x3e1   : > { %v14490_v58 = vsel %vm15996_vm5, %v6749_v54, %v6758_v61  ;;  %vm16029_vm5 = vmmov %vm16007_vm0 }
 0x3e2   : > { %10596 = vmatmul.mubr.msk.bf16.vlgmr.msra.gmra.mrb[0].mxu1 %vm15982_vm15, %v14444_v22  ;;  %15997 = vst [vmem:[#allocation15_spill] sm:$0xff] %v14490_v58  ;;  %v6808_v58 = vrot.slane %v6806_v9, 1  ;;  %vm16017_vm15 = vmmov %vm15999_vm1 }
 0x3e3   : > { %10632 = vmatpush3.bf16.msra.mxu1 %v14038_v31  ;;  %10599 = vmatprep.mubr.msk.bf16.mxu1 %vm15984_vm6, %v14454_v41  ;;  %v14470_v31 = vsel %vm15988_vm2, %v6722_v37, %v6731_v63  ;;  %v6766_v37 = vrot.slane %v6764_v2, 2  ;;  %v14487_v63 = vsel %vm15994_vm8, %v6740_v40, %v6749_v54  ;;  %v14499_v2 = vld [vmem:[#allocation2 + $0x88] sm:$0xff]   ;;  %v6776_v40 = vor.u32 %v6775_v50, %v6772_v43  ;;  %vm16018_vm6 = vmmov %vm16007_vm0 }
 0x3e4   : > { %10633 = vmatprep.subr.bf16.mxu1 %v11674_v36  ;;  %15989 = vst [vmem:[#allocation14_spill] sm:$0xff] %v14470_v31  ;;  %15995 = vst [vmem:[#allocation17_spill] sm:$0xff] %v14487_v63  ;;  %v6800_v54 = vshll.u32 %v14477_v47, 16  ;;  %v6799_v50 = vrot.slane %v6797_v49, 1  ;;  %v6815_v31 = vshrl.u32 %v14492_v8, 16  ;;  %vm16023_vm2 = vcmask 1045504  }
 0x3e5   : > { %v6767_v13 = vor.u32 %v6766_v37, %v6763_v16  ;;  %16000 = vst [vmem:[#allocation20_spill] sm:$0xff] %v14499_v2  ;;  %v14506_v16 = vld [vmem:[#allocation2 + $0x90] sm:$0xff]   ;;  %vm16025_vm7 = vmmov %vm16023_vm2 }
 0x3e6   : > { %16002 = vst [vmem:[#allocation16_spill] sm:$0xff] %v14506_v16  ;;  %v6802_v59 = vrot.slane %v6800_v54, 2  ;;  %v6817_v49 = vrot.slane %v6815_v31, 1  ;;  %v6833_v54 = vshrl.u32 %v14506_v16, 16  ;;  %v16016_v31 = vcombine.low %v14399_v60, %v14381_v52  ;;  %vm16027_vm8 = vmmov %vm16023_vm2 }
 0x3e7   : > { %10634 = vmatpush3.bf16.msra.mxu1 %v11674_v36  ;;  %v6784_v36 = vrot.slane %v6782_v34, 2  ;;  %v14509_v32 = vsel %vm16003_vm4, %v6758_v61, %v6767_v13  ;;  %v6793_v34 = vrot.slane %v6791_v39, 2  ;;  %v14513_v43 = vsel %vm16005_vm12, %v6767_v13, %v6776_v40 }
 0x3e8   : > { %10671 = vmatprep.subr.bf16.mxu1 %v14467_v23  ;;  %16004 = vst [vmem:[#allocation32_spill] sm:$0xff] %v14509_v32  ;;  %16006 = vst [vmem:[#allocation23_spill] sm:$0xff] %v14513_v43  ;;  %v6803_v45 = vor.u32 %v6802_v59, %v6799_v50  ;;  %v6818_v61 = vshll.u32 %v14492_v8, 16  ;;  %v6836_v50 = vshll.u32 %v14506_v16, 16  ;;  %v7145_v60 = vrot.slane %v14396_v26, 2 }
 0x3e9   : > { %v6785_v37 = vor.u32 %v6784_v36, %v6781_v18  ;;  %v6794_v14 = vor.u32 %v6793_v34, %v6790_v33  ;;  %v6824_v18 = vshrl.u32 %v14499_v2, 16  ;;  %v6827_v36 = vshll.u32 %v14499_v2, 16 }
 0x3ea   : > { %10600 = vmatmul.mubr.msk.bf16.gmra.mrb[4].mxu1 %vm15999_vm1, %v14495_v10  ;;  %v6820_v33 = vrot.slane %v6818_v61, 2  ;;  %v7139_v61 = vrot.slane %v14389_v27, 2  ;;  %vm16031_vm1 = vmmov %vm16023_vm2 }
 0x3eb   : > { %10603 = vmatprep.mubr.msk.bf16.mxu1 %vm16001_vm3, %v14062_v5  ;;  %v14516_v63 = vsel %vm16007_vm0, %v6776_v40, %v6785_v37  ;;  %v6811_v5 = vrot.slane %v6809_v20, 2  ;;  %v14523_v13 = vsel %vm16009_vm11, %v6785_v37, %v6794_v14  ;;  %v14527_v40 = vsel %vm16011_vm14, %v6794_v14, %v6803_v45  ;;  %vm16033_vm3 = vmmov %vm16031_vm1 }
 0x3ec   : > { %16008 = vst [vmem:[#allocation18_spill] sm:$0xff] %v14516_v63  ;;  %16010 = vst [vmem:[#allocation34_spill] sm:$0xff] %v14523_v13  ;;  %v6826_v9 = vrot.slane %v6824_v18, 1  ;;  %v6829_v34 = vrot.slane %v6827_v36, 2  ;;  %v6835_v20 = vrot.slane %v6833_v54, 1  ;;  %v6821_v37 = vor.u32 %v6820_v33, %v6817_v49 }
 0x3ed   : > { %v6812_v39 = vor.u32 %v6811_v5, %v6808_v58  ;;  %16012 = vst [vmem:[#allocation26_spill] sm:$0xff] %v14527_v40  ;;  %v7138_v5 = vrot.slane %v16016_v31, 2  ;;  %v6838_v14 = vrot.slane %v6836_v50, 2  ;;  %v7149_v33 = vrot.slane %v14415_v29, 2  ;;  %vm16035_vm4 = vmmov %vm16031_vm1 }
 0x3ee   : > { %v6830_v58 = vor.u32 %v6829_v34, %v6826_v9  ;;  %v7153_v50 = vrot.slane %v14421_v7, 2  ;;  %vm16038_vm12 = vmmov %vm16031_vm1 }
 0x3ef   : > { %v14530_v59 = vsel %vm16013_vm13, %v6803_v45, %v6812_v39  ;;  %v7141_v45 = vrot.slane %v14391_v56, 2  ;;  %v14543_v18 = vsel %vm16018_vm6, %v6812_v39, %v6821_v37  ;;  %v14549_v49 = vor.u32 %v6838_v14, %v6835_v20  ;;  %v14579_v14 = vld [vmem:[#allocation2 + $0x98] ss:$0 sps:$4 sm:$0x33]   ;;  %vm16040_vm0 = vmmov %vm16031_vm1 }
 0x3f0   : > { %16014 = vst [vmem:[#allocation21_spill] sm:$0xff] %v14530_v59  ;;  %16019 = vst [vmem:[#allocation36_spill] sm:$0xff] %v14543_v18  ;;  %v14546_v36 = vsel %vm16020_vm9, %v6821_v37, %v6830_v58  ;;  %v14552_v52 = vsel %vm16023_vm2, %v7138_v5, %v7139_v61  ;;  %v7147_v39 = vrot.slane %v14407_v42, 2  ;;  %v7151_v20 = vrot.slane %v14418_v12, 2 }
 0x3f1   : > { %16021 = vst [vmem:[#allocation30_spill] sm:$0xff] %v14546_v36  ;;  %16022 = vst [vmem:[#allocation22_spill] sm:$0xff] %v14549_v49  ;;  %v14565_v9 = vsel %vm16029_vm5, %v6830_v58, %v14549_v49  ;;  %v7155_v5 = vrot.slane %v14425_v21, 2  ;;  %v14668_v36 = vld [vmem:[#allocation2 + $0x48] sm:$0xff]  }
 0x3f2   : > { %10604 = vmatmul.mubr.msk.bf16.gmra.mrb[8].mxu1 %vm16015_vm10, %v14094_v28  ;;  %v7143_v28 = vrot.slane %v14393_v38, 2  ;;  %16024 = vst [vmem:[#allocation37_spill] sm:$0xff] %v14552_v52  ;;  %16030 = vst [vmem:[#allocation38_spill] sm:$0xff] %v14565_v9  ;;  %v14573_v37 = vsel %vm16033_vm3, %v7145_v60, %v7147_v39  ;;  %v14576_v31 = vsel %vm16035_vm4, %v7147_v39, %v7149_v33  ;;  %v7161_v39 = vrot.slane %v14458_v35, 2 }
 0x3f3   : > { %10607 = vmatprep.mubr.msk.bf16.mxu1 %vm16017_vm15, %v14139_v53  ;;  %v14555_v53 = vsel %vm16025_vm7, %v7139_v61, %v7141_v45  ;;  %16034 = vst [vmem:[#allocation25_spill] sm:$0xff] %v14573_v37  ;;  %16036 = vst [vmem:[#allocation40_spill] sm:$0xff] %v14576_v31  ;;  %v14582_v58 = vsel %vm16038_vm12, %v7149_v33, %v7151_v20  ;;  %v14585_v61 = vsel %vm16040_vm0, %v7151_v20, %v7153_v50 }
 0x3f4   : > { %16026 = vst [vmem:[#allocation33_spill] sm:$0xff] %v14555_v53  ;;  %v14559_v54 = vsel %vm16027_vm8, %v7141_v45, %v7143_v28  ;;  %v14568_v34 = vsel %vm16031_vm1, %v7143_v28, %v7145_v60  ;;  %16037 = vst [vmem:[#allocation39_spill] sm:$0xff] %v14579_v14  ;;  %v7157_v45 = vrot.slane %v14441_v3, 2  ;;  %v7159_v28 = vrot.slane %v14448_v19, 2  ;;  %v8363_v19 = vld [vmem:[#allocation2 + $0x10] sm:$0x8] }
 0x3f5   : > { %16028 = vst [vmem:[#allocation24_spill] sm:$0xff] %v14559_v54  ;;  %16032 = vst [vmem:[#allocation35_spill] sm:$0xff] %v14568_v34  ;;  %v7163_v31 = vrot.slane %v14477_v47, 2  ;;  %v7165_v33 = vrot.slane %v14479_v1, 2 }
 0x3f6   : > { %16039 = vst [vmem:[#allocation27_spill] sm:$0xff] %v14582_v58  ;;  %16041 = vst [vmem:[#allocation42_spill] sm:$0xff] %v14585_v61 }
 0x3f7   : > { %vm16042_vm11 = vmmov %vm16015_vm10 }
 0x3f8   : > { %vm16043_vm14 = vmmov %vm16040_vm0 }
 0x3f9   : > { %v14592_v60 = vsel %vm16043_vm14, %v7153_v50, %v7155_v5  ;;  %vm16045_vm13 = vmmov %vm16015_vm10  ;;  %v7169_v50 = vrot.slane %v14499_v2, 2 }
 0x3fa   : > { %10608 = vmatmul.mubr.msk.bf16.gmra.mrb[12].mxu1 %vm16042_vm11, %v14183_v0  ;;  %16044 = vst [vmem:[#allocation41_spill] sm:$0xff] %v14592_v60  ;;  %vm16046_vm10 = vmmov %vm16040_vm0  ;;  %v7167_v0 = vrot.slane %v14492_v8, 2 }
 0x3fb   : > { %10611 = vmatprep.mubr.msk.bf16.mxu1 %vm16045_vm13, %v14210_v30  ;;  %v14600_v20 = vsel %vm16046_vm10, %v7155_v5, %v7157_v45  ;;  %vm16048_vm15 = vmmov %vm16040_vm0  ;;  %v7171_v30 = vrot.slane %v14506_v16, 2 }
 0x3fc   : > { %16047 = vst [vmem:[#allocation28_spill] sm:$0xff] %v14600_v20  ;;  %v14603_v61 = vsel %vm16048_vm15, %v7157_v45, %v7159_v28  ;;  %vm16050_vm6 = vmmov %vm16040_vm0 }
 0x3fd   : > { %16049 = vst [vmem:[#allocation50_spill] sm:$0xff] %v14603_v61  ;;  %v14608_v60 = vsel %vm16050_vm6, %v7159_v28, %v7161_v39  ;;  %vm16052_vm9 = vmmov %vm16040_vm0  ;;  %v7173_v61 = vrot.slane %v14579_v14, 2 }
 0x3fe   : > { %16051 = vst [vmem:[#allocation51_spill] sm:$0xff] %v14608_v60  ;;  %v14611_v58 = vsel %vm16052_vm9, %v7161_v39, %v7163_v31  ;;  %vm16054_vm2 = vmmov %vm16040_vm0  ;;  %v7454_v39 = vld [vmem:[#allocation2 + $0x10] sm:$0xc] }
 0x3ff   : > { %16053 = vst [vmem:[#allocation43_spill] sm:$0xff] %v14611_v58  ;;  %v14614_v37 = vsel %vm16054_vm2, %v7163_v31, %v7165_v33  ;;  %vm16056_vm7 = vmmov %vm16040_vm0  ;;  %v5895_v58 = vld [vmem:[#allocation2] sm:$0xe]  ;;  %v14632_v31 = vld [vmem:[#allocation2 + $0x14] sm:$0xf] }
 0x400   : > { %16055 = vst [vmem:[#allocation53_spill] sm:$0xff] %v14614_v37  ;;  %v14618_v5 = vsel %vm16056_vm7, %v7165_v33, %v7167_v0  ;;  %vm16058_vm8 = vmmov %vm16040_vm0  ;;  %v14637_v33 = vcombine.low %v7454_v39, %v14632_v31  ;;  %v14653_v37 = vld [vmem:[#allocation2 + $0x38] sm:$0xff]  }
 0x401   : > { %16057 = vst [vmem:[#allocation57_spill] sm:$0xff] %v14618_v5  ;;  %v14621_v45 = vsel %vm16058_vm8, %v7167_v0, %v7169_v50  ;;  %vm16060_vm5 = vmmov %vm16040_vm0  ;;  %v14639_v0 = vld [vmem:[#allocation2 + $0x18] sm:$0xff]   ;;  %v7962_v43 = vshll.u32 %v14653_v37, 16 }
 0x402   : > { %16059 = vst [vmem:[#allocation44_spill] sm:$0xff] %v14621_v45  ;;  %v14625_v20 = vsel %vm16060_vm5, %v7169_v50, %v7171_v30  ;;  %vm16062_vm1 = vmmov %vm16040_vm0  ;;  %v11734_v50 = vld [vmem:[#allocation2 + $0x4] sm:$0xf]  ;;  %v7923_v5 = vshrl.u32 %v14639_v0, 16 }
 0x403   : > { %16061 = vst [vmem:[#allocation55_spill] sm:$0xff] %v14625_v20  ;;  %v14628_v28 = vsel %vm16062_vm1, %v7171_v30, %v7173_v61  ;;  %vm16064_vm3 = vmmov %vm16042_vm11  ;;  %v9500_v20 = vcombine.low %v5895_v58, %v11734_v50  ;;  %v14641_v45 = vld [vmem:[#allocation2 + $0x20] sm:$0xff]   ;;  %v14643_v61 = vld [vmem:[#allocation2 + $0x28] sm:$0xff]   ;;  %v7926_v58 = vshll.u32 %v14639_v0, 16  ;;  %vm16069_vm11 = vsmask.f32 5376 }
 0x404   : > { %16063 = vst [vmem:[#allocation58_spill] sm:$0xff] %v14628_v28  ;;  %10612 = vmatmul.mubr.msk.bf16.gmra.mrb[16].mxu1 %vm16064_vm3, %v14267_v15  ;;  %vm16065_vm4 = vmmov %vm16064_vm3  ;;  %v14645_v30 = vld [vmem:[#allocation2 + $0x30] sm:$0xff]   ;;  %v7915_v15 = vshrl.u32 %v14637_v33, 16  ;;  %v7918_v28 = vshll.u32 %v14637_v33, 16  ;;  %v7932_v50 = vshrl.u32 %v14641_v45, 16  ;;  %v7925_v54 = vrot.slane %v7923_v5, 2 }
 0x405   : > { %10615 = vmatprep.mubr.msk.bf16.mxu1 %vm16065_vm4, %v14300_v51  ;;  %16066 = vst [vmem:[#allocation45_spill] sm:$0xff] %v14637_v33  ;;  %v14650_v51 = vrot.slane %v9500_v20, 1  ;;  %v7935_v53 = vshll.u32 %v14641_v45, 16  ;;  %vm16067_vm12 = vmmov %vm16064_vm3  ;;  %v14660_v33 = vld [vmem:[#allocation2 + $0x40] sm:$0xff]   ;;  %v7928_v20 = vrot.slane %v7926_v58, 3  ;;  %v7941_v39 = vshrl.u32 %v14643_v61, 16 }
 0x406   : > { %v7917_v60 = vrot.slane %v7915_v15, 2  ;;  %v7920_v34 = vrot.slane %v7918_v28, 3  ;;  %v7934_v52 = vrot.slane %v7932_v50, 2  ;;  %v7944_v49 = vshll.u32 %v14643_v61, 16  ;;  %vm16068_vm0 = vmmov %vm16064_vm3  ;;  %v14671_v50 = vld [vmem:[#allocation2 + $0x50] sm:$0xff]  }
 0x407   : > { %v7937_v15 = vrot.slane %v7935_v53, 3  ;;  %v7950_v5 = vshrl.u32 %v14645_v30, 16  ;;  %v7953_v28 = vshll.u32 %v14645_v30, 16  ;;  %v7929_v14 = vor.u32 %v7928_v20, %v7925_v54  ;;  %vm16071_vm14 = vmmov %vm16069_vm11 }
 0x408   : > { %v7921_v9 = vor.u32 %v7920_v34, %v7917_v60  ;;  %v7943_v18 = vrot.slane %v7941_v39, 2  ;;  %v7946_v59 = vrot.slane %v7944_v49, 3  ;;  %v7959_v58 = vshrl.u32 %v14653_v37, 16  ;;  %v14674_v34 = vld [vmem:[#allocation2 + $0x58] sm:$0xff]   ;;  %vm16073_vm13 = vmmov %vm16069_vm11 }
 0x409   : > { %v7938_v40 = vor.u32 %v7937_v15, %v7934_v52  ;;  %v7952_v13 = vrot.slane %v7950_v5, 2  ;;  %v7955_v63 = vrot.slane %v7953_v28, 3  ;;  %v7968_v54 = vshrl.u32 %v14660_v33, 16  ;;  %v14684_v15 = vld [vmem:[#allocation2 + $0x60] sm:$0xff]   ;;  %vm16075_vm10 = vmmov %vm16069_vm11 }
 0x40a   : > { %v14677_v53 = vsel %vm16069_vm11, %v7921_v9, %v7929_v14  ;;  %v7947_v60 = vor.u32 %v7946_v59, %v7943_v18  ;;  %v7961_v32 = vrot.slane %v7959_v58, 2  ;;  %v7964_v20 = vrot.slane %v7962_v43, 3  ;;  %v14691_v18 = vld [vmem:[#allocation2 + $0x68] sm:$0xff]   ;;  %vm16077_vm15 = vmmov %vm16068_vm0 }
 0x40b   : > { %16070 = vst [vmem:[#allocation59_spill] sm:$0xff] %v14677_v53  ;;  %v14681_v49 = vsel %vm16071_vm14, %v7929_v14, %v7938_v40  ;;  %v7956_v39 = vor.u32 %v7955_v63, %v7952_v13  ;;  %v7971_v52 = vshll.u32 %v14660_v33, 16  ;;  %v7970_v28 = vrot.slane %v7968_v54, 2  ;;  %vm16078_vm6 = vmmov %vm16068_vm0 }
 0x40c   : > { %10616 = vmatmul.mubr.msk.bf16.gmra.mrb[20].mxu1 %vm16067_vm12, %v14313_v46  ;;  %16072 = vst [vmem:[#allocation60_spill] sm:$0xff] %v14681_v49  ;;  %v14687_v5 = vsel %vm16073_vm13, %v7938_v40, %v7947_v60  ;;  %v7977_v9 = vshrl.u32 %v14668_v36, 16  ;;  %v7980_v59 = vshll.u32 %v14668_v36, 16  ;;  %v7965_v14 = vor.u32 %v7964_v20, %v7961_v32  ;;  %v14703_v49 = vld [vmem:[#allocation2 + $0x70] sm:$0xff]   ;;  %vm16079_vm9 = vmmov %vm16075_vm10 }
 0x40d   : > { %10619 = vmatprep.mubr.msk.bf16.mxu1 %vm16068_vm0, %v14317_v55  ;;  %16074 = vst [vmem:[#allocation46_spill] sm:$0xff] %v14687_v5  ;;  %v14694_v58 = vsel %vm16075_vm10, %v7947_v60, %v7956_v39  ;;  %v7973_v63 = vrot.slane %v7971_v52, 3  ;;  %v7986_v43 = vshrl.u32 %v14671_v50, 16  ;;  %v7989_v54 = vshll.u32 %v14671_v50, 16  ;;  %vm16081_vm2 = vmmov %vm16079_vm9 }
 0x40e   : > { %16076 = vst [vmem:[#allocation61_spill] sm:$0xff] %v14694_v58  ;;  %v7979_v13 = vrot.slane %v7977_v9, 2  ;;  %v7982_v40 = vrot.slane %v7980_v59, 3  ;;  %v7995_v5 = vshrl.u32 %v14674_v34, 16  ;;  %v14706_v60 = vsel %vm16079_vm9, %v7956_v39, %v7965_v14  ;;  %v14709_v58 = vld [vmem:[#allocation2 + $0x78] sm:$0xff]   ;;  %vm16083_vm7 = vmmov %vm16081_vm2 }
 0x40f   : > { %16080 = vst [vmem:[#allocation62_spill] sm:$0xff] %v14706_v60  ;;  %v7974_v32 = vor.u32 %v7973_v63, %v7970_v28  ;;  %v7988_v20 = vrot.slane %v7986_v43, 2  ;;  %v7998_v52 = vshll.u32 %v14674_v34, 16  ;;  %v7991_v59 = vrot.slane %v7989_v54, 3  ;;  %v14717_v60 = vld [vmem:[#allocation2 + $0x80] sm:$0xff]   ;;  %vm16085_vm8 = vmmov %vm16081_vm2 }
 0x410   : > { %v7983_v9 = vor.u32 %v7982_v40, %v7979_v13  ;;  %v7997_v53 = vrot.slane %v7995_v5, 2  ;;  %v8004_v11 = vshrl.u32 %v14684_v15, 16  ;;  %v8007_v16 = vshll.u32 %v14684_v15, 16  ;;  %v14723_v5 = vld [vmem:[#allocation2 + $0x88] sm:$0xff]   ;;  %vm16087_vm5 = vmmov %vm16081_vm2 }
 0x411   : > { %v14713_v25 = vsel %vm16081_vm2, %v7965_v14, %v7974_v32  ;;  %v8000_v4 = vrot.slane %v7998_v52, 3  ;;  %v8013_v39 = vshrl.u32 %v14691_v18, 16  ;;  %v7992_v63 = vor.u32 %v7991_v59, %v7988_v20  ;;  %vm16089_vm1 = vmmov %vm16068_vm0 }
 0x412   : > { %16082 = vst [vmem:[#allocation47_spill] sm:$0xff] %v14713_v25  ;;  %v14720_v28 = vsel %vm16083_vm7, %v7974_v32, %v7983_v9  ;;  %v8006_v43 = vrot.slane %v8004_v11, 2  ;;  %v8016_v13 = vshll.u32 %v14691_v18, 16  ;;  %v8009_v54 = vrot.slane %v8007_v16, 3  ;;  %v14739_v16 = vld [vmem:[#allocation2 + $0x98] sm:$0xff]   ;;  %vm16090_vm3 = vmmov %vm16068_vm0 }
 0x413   : > { %16084 = vst [vmem:[#allocation63_spill] sm:$0xff] %v14720_v28  ;;  %v8001_v40 = vor.u32 %v8000_v4, %v7997_v53  ;;  %v8015_v14 = vrot.slane %v8013_v39, 2  ;;  %v8022_v52 = vshrl.u32 %v14703_v49, 16  ;;  %v14727_v25 = vsel %vm16085_vm8, %v7983_v9, %v7992_v63  ;;  %v14731_v28 = vld [vmem:[#allocation2 + $0x90] sm:$0xff]   ;;  %vm16091_vm4 = vmmov %vm16081_vm2 }
 0x414   : > { %10620 = vmatmul.mubr.msk.bf16.gmra.mrb[24].mxu1 %vm16077_vm15, %v14324_v44  ;;  %16086 = vst [vmem:[#allocation64_spill] sm:$0xff] %v14727_v25  ;;  %v8018_v2 = vrot.slane %v8016_v13, 3  ;;  %v8025_v8 = vshll.u32 %v14703_v49, 16  ;;  %v8031_v32 = vshrl.u32 %v14709_v58, 16  ;;  %v8010_v20 = vor.u32 %v8009_v54, %v8006_v43  ;;  %vm16093_vm12 = vmmov %vm16081_vm2 }
 0x415   : > { %10623 = vmatprep.mubr.msk.bf16.mxu1 %vm16078_vm6, %v14338_v48  ;;  %v14734_v11 = vsel %vm16087_vm5, %v7992_v63, %v8001_v40  ;;  %v8024_v59 = vrot.slane %v8022_v52, 2  ;;  %v8034_v4 = vshll.u32 %v14709_v58, 16  ;;  %v8040_v13 = vshrl.u32 %v14717_v60, 16  ;;  %vm16094_vm0 = vmmov %vm16081_vm2 }
 0x416   : > { %16088 = vst [vmem:[#allocation48_spill] sm:$0xff] %v14734_v11  ;;  %v8019_v53 = vor.u32 %v8018_v2, %v8015_v14  ;;  %v8027_v9 = vrot.slane %v8025_v8, 3  ;;  %v8033_v39 = vrot.slane %v8031_v32, 2  ;;  %v14745_v63 = vsel %vm16091_vm4, %v8001_v40, %v8010_v20  ;;  %vm16096_vm11 = vmmov %vm16094_vm0 }
 0x417   : > { %16092 = vst [vmem:[#allocation65_spill] sm:$0xff] %v14745_v63  ;;  %v8036_v43 = vrot.slane %v8034_v4, 3  ;;  %v8043_v54 = vshll.u32 %v14717_v60, 16  ;;  %v8049_v52 = vshrl.u32 %v14723_v5, 16  ;;  %v8042_v2 = vrot.slane %v8040_v13, 2  ;;  %vm16097_vm14 = vmmov %vm16094_vm0 }
 0x418   : > { %v14750_v11 = vsel %vm16093_vm12, %v8010_v20, %v8019_v53  ;;  %v8028_v25 = vor.u32 %v8027_v9, %v8024_v59  ;;  %v8052_v8 = vshll.u32 %v14723_v5, 16  ;;  %v8058_v47 = vshrl.u32 %v14731_v28, 16  ;;  %vm16098_vm13 = vmmov %vm16089_vm1 }
 0x419   : > { %v8037_v14 = vor.u32 %v8036_v43, %v8033_v39  ;;  %v8045_v32 = vrot.slane %v8043_v54, 3  ;;  %v8051_v1 = vrot.slane %v8049_v52, 2  ;;  %v8061_v63 = vshll.u32 %v14731_v28, 16  ;;  %vm16101_vm15 = vmmov %vm16094_vm0 }
 0x41a   : > { %v14755_v40 = vsel %vm16094_vm0, %v8019_v53, %v8028_v25  ;;  %v8054_v4 = vrot.slane %v8052_v8, 3  ;;  %v8067_v35 = vshrl.u32 %v14739_v16, 16  ;;  %v8060_v9 = vrot.slane %v8058_v47, 2  ;;  %vm16102_vm6 = vmmov %vm16089_vm1 }
 0x41b   : > { %16095 = vst [vmem:[#allocation66_spill] sm:$0xff] %v14755_v40  ;;  %v14760_v20 = vsel %vm16096_vm11, %v8028_v25, %v8037_v14  ;;  %v8046_v59 = vor.u32 %v8045_v32, %v8042_v2  ;;  %v8070_v39 = vshll.u32 %v14739_v16, 16  ;;  %v8063_v43 = vrot.slane %v8061_v63, 3  ;;  %vm16103_vm9 = vmmov %vm16094_vm0 }
 0x41c   : > { %10624 = vmatmul.mubr.msk.bf16.gmra.mrb[28].mxu1 %vm16089_vm1, %v14342_v24  ;;  %v8055_v13 = vor.u32 %v8054_v4, %v8051_v1  ;;  %v8069_v54 = vrot.slane %v8067_v35, 2  ;;  %v5907_v52 = vrot.slane %v14454_v41, 1  ;;  %v9686_v40 = vcombine.low %v8363_v19, %v14632_v31  ;;  %vm16106_vm7 = vmmov %vm16094_vm0 }
 0x41d   : > { %10627 = vmatprep.mubr.msk.bf16.mxu1 %vm16090_vm3, %v14359_v62  ;;  %v14765_v53 = vsel %vm16097_vm14, %v8037_v14, %v8046_v59  ;;  %v8072_v8 = vrot.slane %v8070_v39, 3  ;;  %v16099_v25 = vrot.slane %v14444_v22, 1  ;;  %vm16100_vm10 = vcmask 1046528  }
 0x41e   : > { %v14775_v1 = vsel %vm16101_vm15, %v8046_v59, %v8055_v13  ;;  %v8064_v35 = vor.u32 %v8063_v43, %v8060_v9  ;;  %v8373_v41 = vrot.slane %v14639_v0, 3  ;;  %v5909_v63 = vrot.slane %v14495_v10, 1  ;;  %vm16105_vm2 = vmmov %vm16100_vm10 }
 0x41f   : > { %v5906_v47 = vsel %vm16100_vm10, %v14650_v51, %v16099_v25  ;;  %v14780_v2 = vor.u32 %v8072_v8, %v8069_v54  ;;  %v8372_v19 = vrot.slane %v9686_v40, 3  ;;  %v8375_v31 = vrot.slane %v14641_v45, 3  ;;  %vm16116_vm12 = vmmov %vm16105_vm2 }
 0x420   : > { %v14784_v14 = vsel %vm16103_vm9, %v8055_v13, %v8064_v35  ;;  %v8377_v51 = vrot.slane %v14643_v61, 3  ;;  %v8379_v32 = vrot.slane %v14645_v30, 3  ;;  %v8381_v4 = vrot.slane %v14653_v37, 3  ;;  %vm16124_vm10 = vmmov %vm16102_vm6 }
 0x421   : > { %v16104_v59 = vmov %v16099_v25  ;;  %v14794_v10 = vsel %vm16106_vm7, %v8064_v35, %v14780_v2  ;;  %vm16107_vm8 = vcmask 1044480   ;;  %v8383_v54 = vrot.slane %v14660_v33, 3  ;;  %v14813_v25 = vld [vmem:[#allocation2 + $0xa0] ss:$0 sps:$4 sm:$0x77]  }
 0x422   : > { %v5908_v9 = vsel %vm16105_vm2, %v16104_v59, %v5907_v52  ;;  %v14797_v40 = vsel %vm16107_vm8, %v8372_v19, %v8373_v41  ;;  %vm16108_vm5 = vmmov %vm16107_vm8  ;;  %v5910_v8 = vsel %vm16116_vm12, %v5907_v52, %v5909_v63  ;;  %v8387_v35 = vrot.slane %v14671_v50, 3  ;;  %v11676_v19 = vld [vmem:[%s15383_s3 + $0x38] sm:$0xff]  }
 0x423   : > { %v14800_v39 = vsel %vm16108_vm5, %v8373_v41, %v8375_v31  ;;  %vm16110_vm1 = vmmov %vm16108_vm5  ;;  %v8389_v41 = vrot.slane %v14674_v34, 3  ;;  %v8395_v52 = vrot.slane %v14703_v49, 3 }
 0x424   : > { %10628 = vmatmul.mubr.msk.bf16.gmra.mrb[32].mxu1 %vm16098_vm13, %v14370_v6  ;;  %16109 = vst [vmem:[#allocation49_spill] sm:$0xff] %v14800_v39  ;;  %v14803_v13 = vsel %vm16110_vm1, %v8375_v31, %v8377_v51  ;;  %vm16112_vm3 = vmmov %vm16110_vm1 }
 0x425   : > { %10635 = vmatprep.mubr.msk.bf16.mxu1 %vm16102_vm6, %v5906_v47  ;;  %16111 = vst [vmem:[#allocation67_spill] sm:$0xff] %v14803_v13  ;;  %v14806_v43 = vsel %vm16112_vm3, %v8377_v51, %v8379_v32  ;;  %vm16114_vm4 = vmmov %vm16110_vm1  ;;  %v8385_v47 = vrot.slane %v14668_v36, 3  ;;  %v8391_v51 = vrot.slane %v14684_v15, 3  ;;  %v8397_v13 = vrot.slane %v14709_v58, 3 }
 0x426   : > { %16113 = vst [vmem:[#allocation68_spill] sm:$0xff] %v14806_v43  ;;  %v14809_v22 = vsel %vm16114_vm4, %v8379_v32, %v8381_v4  ;;  %vm16117_vm0 = vmmov %vm16110_vm1  ;;  %v8393_v32 = vrot.slane %v14691_v18, 3 }
 0x427   : > { %16115 = vst [vmem:[#allocation52_spill] sm:$0xff] %v14809_v22  ;;  %v14822_v31 = vsel %vm16117_vm0, %v8381_v4, %v8383_v54  ;;  %vm16119_vm11 = vmmov %vm16117_vm0 }
 0x428   : > { %16118 = vst [vmem:[#allocation8_spill] sm:$0xff] %v14822_v31  ;;  %v14828_v59 = vsel %vm16119_vm11, %v8383_v54, %v8385_v47  ;;  %vm16120_vm14 = vmmov %vm16117_vm0  ;;  %v8399_v54 = vrot.slane %v14717_v60, 3 }
 0x429   : > { %v14831_v22 = vsel %vm16120_vm14, %v8385_v47, %v8387_v35  ;;  %vm16122_vm13 = vmmov %vm16117_vm0 }
 0x42a   : > { %16121 = vst [vmem:[#allocation7_spill] sm:$0xff] %v14831_v22  ;;  %v14834_v43 = vsel %vm16122_vm13, %v8387_v35, %v8389_v41  ;;  %vm16125_vm15 = vmmov %vm16117_vm0  ;;  %v8403_v35 = vrot.slane %v14731_v28, 3 }
 0x42b   : > { %16123 = vst [vmem:[#allocation54_spill] sm:$0xff] %v14834_v43  ;;  %v14839_v4 = vsel %vm16125_vm15, %v8389_v41, %v8391_v51  ;;  %vm16127_vm6 = vmmov %vm16117_vm0  ;;  %v8405_v41 = vrot.slane %v14739_v16, 3 }
 0x42c   : > { %10636 = vmatmul.mubr.msk.bf16.vlgmr.msra.gmra.mrb[0].mxu1 %vm16124_vm10, %v5908_v9  ;;  %16126 = vst [vmem:[#allocation69_spill] sm:$0xff] %v14839_v4  ;;  %v14842_v31 = vsel %vm16127_vm6, %v8391_v51, %v8393_v32  ;;  %vm16129_vm9 = vmmov %vm16117_vm0  ;;  %v8401_v9 = vrot.slane %v14723_v5, 3  ;;  %v14859_v51 = vld [vmem:[%s15383_s3 + $0x40] sm:$0xff]   ;;  %v11736_v4 = vld [vmem:[#allocation2 + $0x28] sm:$0xff]  }
 0x42d   : > { %16128 = vst [vmem:[#allocation3_spill] sm:$0xff] %v14842_v31  ;;  %v14845_v39 = vsel %vm16129_vm9, %v8393_v32, %v8395_v52  ;;  %10672 = vmatpush3.bf16.msra.mxu1 %v14467_v23  ;;  %vm16131_vm2 = vmmov %vm16124_vm10  ;;  %v8407_v23 = vrot.slane %v14813_v25, 3  ;;  %v5913_v43 = vrot.slane %v11736_v4, 1 }
 0x42e   : > { %16130 = vst [vmem:[#allocation56_spill] sm:$0xff] %v14845_v39  ;;  %10639 = vmatprep.mubr.msk.bf16.mxu1 %vm16131_vm2, %v5910_v8  ;;  %vm16132_vm7 = vmmov %vm16117_vm0  ;;  %10673 = vmatprep.subr.bf16.mxu1 %v11676_v19  ;;  %v11735_v8 = vld [vmem:[#allocation2 + $0x20] sm:$0xff]  }
 0x42f   : > { %v14851_v47 = vsel %vm16132_vm7, %v8395_v52, %v8397_v13  ;;  %vm16134_vm8 = vmmov %vm16117_vm0  ;;  %v5911_v52 = vrot.slane %v11735_v8, 1 }
 0x430   : > { %16133 = vst [vmem:[#allocation31_spill] sm:$0xff] %v14851_v47  ;;  %v14862_v32 = vsel %vm16134_vm8, %v8397_v13, %v8399_v54  ;;  %vm16135_vm5 = vmmov %vm16117_vm0 }
 0x431   : > { %v14866_v47 = vsel %vm16135_vm5, %v8399_v54, %v8401_v9  ;;  %vm16136_vm1 = vmmov %vm16117_vm0  ;;  %10674 = vmatpush3.bf16.msra.mxu1 %v11676_v19  ;;  %v5912_v13 = vsel %vm16116_vm12, %v5909_v63, %v5911_v52 }
 0x432   : > { %v14869_v39 = vsel %vm16136_vm1, %v8401_v9, %v8403_v35  ;;  %vm16137_vm3 = vmmov %vm16117_vm0  ;;  %10711 = vmatprep.subr.bf16.mxu1 %v14859_v51  ;;  %v11737_v9 = vld [vmem:[#allocation2 + $0x30] sm:$0xff]  }
 0x433   : > { %v14872_v31 = vsel %vm16137_vm3, %v8403_v35, %v8405_v41  ;;  %vm16139_vm4 = vmmov %vm16117_vm0  ;;  %v5915_v8 = vrot.slane %v11737_v9, 1  ;;  %v11738_v35 = vld [vmem:[#allocation2 + $0x38] sm:$0xff]   ;;  %v11741_v9 = vld [vmem:[#allocation2 + $0x50] sm:$0xff]  }
 0x434   : > { %16138 = vst [vmem:[#allocation70_spill] sm:$0xff] %v14872_v31  ;;  %v14875_v22 = vsel %vm16139_vm4, %v8405_v41, %v8407_v23  ;;  %vm16140_vm0 = vmmov %vm16131_vm2  ;;  %v5917_v31 = vrot.slane %v11738_v35, 1  ;;  %v11739_v41 = vld [vmem:[#allocation2 + $0x40] sm:$0xff]   ;;  %v11740_v23 = vld [vmem:[#allocation2 + $0x48] sm:$0xff]   ;;  %v5925_v35 = vrot.slane %v14313_v46, 1  ;;  %v5931_v46 = vrot.slane %v14338_v48, 1 }
 0x435   : > { %10640 = vmatmul.mubr.msk.bf16.gmra.mrb[4].mxu1 %vm16140_vm0, %v5912_v13  ;;  %vm16141_vm11 = vmmov %vm16116_vm12  ;;  %v5919_v63 = vrot.slane %v11739_v41, 1  ;;  %v5921_v13 = vrot.slane %v11740_v23, 1  ;;  %v5933_v23 = vrot.slane %v14342_v24, 1  ;;  %v5939_v24 = vrot.slane %v14375_v57, 1  ;;  %v11690_v57 = vld [vmem:[%s15383_s3 + $0x48] sm:$0xff]  }
 0x436   : > { %v5914_v54 = vsel %vm16141_vm11, %v5911_v52, %v5913_v43  ;;  %vm16142_vm14 = vmmov %vm16140_vm0 }
 0x437   : > { %10643 = vmatprep.mubr.msk.bf16.mxu1 %vm16142_vm14, %v5914_v54  ;;  %vm16143_vm13 = vmmov %vm16141_vm11 }
 0x438   : > { %v5916_v4 = vsel %vm16143_vm13, %v5913_v43, %v5915_v8  ;;  %vm16144_vm10 = vmmov %vm16140_vm0  ;;  %v5923_v43 = vrot.slane %v11741_v9, 1  ;;  %v6355_v9 = vrot.slane %v14387_v17, 1 }
 0x439   : > { %vm16145_vm15 = vmmov %vm16141_vm11 }
 0x43a   : > { %v5918_v19 = vsel %vm16145_vm15, %v5915_v8, %v5917_v31  ;;  %vm16146_vm6 = vmmov %vm16140_vm0 }
 0x43b   : > { %vm16147_vm9 = vmmov %vm16141_vm11 }
 0x43c   : > { %v5920_v52 = vsel %vm16147_vm9, %v5917_v31, %v5919_v63  ;;  %vm16148_vm2 = vmmov %vm16140_vm0  ;;  %v5927_v31 = vrot.slane %v14317_v55, 1 }
 0x43d   : > { %10644 = vmatmul.mubr.msk.bf16.gmra.mrb[8].mxu1 %vm16144_vm10, %v5916_v4  ;;  %vm16149_vm7 = vmmov %vm16147_vm9 }
 0x43e   : > { %10647 = vmatprep.mubr.msk.bf16.mxu1 %vm16146_vm6, %v5918_v19  ;;  %v5922_v54 = vsel %vm16149_vm7, %v5919_v63, %v5921_v13  ;;  %vm16150_vm8 = vmmov %vm16140_vm0  ;;  %v5929_v19 = vrot.slane %v14324_v44, 1  ;;  %v5935_v44 = vrot.slane %v14359_v62, 1 }
 0x43f   : > { %vm16151_vm5 = vmmov %vm16149_vm7 }
 0x440   : > { %v5924_v8 = vsel %vm16151_vm5, %v5921_v13, %v5923_v43  ;;  %vm16152_vm1 = vmmov %vm16140_vm0 }
 0x441   : > { %vm16153_vm3 = vmmov %vm16151_vm5 }
 0x442   : > { %v5926_v4 = vsel %vm16153_vm3, %v5923_v43, %v5925_v35  ;;  %vm16154_vm4 = vmmov %vm16140_vm0  ;;  %v6356_v43 = vrot.slane %v14389_v27, 1 }
 0x443   : > { %vm16155_vm12 = vmmov %vm16153_vm3 }
 0x444   : > { %v5928_v41 = vsel %vm16155_vm12, %v5925_v35, %v5927_v31  ;;  %vm16156_vm11 = vmmov %vm16153_vm3  ;;  %v6357_v62 = vsel %vm16153_vm3, %v6355_v9, %v6356_v43  ;;  %v16193_v9 = vld [vmem:[#allocation19_spill] sm:$0xff] }
 0x445   : > { %10648 = vmatmul.mubr.msk.bf16.gmra.mrb[12].mxu1 %vm16148_vm2, %v5920_v52  ;;  %v5930_v63 = vsel %vm16156_vm11, %v5927_v31, %v5929_v19  ;;  %vm16157_vm14 = vmmov %vm16140_vm0  ;;  %v5937_v52 = vrot.slane %v14370_v6, 1  ;;  %v6358_v6 = vrot.slane %v14391_v56, 1  ;;  %v11698_v56 = vld [vmem:[%s15383_s3 + $0x50] sm:$0xff]  }
 0x446   : > { %10651 = vmatprep.mubr.msk.bf16.mxu1 %vm16150_vm8, %v5922_v54  ;;  %vm16158_vm13 = vmmov %vm16153_vm3 }
 0x447   : > { %v5932_v13 = vsel %vm16158_vm13, %v5929_v19, %v5931_v46  ;;  %vm16159_vm10 = vmmov %vm16140_vm0 }
 0x448   : > { %vm16160_vm15 = vmmov %vm16153_vm3 }
 0x449   : > { %v5934_v55 = vsel %vm16160_vm15, %v5931_v46, %v5933_v23  ;;  %vm16161_vm6 = vmmov %vm16140_vm0  ;;  %v6372_v46 = vrot.slane %v14425_v21, 1  ;;  %v16187_v21 = vld [vmem:[#allocation12_spill] sm:$0xff] }
 0x44a   : > { %vm16162_vm9 = vmmov %vm16153_vm3 }
 0x44b   : > { %v5936_v54 = vsel %vm16162_vm9, %v5933_v23, %v5935_v44  ;;  %vm16163_vm2 = vmmov %vm16140_vm0 }
 0x44c   : > { %vm16164_vm7 = vmmov %vm16153_vm3 }
 0x44d   : > { %10652 = vmatmul.mubr.msk.bf16.gmra.mrb[16].mxu1 %vm16152_vm1, %v5924_v8  ;;  %v5938_v48 = vsel %vm16164_vm7, %v5935_v44, %v5937_v52  ;;  %vm16165_vm8 = vmmov %vm16140_vm0  ;;  %v6360_v8 = vrot.slane %v14393_v38, 1  ;;  %v6362_v38 = vrot.slane %v14396_v26, 1 }
 0x44e   : > { %10655 = vmatprep.mubr.msk.bf16.mxu1 %vm16154_vm4, %v5926_v4  ;;  %vm16166_vm5 = vmmov %vm16153_vm3  ;;  %v6364_v4 = vrot.slane %v14407_v42, 1  ;;  %v6370_v42 = vrot.slane %v14421_v7, 1 }
 0x44f   : > { %v5940_v35 = vsel %vm16166_vm5, %v5937_v52, %v5939_v24  ;;  %vm16167_vm1 = vmmov %vm16140_vm0  ;;  %v6378_v52 = vrot.slane %v16187_v21, 1  ;;  %v16225_v21 = vld [vmem:[#allocation18_spill] sm:$0xff] }
 0x450   : > { %vm16168_vm4 = vmmov %vm16140_vm0 }
 0x451   : > { %vm16169_vm12 = vmmov %vm16153_vm3 }
 0x452   : > { %v6359_v17 = vsel %vm16169_vm12, %v6356_v43, %v6358_v6  ;;  %vm16170_vm11 = vmmov %vm16153_vm3  ;;  %v6382_v43 = vrot.slane %v16193_v9, 1 }
 0x453   : > { %v6361_v27 = vsel %vm16170_vm11, %v6358_v6, %v6360_v8  ;;  %vm16172_vm13 = vmmov %vm16153_vm3 }
 0x454   : > { %v6363_v31 = vsel %vm16172_vm13, %v6360_v8, %v6362_v38  ;;  %vm16174_vm15 = vmmov %vm16153_vm3 }
 0x455   : > { %10656 = vmatmul.mubr.msk.bf16.gmra.mrb[20].mxu1 %vm16140_vm0, %v5928_v41  ;;  %v6365_v19 = vsel %vm16174_vm15, %v6362_v38, %v6364_v4  ;;  %v6368_v41 = vrot.slane %v14418_v12, 1  ;;  %vm16176_vm9 = vmmov %vm16153_vm3  ;;  %v6374_v12 = vrot.slane %v14441_v3, 1 }
 0x456   : > { %10659 = vmatprep.mubr.msk.bf16.mxu1 %vm16157_vm14, %v5930_v63  ;;  %vm16171_vm14 = vmmov %vm16140_vm0 }
 0x457   : > { %vm16178_vm7 = vmmov %vm16153_vm3 }
 0x458   : > { %vm16180_vm5 = vmmov %vm16153_vm3 }
 0x459   : > { %v6371_v23 = vsel %vm16180_vm5, %v6368_v41, %v6370_v42  ;;  %vm16184_vm12 = vmmov %vm16153_vm3 }
 0x45a   : > { %v6375_v44 = vsel %vm16184_vm12, %v6372_v46, %v6374_v12  ;;  %vm16185_vm11 = vmmov %vm16153_vm3 }
 0x45b   : > { %vm16189_vm13 = vmmov %vm16153_vm3 }
 0x45c   : > { %vm16191_vm15 = vmmov %vm16153_vm3 }
 0x45d   : > { %10660 = vmatmul.mubr.msk.bf16.gmra.mrb[24].mxu1 %vm16159_vm10, %v5932_v13  ;;  %vm16173_vm10 = vmmov %vm16140_vm0  ;;  %v16183_v13 = vld [vmem:[#allocation11_spill] sm:$0xff] }
 0x45e   : > { %10663 = vmatprep.mubr.msk.bf16.mxu1 %vm16161_vm6, %v5934_v55  ;;  %vm16175_vm6 = vmmov %vm16140_vm0  ;;  %v6376_v55 = vrot.slane %v16183_v13, 1  ;;  %v16215_v13 = vld [vmem:[#allocation13_spill] sm:$0xff] }
 0x45f   : > { %vm16201_vm5 = vmmov %vm16153_vm3 }
 0x460   : > { %v6377_v7 = vsel %vm16185_vm11, %v6374_v12, %v6376_v55  ;;  %v6379_v24 = vsel %vm16189_vm13, %v6376_v55, %v6378_v52  ;;  %vm16204_vm12 = vmmov %vm16153_vm3  ;;  %v16213_v12 = vld [vmem:[#allocation14_spill] sm:$0xff]  ;;  %v16219_v55 = vld [vmem:[#allocation15_spill] sm:$0xff] }
 0x461   : > { %vm16206_vm11 = vmmov %vm16140_vm0 }
 0x462   : > { %vm16210_vm13 = vmmov %vm16140_vm0 }
 0x465   : > { %10664 = vmatmul.mubr.msk.bf16.gmra.mrb[28].mxu1 %vm16163_vm2, %v5936_v54  ;;  %vm16177_vm2 = vmmov %vm16140_vm0  ;;  %v16188_v54 = vld [vmem:[#allocation6_spill] sm:$0xff] }
 0x466   : > { %10667 = vmatprep.mubr.msk.bf16.mxu1 %vm16165_vm8, %v5938_v48  ;;  %vm16179_vm8 = vmmov %vm16140_vm0  ;;  %v6380_v48 = vrot.slane %v16188_v54, 1  ;;  %v16229_v54 = vld [vmem:[#allocation26_spill] sm:$0xff] }
 0x468   : > { %v6381_v3 = vsel %vm16191_vm15, %v6378_v52, %v6380_v48  ;;  %vm16214_vm15 = vmmov %vm16140_vm0  ;;  %v16227_v52 = vld [vmem:[#allocation34_spill] sm:$0xff] }
 0x46d   : > { %10668 = vmatmul.mubr.msk.bf16.gmra.mrb[32].mxu1 %vm16167_vm1, %v5940_v35  ;;  %vm16181_vm1 = vmmov %vm16140_vm0  ;;  %v16194_v35 = vld [vmem:[#allocation29_spill] sm:$0xff] }
 0x46e   : > { %10675 = vmatprep.mubr.msk.bf16.mxu1 %vm16168_vm4, %v6357_v62  ;;  %vm16182_vm4 = vmmov %vm16140_vm0  ;;  %v6384_v62 = vrot.slane %v16194_v35, 1 }
 0x475   : > { %10676 = vmatmul.mubr.msk.bf16.vlgmr.msra.gmra.mrb[0].mxu1 %vm16140_vm0, %v6359_v17 }
 0x476   : > { %10712 = vmatpush3.bf16.msra.mxu1 %v14859_v51  ;;  %10679 = vmatprep.mubr.msk.bf16.mxu1 %vm16171_vm14, %v6361_v27  ;;  %v6366_v51 = vrot.slane %v14415_v29, 1  ;;  %v6373_v29 = vsel %vm16153_vm3, %v6370_v42, %v6372_v46  ;;  %vm16186_vm14 = vmmov %vm16140_vm0  ;;  %v16200_v27 = vld [vmem:[#allocation16_spill] sm:$0xff]  ;;  %v16207_v42 = vld [vmem:[#allocation10_spill] sm:$0xff] }
 0x477   : > { %10713 = vmatprep.subr.bf16.mxu1 %v11690_v57  ;;  %v6388_v38 = vrot.slane %v16200_v27, 1  ;;  %v16209_v46 = vld [vmem:[#allocation4_spill] sm:$0xff] }
 0x478   : > { %v6367_v63 = vsel %vm16176_vm9, %v6364_v4, %v6366_v51  ;;  %v6369_v26 = vsel %vm16178_vm7, %v6366_v51, %v6368_v41  ;;  %vm16195_vm9 = vmmov %vm16153_vm3 }
 0x479   : > { %v6383_v6 = vsel %vm16195_vm9, %v6380_v48, %v6382_v43  ;;  %vm16197_vm7 = vmmov %vm16153_vm3  ;;  %v16231_v48 = vld [vmem:[#allocation21_spill] sm:$0xff] }
 0x47a   : > { %10714 = vmatpush3.bf16.msra.mxu1 %v11690_v57  ;;  %v6385_v8 = vsel %vm16197_vm7, %v6382_v43, %v6384_v62  ;;  %v16199_v57 = vld [vmem:[#allocation20_spill] sm:$0xff]  ;;  %vm16218_vm9 = vmmov %vm16140_vm0 }
 0x47b   : > { %10751 = vmatprep.subr.bf16.mxu1 %v11698_v56  ;;  %v6386_v17 = vrot.slane %v16199_v57, 1  ;;  %vm16222_vm7 = vmmov %vm16140_vm0 }
 0x47d   : > { %10680 = vmatmul.mubr.msk.bf16.gmra.mrb[4].mxu1 %vm16173_vm10, %v6363_v31  ;;  %vm16190_vm10 = vmmov %vm16140_vm0  ;;  %v6387_v4 = vsel %vm16201_vm5, %v6384_v62, %v6386_v17  ;;  %v11697_v31 = vld [vmem:[#allocation2 + $0x98] ss:$0 sps:$4 sm:$0x11]  }
 0x47e   : > { %10683 = vmatprep.mubr.msk.bf16.mxu1 %vm16175_vm6, %v6365_v19  ;;  %vm16192_vm6 = vmmov %vm16140_vm0  ;;  %v6389_v19 = vsel %vm16153_vm3, %v6386_v17, %v6388_v38  ;;  %v6390_v51 = vrot.slane %v11697_v31, 1  ;;  %v16239_v17 = vld [vmem:[#allocation22_spill] sm:$0xff]  ;;  %v16244_v31 = vld [vmem:[#allocation33_spill] sm:$0xff] }
 0x47f   : > { %vm16226_vm5 = vmmov %vm16140_vm0 }
 0x480   : > { %v6391_v41 = vsel %vm16204_vm12, %v6388_v38, %v6390_v51  ;;  %vm16230_vm3 = vmmov %vm16140_vm0  ;;  %v16242_v38 = vld [vmem:[#allocation37_spill] sm:$0xff] }
 0x481   : > { %vm16234_vm12 = vmmov %vm16140_vm0  ;;  %v11706_v51 = vld [vmem:[%s15383_s3 + $0x70] sm:$0xff]  }
 0x485   : > { %10684 = vmatmul.mubr.msk.bf16.gmra.mrb[8].mxu1 %vm16177_vm2, %v6367_v63  ;;  %vm16196_vm2 = vmmov %vm16140_vm0  ;;  %v16205_v63 = vld [vmem:[#allocation9_spill] sm:$0xff] }
 0x486   : > { %10687 = vmatprep.mubr.msk.bf16.mxu1 %vm16179_vm8, %v6369_v26  ;;  %vm16198_vm8 = vmmov %vm16140_vm0  ;;  %v11699_v26 = vld [vmem:[%s15383_s3 + $0x58] sm:$0xff]  }
 0x48d   : > { %10688 = vmatmul.mubr.msk.bf16.gmra.mrb[12].mxu1 %vm16181_vm1, %v6371_v23  ;;  %vm16202_vm1 = vmmov %vm16140_vm0  ;;  %v11702_v23 = vld [vmem:[%s15383_s3 + $0x60] sm:$0xff]  }
 0x48e   : > { %10691 = vmatprep.mubr.msk.bf16.mxu1 %vm16182_vm4, %v6373_v29  ;;  %vm16203_vm4 = vmmov %vm16140_vm0  ;;  %v16211_v29 = vld [vmem:[#allocation5_spill] sm:$0xff] }
 0x495   : > { %10692 = vmatmul.mubr.msk.bf16.gmra.mrb[16].mxu1 %vm16140_vm0, %v6375_v44  ;;  %v16221_v44 = vld [vmem:[#allocation32_spill] sm:$0xff] }
 0x496   : > { %10695 = vmatprep.mubr.msk.bf16.mxu1 %vm16186_vm14, %v6377_v7  ;;  %vm16208_vm14 = vmmov %vm16140_vm0  ;;  %v16223_v7 = vld [vmem:[#allocation23_spill] sm:$0xff] }
 0x49d   : > { %10696 = vmatmul.mubr.msk.bf16.gmra.mrb[20].mxu1 %vm16190_vm10, %v6379_v24  ;;  %vm16212_vm10 = vmmov %vm16140_vm0  ;;  %v16233_v24 = vld [vmem:[#allocation36_spill] sm:$0xff] }
 0x49e   : > { %10699 = vmatprep.mubr.msk.bf16.mxu1 %vm16192_vm6, %v6381_v3  ;;  %vm16216_vm6 = vmmov %vm16140_vm0  ;;  %v16235_v3 = vld [vmem:[#allocation39_spill] sm:$0xff] }
 0x49f   : > { %v6842_v9 = vshrl.u32 %v16235_v3, 16  ;;  %v6845_v43 = vshll.u32 %v16235_v3, 16 }
 0x4a1   : > { %v6844_v35 = vrot.slane %v6842_v9, 1  ;;  %v6847_v62 = vrot.slane %v6845_v43, 2  ;;  %v7592_v9 = vrot.slane %v14641_v45, 2  ;;  %v7594_v43 = vrot.slane %v14643_v61, 2  ;;  %v11725_v45 = vld [vmem:[%s15383_s3 + $0x80] sm:$0xff]  }
 0x4a2   : > { %v7596_v61 = vrot.slane %v14645_v30, 2  ;;  %v7604_v30 = vrot.slane %v14671_v50, 2 }
 0x4a3   : > { %v6848_v57 = vor.u32 %v6847_v62, %v6844_v35  ;;  %v11717_v35 = vld [vmem:[%s15383_s3 + $0x78] sm:$0xff]  }
 0x4a5   : > { %10700 = vmatmul.mubr.msk.bf16.gmra.mrb[24].mxu1 %vm16196_vm2, %v6383_v6  ;;  %vm16220_vm2 = vmmov %vm16140_vm0  ;;  %v16236_v6 = vld [vmem:[#allocation30_spill] sm:$0xff] }
 0x4a6   : > { %10703 = vmatprep.mubr.msk.bf16.mxu1 %vm16198_vm8, %v6385_v8  ;;  %vm16224_vm8 = vmmov %vm16140_vm0  ;;  %v16237_v8 = vld [vmem:[#allocation38_spill] sm:$0xff] }
 0x4ad   : > { %10704 = vmatmul.mubr.msk.bf16.gmra.mrb[28].mxu1 %vm16202_vm1, %v6387_v4  ;;  %vm16228_vm1 = vmmov %vm16140_vm0  ;;  %v11703_v4 = vld [vmem:[%s15383_s3 + $0x68] sm:$0xff]  }
 0x4ae   : > { %10707 = vmatprep.mubr.msk.bf16.mxu1 %vm16203_vm4, %v6389_v19  ;;  %vm16232_vm4 = vmmov %vm16140_vm0  ;;  %v16246_v19 = vld [vmem:[#allocation24_spill] sm:$0xff] }
 0x4b5   : > { %10708 = vmatmul.mubr.msk.bf16.gmra.mrb[32].mxu1 %vm16140_vm0, %v6391_v41  ;;  %v16248_v41 = vld [vmem:[#allocation35_spill] sm:$0xff] }
 0x4b6   : > { %10715 = vmatprep.mubr.msk.bf16.mxu1 %vm16206_vm11, %v16205_v63  ;;  %vm16238_vm11 = vmmov %vm16140_vm0  ;;  %v16250_v63 = vld [vmem:[#allocation25_spill] sm:$0xff] }
 0x4bd   : > { %10716 = vmatmul.mubr.msk.bf16.vlgmr.msra.gmra.mrb[0].mxu1 %vm16208_vm14, %v16207_v42  ;;  %vm16240_vm14 = vsmask.f32 6400  ;;  %v16254_v42 = vld [vmem:[#allocation27_spill] sm:$0xff] }
 0x4be   : > { %10752 = vmatpush3.bf16.msra.mxu1 %v11698_v56  ;;  %10719 = vmatprep.mubr.msk.bf16.mxu1 %vm16210_vm13, %v16209_v46  ;;  %v16217_v56 = vld [vmem:[#allocation17_spill] sm:$0xff]  ;;  %v6849_v27 = vsel %vm16240_vm14, %v16239_v17, %v6848_v57  ;;  %vm16241_vm13 = vmmov %vm16140_vm0  ;;  %v16256_v46 = vld [vmem:[#allocation42_spill] sm:$0xff]  ;;  %v7600_v17 = vrot.slane %v14660_v33, 2 }
 0x4bf   : > { %10753 = vmatprep.subr.bf16.mxu1 %v11699_v26  ;;  %vm16270_vm14 = vmmov %vm16140_vm0 }
 0x4c2   : > { %10754 = vmatpush3.bf16.msra.mxu1 %v11699_v26  ;;  %v16252_v26 = vld [vmem:[#allocation40_spill] sm:$0xff] }
 0x4c3   : > { %10791 = vmatprep.subr.bf16.mxu1 %v11702_v23 }
 0x4c5   : > { %10720 = vmatmul.mubr.msk.bf16.gmra.mrb[4].mxu1 %vm16212_vm10, %v16211_v29  ;;  %vm16243_vm10 = vmmov %vm16140_vm0  ;;  %v16260_v29 = vld [vmem:[#allocation28_spill] sm:$0xff] }
 0x4c6   : > { %10723 = vmatprep.mubr.msk.bf16.mxu1 %vm16214_vm15, %v16213_v12  ;;  %vm16245_vm15 = vmmov %vm16140_vm0  ;;  %v16262_v12 = vld [vmem:[#allocation50_spill] sm:$0xff] }
 0x4cd   : > { %10724 = vmatmul.mubr.msk.bf16.gmra.mrb[8].mxu1 %vm16216_vm6, %v16215_v13  ;;  %vm16247_vm6 = vmmov %vm16140_vm0  ;;  %v16264_v13 = vld [vmem:[#allocation51_spill] sm:$0xff] }
 0x4ce   : > { %10727 = vmatprep.mubr.msk.bf16.mxu1 %vm16218_vm9, %v16217_v56  ;;  %vm16249_vm9 = vmmov %vm16140_vm0  ;;  %v16266_v56 = vld [vmem:[#allocation43_spill] sm:$0xff] }
 0x4d5   : > { %10728 = vmatmul.mubr.msk.bf16.gmra.mrb[12].mxu1 %vm16220_vm2, %v16219_v55  ;;  %vm16251_vm2 = vmmov %vm16140_vm0  ;;  %v16267_v55 = vld [vmem:[#allocation53_spill] sm:$0xff] }
 0x4d6   : > { %10731 = vmatprep.mubr.msk.bf16.mxu1 %vm16222_vm7, %v16221_v44  ;;  %vm16253_vm7 = vmmov %vm16140_vm0  ;;  %v16269_v44 = vld [vmem:[#allocation57_spill] sm:$0xff] }
 0x4dd   : > { %10732 = vmatmul.mubr.msk.bf16.gmra.mrb[16].mxu1 %vm16224_vm8, %v16223_v7  ;;  %vm16255_vm8 = vmmov %vm16140_vm0  ;;  %v16271_v7 = vld [vmem:[#allocation44_spill] sm:$0xff] }
 0x4de   : > { %10735 = vmatprep.mubr.msk.bf16.mxu1 %vm16226_vm5, %v16225_v21  ;;  %vm16257_vm5 = vmmov %vm16140_vm0  ;;  %v16273_v21 = vld [vmem:[#allocation55_spill] sm:$0xff] }
 0x4e5   : > { %10736 = vmatmul.mubr.msk.bf16.gmra.mrb[20].mxu1 %vm16228_vm1, %v16227_v52  ;;  %vm16259_vm1 = vmmov %vm16140_vm0  ;;  %v7590_v52 = vrot.slane %v14639_v0, 2 }
 0x4e6   : > { %10739 = vmatprep.mubr.msk.bf16.mxu1 %vm16230_vm3, %v16229_v54  ;;  %vm16261_vm3 = vmmov %vm16140_vm0  ;;  %v16275_v54 = vld [vmem:[#allocation45_spill] sm:$0xff] }
 0x4ed   : > { %10740 = vmatmul.mubr.msk.bf16.gmra.mrb[24].mxu1 %vm16232_vm4, %v16231_v48  ;;  %vm16263_vm4 = vmmov %vm16140_vm0  ;;  %v7589_v48 = vrot.slane %v16275_v54, 2  ;;  %v16328_v54 = vld [vmem:[#allocation48_spill] sm:$0xff] }
 0x4ee   : > { %10743 = vmatprep.mubr.msk.bf16.mxu1 %vm16234_vm12, %v16233_v24  ;;  %vm16265_vm12 = vmmov %vm16140_vm0  ;;  %v16276_v24 = vld [vmem:[#allocation58_spill] sm:$0xff] }
 0x4f5   : > { %10744 = vmatmul.mubr.msk.bf16.gmra.mrb[28].mxu1 %vm16140_vm0, %v16236_v6  ;;  %v7598_v6 = vrot.slane %v14653_v37, 2 }
 0x4f6   : > { %10747 = vmatprep.mubr.msk.bf16.mxu1 %vm16238_vm11, %v16237_v8  ;;  %vm16268_vm11 = vmmov %vm16140_vm0 }
 0x4fd   : > { %10748 = vmatmul.mubr.msk.bf16.gmra.mrb[32].mxu1 %vm16241_vm13, %v6849_v27  ;;  %vm16272_vm13 = vmmov %vm16140_vm0  ;;  %v7602_v27 = vrot.slane %v14668_v36, 2  ;;  %v7608_v36 = vrot.slane %v14684_v15, 2 }
 0x4fe   : > { %10755 = vmatprep.mubr.msk.bf16.mxu1 %vm16243_vm10, %v16242_v38  ;;  %vm16274_vm10 = vmmov %vm16140_vm0 }
 0x505   : > { %10756 = vmatmul.mubr.msk.bf16.vlgmr.msra.gmra.mrb[0].mxu1 %vm16245_vm15, %v16244_v31  ;;  %vm16277_vm15 = vmmov %vm16140_vm0 }
 0x506   : > { %10792 = vmatpush3.bf16.msra.mxu1 %v11702_v23  ;;  %10759 = vmatprep.mubr.msk.bf16.mxu1 %vm16247_vm6, %v16246_v19  ;;  %v16258_v23 = vld [vmem:[#allocation41_spill] sm:$0xff]  ;;  %vm16278_vm6 = vcmask 1045504   ;;  %v7610_v19 = vrot.slane %v14691_v18, 2  ;;  %v7616_v18 = vrot.slane %v14717_v60, 2 }
 0x507   : > { %10793 = vmatprep.subr.bf16.mxu1 %v11703_v4  ;;  %v7591_v3 = vsel %vm16278_vm6, %v7589_v48, %v7590_v52  ;;  %v16330_v48 = vld [vmem:[#allocation65_spill] sm:$0xff] }
 0x50a   : > { %10794 = vmatpush3.bf16.msra.mxu1 %v11703_v4  ;;  %v7606_v4 = vrot.slane %v14674_v34, 2  ;;  %v7612_v34 = vrot.slane %v14703_v49, 2 }
 0x50b   : > { %10831 = vmatprep.subr.bf16.mxu1 %v11706_v51 }
 0x50d   : > { %10760 = vmatmul.mubr.msk.bf16.gmra.mrb[4].mxu1 %vm16249_vm9, %v16248_v41  ;;  %vm16279_vm9 = vmmov %vm16140_vm0  ;;  %v7614_v41 = vrot.slane %v14709_v58, 2  ;;  %v7620_v58 = vrot.slane %v14731_v28, 2  ;;  %v11726_v28 = vld [vmem:[%s15383_s3 + $0x88] sm:$0xff]  }
 0x50e   : > { %10763 = vmatprep.mubr.msk.bf16.mxu1 %vm16251_vm2, %v16250_v63  ;;  %vm16280_vm2 = vmmov %vm16278_vm6 }
 0x50f   : > { %v7593_v62 = vsel %vm16280_vm2, %v7590_v52, %v7592_v9  ;;  %v16326_v52 = vld [vmem:[#allocation64_spill] sm:$0xff] }
 0x515   : > { %10764 = vmatmul.mubr.msk.bf16.gmra.mrb[8].mxu1 %vm16253_vm7, %v16252_v26  ;;  %vm16281_vm7 = vmmov %vm16140_vm0  ;;  %v7618_v26 = vrot.slane %v14723_v5, 2 }
 0x516   : > { %10767 = vmatprep.mubr.msk.bf16.mxu1 %vm16255_vm8, %v16254_v42  ;;  %vm16282_vm8 = vmmov %vm16280_vm2 }
 0x517   : > { %v7595_v0 = vsel %vm16282_vm8, %v7592_v9, %v7594_v43  ;;  %v8079_v9 = vshll.u32 %v14813_v25, 16 }
 0x51d   : > { %10768 = vmatmul.mubr.msk.bf16.gmra.mrb[12].mxu1 %vm16257_vm5, %v16256_v46  ;;  %vm16283_vm5 = vmmov %vm16140_vm0  ;;  %v7622_v46 = vrot.slane %v14739_v16, 2  ;;  %v16314_v16 = vld [vmem:[#allocation60_spill] sm:$0xff] }
 0x51e   : > { %10771 = vmatprep.mubr.msk.bf16.mxu1 %vm16259_vm1, %v16258_v23  ;;  %vm16284_vm1 = vmmov %vm16280_vm2 }
 0x51f   : > { %v7597_v8 = vsel %vm16284_vm1, %v7594_v43, %v7596_v61 }
 0x525   : > { %10772 = vmatmul.mubr.msk.bf16.gmra.mrb[16].mxu1 %vm16261_vm3, %v16260_v29  ;;  %vm16285_vm3 = vmmov %vm16140_vm0  ;;  %v11724_v29 = vld [vmem:[#allocation2 + $0xa0] ss:$0 sps:$4 sm:$0x33]  }
 0x526   : > { %10775 = vmatprep.mubr.msk.bf16.mxu1 %vm16263_vm4, %v16262_v12  ;;  %vm16286_vm4 = vmmov %vm16284_vm1  ;;  %v7624_v5 = vrot.slane %v11724_v29, 2 }
 0x527   : > { %v7599_v57 = vsel %vm16286_vm4, %v7596_v61, %v7598_v6  ;;  %v16363_v61 = vld [vmem:[#allocation31_spill] sm:$0xff] }
 0x52d   : > { %10776 = vmatmul.mubr.msk.bf16.gmra.mrb[20].mxu1 %vm16265_vm12, %v16264_v13  ;;  %vm16287_vm12 = vmmov %vm16140_vm0  ;;  %v16312_v13 = vld [vmem:[#allocation59_spill] sm:$0xff] }
 0x52e   : > { %10779 = vmatprep.mubr.msk.bf16.mxu1 %vm16140_vm0, %v16266_v56  ;;  %vm16288_vm0 = vmmov %vm16284_vm1  ;;  %v16316_v56 = vld [vmem:[#allocation46_spill] sm:$0xff] }
 0x52f   : > { %v7601_v38 = vsel %vm16288_vm0, %v7598_v6, %v7600_v17  ;;  %vm16294_vm6 = vmmov %vm16288_vm0  ;;  %v7617_v42 = vsel %vm16288_vm0, %v7614_v41, %v7616_v18  ;;  %v9814_v6 = vld [vmem:[%s11804_s29 + $0x10] sm:$0xff]  }
 0x530   : > { %v7607_v33 = vsel %vm16294_vm6, %v7604_v30, %v7606_v4  ;;  %vm16296_vm2 = vmmov %vm16288_vm0 }
 0x531   : > { %vm16298_vm8 = vmmov %vm16288_vm0 }
 0x532   : > { %v7611_v50 = vsel %vm16298_vm8, %v7608_v36, %v7610_v19  ;;  %vm16300_vm1 = vmmov %vm16288_vm0 }
 0x533   : > { %v7613_v63 = vsel %vm16300_vm1, %v7610_v19, %v7612_v34  ;;  %vm16301_vm4 = vmmov %vm16288_vm0 }
 0x534   : > { %v7615_v15 = vsel %vm16301_vm4, %v7612_v34, %v7614_v41  ;;  %vm16308_vm6 = vmmov %vm16288_vm0  ;;  %v9817_v34 = vld [vmem:[%s11804_s29 + $0x28] sm:$0xff]  }
 0x535   : > { %10780 = vmatmul.mubr.msk.bf16.gmra.mrb[24].mxu1 %vm16268_vm11, %v16267_v55  ;;  %vm16289_vm11 = vmmov %vm16285_vm3  ;;  %v7623_v60 = vsel %vm16308_vm6, %v7620_v58, %v7622_v46  ;;  %v16318_v55 = vld [vmem:[#allocation61_spill] sm:$0xff] }
 0x536   : > { %10783 = vmatprep.mubr.msk.bf16.mxu1 %vm16270_vm14, %v16269_v44  ;;  %vm16290_vm14 = vmmov %vm16288_vm0  ;;  %v16320_v44 = vld [vmem:[#allocation62_spill] sm:$0xff] }
 0x537   : > { %v7603_v37 = vsel %vm16290_vm14, %v7600_v17, %v7602_v27  ;;  %vm16304_vm14 = vmmov %vm16288_vm0  ;;  %v9815_v17 = vld [vmem:[%s11804_s29 + $0x18] sm:$0xff]  }
 0x538   : > { %v7619_v49 = vsel %vm16304_vm14, %v7616_v18, %v7618_v26  ;;  %vm16313_vm8 = vmmov %vm16285_vm3 }
 0x539   : > { %vm16317_vm1 = vmmov %vm16285_vm3 }
 0x53a   : > { %vm16321_vm4 = vmmov %vm16317_vm1 }
 0x53d   : > { %10784 = vmatmul.mubr.msk.bf16.gmra.mrb[28].mxu1 %vm16272_vm13, %v16271_v7  ;;  %vm16291_vm13 = vmmov %vm16285_vm3  ;;  %v16322_v7 = vld [vmem:[#allocation47_spill] sm:$0xff] }
 0x53e   : > { %10787 = vmatprep.mubr.msk.bf16.mxu1 %vm16274_vm10, %v16273_v21  ;;  %vm16292_vm10 = vmmov %vm16288_vm0  ;;  %v16324_v21 = vld [vmem:[#allocation63_spill] sm:$0xff] }
 0x53f   : > { %v7605_v31 = vsel %vm16292_vm10, %v7602_v27, %v7604_v30  ;;  %vm16306_vm10 = vmmov %vm16288_vm0  ;;  %v9748_v27 = vunpack.c.l.bf16 %v9814_v6 }
 0x540   : > { %v7621_v23 = vsel %vm16306_vm10, %v7618_v26, %v7620_v58 }
 0x541   : > { %v8882_v30 = vrot.slane %v9748_v27, 3 }
 0x545   : > { %10788 = vmatmul.mubr.msk.bf16.gmra.mrb[32].mxu1 %vm16277_vm15, %v16276_v24  ;;  %vm16293_vm15 = vmmov %vm16285_vm3  ;;  %v16333_v24 = vld [vmem:[#allocation66_spill] sm:$0xff] }
 0x546   : > { %10795 = vmatprep.mubr.msk.bf16.mxu1 %vm16279_vm9, %v7591_v3  ;;  %vm16295_vm9 = vmmov %vm16285_vm3  ;;  %v8076_v3 = vshrl.u32 %v14813_v25, 16  ;;  %v16347_v25 = vld [vmem:[#allocation68_spill] sm:$0xff] }
 0x548   : > { %v8078_v43 = vrot.slane %v8076_v3, 2 }
 0x54d   : > { %10796 = vmatmul.mubr.msk.bf16.vlgmr.msra.gmra.mrb[0].mxu1 %vm16281_vm7, %v7593_v62  ;;  %vm16297_vm7 = vmmov %vm16285_vm3  ;;  %v16357_v62 = vld [vmem:[#allocation69_spill] sm:$0xff] }
 0x54e   : > { %10832 = vmatpush3.bf16.msra.mxu1 %v11706_v51  ;;  %10799 = vmatprep.mubr.msk.bf16.mxu1 %vm16283_vm5, %v7595_v0  ;;  %v7609_v51 = vsel %vm16296_vm2, %v7606_v4, %v7608_v36  ;;  %vm16299_vm5 = vmmov %vm16285_vm3  ;;  %v16359_v0 = vld [vmem:[#allocation3_spill] sm:$0xff] }
 0x54f   : > { %10833 = vmatprep.subr.bf16.mxu1 %v11717_v35  ;;  %vm16310_vm2 = vmmov %vm16288_vm0 }
 0x550   : > { %v7625_v12 = vsel %vm16310_vm2, %v7622_v46, %v7624_v5  ;;  %vm16325_vm0 = vmmov %vm16317_vm1 }
 0x551   : > { %vm16329_vm14 = vmmov %vm16325_vm0 }
 0x552   : > { %10834 = vmatpush3.bf16.msra.mxu1 %v11717_v35  ;;  %vm16332_vm10 = vmmov %vm16325_vm0  ;;  %v8081_v35 = vrot.slane %v8079_v9, 3 }
 0x553   : > { %10871 = vmatprep.subr.bf16.mxu1 %v11725_v45  ;;  %vm16335_vm6 = vmmov %vm16325_vm0 }
 0x554   : > { %vm16337_vm2 = vmmov %vm16325_vm0 }
 0x555   : > { %10800 = vmatmul.mubr.msk.bf16.gmra.mrb[4].mxu1 %vm16285_vm3, %v7597_v8  ;;  %v8767_v8 = vld [vmem:[%s11804_s29 + $0x8] sm:$0xe] }
 0x556   : > { %10803 = vmatprep.mubr.msk.bf16.mxu1 %vm16287_vm12, %v7599_v57  ;;  %vm16302_vm12 = vmmov %vm16285_vm3  ;;  %v8768_v57 = vld [vmem:[%s11804_s29 + $0xc] sm:$0xf] }
 0x55d   : > { %10804 = vmatmul.mubr.msk.bf16.gmra.mrb[8].mxu1 %vm16289_vm11, %v7601_v38  ;;  %vm16303_vm11 = vmmov %vm16285_vm3  ;;  %v8804_v38 = vunpack.c.l.bf16 %v8767_v8 }
 0x55e   : > { %10807 = vmatprep.mubr.msk.bf16.mxu1 %vm16291_vm13, %v7603_v37  ;;  %vm16305_vm13 = vmmov %vm16285_vm3  ;;  %v9752_v37 = vunpack.c.l.bf16 %v9815_v17 }
 0x560   : > { %v8886_v19 = vrot.slane %v9752_v37, 3 }
 0x565   : > { %10808 = vmatmul.mubr.msk.bf16.gmra.mrb[12].mxu1 %vm16293_vm15, %v7605_v31  ;;  %vm16307_vm15 = vmmov %vm16285_vm3  ;;  %v8879_v31 = vrot.slane %v8804_v38, 3 }
 0x566   : > { %10811 = vmatprep.mubr.msk.bf16.mxu1 %vm16295_vm9, %v7607_v33  ;;  %vm16309_vm9 = vmmov %vm16285_vm3  ;;  %v9816_v33 = vld [vmem:[%s11804_s29 + $0x20] sm:$0xff]  }
 0x567   : > { %v9756_v18 = vunpack.c.l.bf16 %v9816_v33  ;;  %v9757_v26 = vunpack.c.h.bf16 %v9816_v33 }
 0x56d   : > { %10812 = vmatmul.mubr.msk.bf16.gmra.mrb[16].mxu1 %vm16297_vm7, %v7609_v51  ;;  %vm16311_vm7 = vmmov %vm16285_vm3 }
 0x56e   : > { %10815 = vmatprep.mubr.msk.bf16.mxu1 %vm16299_vm5, %v7611_v50  ;;  %vm16315_vm5 = vmmov %vm16285_vm3 }
 0x575   : > { %10816 = vmatmul.mubr.msk.bf16.gmra.mrb[20].mxu1 %vm16285_vm3, %v7613_v63  ;;  %vm16319_vm3 = vmmov %vm16317_vm1 }
 0x576   : > { %10819 = vmatprep.mubr.msk.bf16.mxu1 %vm16302_vm12, %v7615_v15  ;;  %vm16323_vm12 = vmmov %vm16317_vm1 }
 0x57d   : > { %10820 = vmatmul.mubr.msk.bf16.gmra.mrb[24].mxu1 %vm16303_vm11, %v7617_v42  ;;  %vm16327_vm11 = vmmov %vm16325_vm0 }
 0x57e   : > { %10823 = vmatprep.mubr.msk.bf16.mxu1 %vm16305_vm13, %v7619_v49  ;;  %vm16331_vm13 = vmmov %vm16325_vm0 }
 0x585   : > { %10824 = vmatmul.mubr.msk.bf16.gmra.mrb[28].mxu1 %vm16307_vm15, %v7621_v23  ;;  %vm16334_vm15 = vmmov %vm16325_vm0  ;;  %v9753_v23 = vunpack.c.h.bf16 %v9815_v17 }
 0x586   : > { %10827 = vmatprep.mubr.msk.bf16.mxu1 %vm16309_vm9, %v7623_v60  ;;  %vm16336_vm9 = vmmov %vm16325_vm0 }
 0x58d   : > { %10828 = vmatmul.mubr.msk.bf16.gmra.mrb[32].mxu1 %vm16311_vm7, %v7625_v12  ;;  %vm16338_vm7 = vmmov %vm16325_vm0  ;;  %v9760_v12 = vunpack.c.l.bf16 %v9817_v34 }
 0x58e   : > { %10835 = vmatprep.mubr.msk.bf16.mxu1 %vm16313_vm8, %v16312_v13  ;;  %vm16339_vm8 = vmmov %vm16325_vm0 }
 0x58f   : > { %v8894_v3 = vrot.slane %v9760_v12, 3 }
 0x595   : > { %10836 = vmatmul.mubr.msk.bf16.vlgmr.msra.gmra.mrb[0].mxu1 %vm16315_vm5, %v16314_v16  ;;  %vm16340_vm5 = vsmask.f32 5376 }
 0x596   : > { %10872 = vmatpush3.bf16.msra.mxu1 %v11725_v45  ;;  %10839 = vmatprep.mubr.msk.bf16.mxu1 %vm16317_vm1, %v16316_v56  ;;  %vm16341_vm1 = vmmov %vm16325_vm0  ;;  %v16361_v45 = vld [vmem:[#allocation56_spill] sm:$0xff] }
 0x597   : > { %10873 = vmatprep.subr.bf16.mxu1 %v11726_v28 }
 0x59a   : > { %10874 = vmatpush3.bf16.msra.mxu1 %v11726_v28 }
 0x59d   : > { %10840 = vmatmul.mubr.msk.bf16.gmra.mrb[4].mxu1 %vm16319_vm3, %v16318_v55  ;;  %vm16342_vm3 = vmmov %vm16325_vm0 }
 0x59e   : > { %10843 = vmatprep.mubr.msk.bf16.mxu1 %vm16321_vm4, %v16320_v44  ;;  %vm16344_vm4 = vmmov %vm16325_vm0  ;;  %v8890_v44 = vrot.slane %v9756_v18, 3 }
 0x5a5   : > { %10844 = vmatmul.mubr.msk.bf16.gmra.mrb[8].mxu1 %vm16323_vm12, %v16322_v7  ;;  %vm16346_vm12 = vmmov %vm16325_vm0  ;;  %v8892_v7 = vrot.slane %v9757_v26, 3 }
 0x5a6   : > { %10847 = vmatprep.mubr.msk.bf16.mxu1 %vm16325_vm0, %v16324_v21 }
 0x5ad   : > { %10848 = vmatmul.mubr.msk.bf16.gmra.mrb[12].mxu1 %vm16327_vm11, %v16326_v52  ;;  %vm16349_vm11 = vmmov %vm16325_vm0  ;;  %v8888_v52 = vrot.slane %v9753_v23, 3 }
 0x5ae   : > { %10851 = vmatprep.mubr.msk.bf16.mxu1 %vm16329_vm14, %v16328_v54  ;;  %vm16351_vm14 = vmmov %vm16325_vm0  ;;  %v9818_v54 = vld [vmem:[%s11804_s29 + $0x30] sm:$0xff]  }
 0x5b5   : > { %10852 = vmatmul.mubr.msk.bf16.gmra.mrb[16].mxu1 %vm16331_vm13, %v16330_v48  ;;  %vm16352_vm13 = vmmov %vm16325_vm0 }
 0x5b6   : > { %10855 = vmatprep.mubr.msk.bf16.mxu1 %vm16332_vm10, %v14750_v11  ;;  %v8082_v11 = vor.u32 %v8081_v35, %v8078_v43  ;;  %vm16354_vm10 = vmmov %vm16325_vm0  ;;  %v9819_v35 = vld [vmem:[%s11804_s29 + $0x38] sm:$0xff]  }
 0x5bd   : > { %10856 = vmatmul.mubr.msk.bf16.gmra.mrb[20].mxu1 %vm16334_vm15, %v16333_v24  ;;  %vm16356_vm15 = vmmov %vm16325_vm0 }
 0x5be   : > { %10859 = vmatprep.mubr.msk.bf16.mxu1 %vm16335_vm6, %v14760_v20  ;;  %v8083_v20 = vsel %vm16340_vm5, %v14780_v2, %v8082_v11  ;;  %v16350_v2 = vld [vmem:[#allocation8_spill] sm:$0xff]  ;;  %vm16358_vm6 = vmmov %vm16325_vm0 }
 0x5bf   : > { %vm16366_vm5 = vmmov %vm16325_vm0 }
 0x5c5   : > { %10860 = vmatmul.mubr.msk.bf16.gmra.mrb[24].mxu1 %vm16336_vm9, %v14765_v53  ;;  %v16343_v53 = vld [vmem:[#allocation49_spill] sm:$0xff]  ;;  %vm16360_vm9 = vmmov %vm16325_vm0 }
 0x5c6   : > { %10863 = vmatprep.mubr.msk.bf16.mxu1 %vm16337_vm2, %v14775_v1  ;;  %v16345_v1 = vld [vmem:[#allocation67_spill] sm:$0xff]  ;;  %vm16362_vm2 = vmmov %vm16325_vm0 }
 0x5cd   : > { %10864 = vmatmul.mubr.msk.bf16.gmra.mrb[28].mxu1 %vm16338_vm7, %v14784_v14  ;;  %v16348_v14 = vld [vmem:[#allocation52_spill] sm:$0xff]  ;;  %vm16364_vm7 = vmmov %vm16325_vm0 }
 0x5ce   : > { %10867 = vmatprep.mubr.msk.bf16.mxu1 %vm16339_vm8, %v14794_v10  ;;  %v16353_v10 = vld [vmem:[#allocation7_spill] sm:$0xff]  ;;  %vm16365_vm8 = vmmov %vm16325_vm0 }
 0x5d5   : > { %10868 = vmatmul.mubr.msk.bf16.gmra.mrb[32].mxu1 %vm16341_vm1, %v8083_v20  ;;  %vm16367_vm1 = vmmov %vm16325_vm0 }
 0x5d6   : > { %10875 = vmatprep.mubr.msk.bf16.mxu1 %vm16342_vm3, %v14797_v40  ;;  %v16355_v40 = vld [vmem:[#allocation54_spill] sm:$0xff]  ;;  %vm16369_vm3 = vmmov %vm16325_vm0 }
 0x5dd   : > { %10876 = vmatmul.mubr.msk.bf16.vlgmr.msra.gmra.mrb[0].mxu1 %vm16344_vm4, %v16343_v53  ;;  %vm16370_vm4 = vmmov %vm16325_vm0 }
 0x5de   : > { %10879 = vmatprep.mubr.msk.bf16.mxu1 %vm16346_vm12, %v16345_v1  ;;  %vm16371_vm12 = vcmask 1044480   ;;  %v9764_v1 = vunpack.c.l.bf16 %v9818_v54 }
 0x5e5   : > { %10880 = vmatmul.mubr.msk.bf16.gmra.mrb[4].mxu1 %vm16325_vm0, %v16347_v25  ;;  %vm16372_vm0 = vmmov %vm16371_vm12  ;;  %v9765_v25 = vunpack.c.h.bf16 %v9818_v54 }
 0x5e6   : > { %10883 = vmatprep.mubr.msk.bf16.mxu1 %vm16349_vm11, %v16348_v14  ;;  %vm16373_vm11 = vmmov %vm16372_vm0 }
 0x5e7   : > { %v8900_v38 = vrot.slane %v9765_v25, 3 }
 0x5ed   : > { %10884 = vmatmul.mubr.msk.bf16.gmra.mrb[8].mxu1 %vm16351_vm14, %v16350_v2  ;;  %vm16374_vm14 = vmmov %vm16372_vm0 }
 0x5ee   : > { %10887 = vmatprep.mubr.msk.bf16.mxu1 %vm16352_vm13, %v14828_v59  ;;  %v16368_v59 = vld [vmem:[#allocation70_spill] sm:$0xff]  ;;  %vm16375_vm13 = vmmov %vm16367_vm1 }
 0x5f5   : > { %10888 = vmatmul.mubr.msk.bf16.gmra.mrb[12].mxu1 %vm16354_vm10, %v16353_v10  ;;  %vm16376_vm10 = vmmov %vm16367_vm1 }
 0x5f6   : > { %10891 = vmatprep.mubr.msk.bf16.mxu1 %vm16356_vm15, %v16355_v40  ;;  %vm16377_vm15 = vmmov %vm16367_vm1 }
 0x5fd   : > { %10892 = vmatmul.mubr.msk.bf16.gmra.mrb[16].mxu1 %vm16358_vm6, %v16357_v62  ;;  %vm16378_vm6 = vmmov %vm16367_vm1  ;;  %v9761_v62 = vunpack.c.h.bf16 %v9817_v34 }
 0x5fe   : > { %10895 = vmatprep.mubr.msk.bf16.mxu1 %vm16360_vm9, %v16359_v0  ;;  %vm16379_vm9 = vmmov %vm16372_vm0 }
 0x5ff   : > { %v8893_v11 = vsel %vm16379_vm9, %v8890_v44, %v8892_v7  ;;  %v8896_v37 = vrot.slane %v9761_v62, 3  ;;  %vm16393_vm9 = vmmov %vm16372_vm0 }
 0x601   : > { %v8897_v18 = vsel %vm16372_vm0, %v8894_v3, %v8896_v37 }
 0x605   : > { %10896 = vmatmul.mubr.msk.bf16.gmra.mrb[20].mxu1 %vm16362_vm2, %v16361_v45  ;;  %vm16380_vm2 = vmmov %vm16372_vm0 }
 0x606   : > { %10899 = vmatprep.mubr.msk.bf16.mxu1 %vm16364_vm7, %v16363_v61  ;;  %v8889_v2 = vsel %vm16380_vm2, %v8886_v19, %v8888_v52  ;;  %vm16381_vm7 = vmmov %vm16372_vm0 }
 0x607   : > { %v8895_v45 = vsel %vm16381_vm7, %v8892_v7, %v8894_v3  ;;  %v9822_v7 = vld [vmem:[%s11804_s29 + $0x50] sm:$0xff]   ;;  %v9823_v3 = vld [vmem:[%s11804_s29 + $0x58] sm:$0xff]   ;;  %vm16394_vm2 = vmmov %vm16372_vm0 }
 0x608   : > { %vm16395_vm7 = vmmov %vm16372_vm0 }
 0x60d   : > { %10900 = vmatmul.mubr.msk.bf16.gmra.mrb[24].mxu1 %vm16365_vm8, %v14862_v32  ;;  %v9749_v32 = vunpack.c.h.bf16 %v9814_v6  ;;  %vm16382_vm8 = vmmov %vm16372_vm0 }
 0x60e   : > { %10903 = vmatprep.mubr.msk.bf16.mxu1 %vm16366_vm5, %v14866_v47  ;;  %v8805_v47 = vunpack.c.l.bf16 %v8768_v57  ;;  %v8891_v57 = vsel %vm16382_vm8, %v8888_v52, %v8890_v44  ;;  %vm16383_vm5 = vmmov %vm16367_vm1 }
 0x60f   : > { %v8884_v4 = vrot.slane %v9749_v32, 3  ;;  %v8898_v32 = vrot.slane %v9764_v1, 3  ;;  %vm16396_vm8 = vmmov %vm16372_vm0 }
 0x611   : > { %v8885_v41 = vsel %vm16371_vm12, %v8882_v30, %v8884_v4  ;;  %v8887_v60 = vsel %vm16373_vm11, %v8884_v4, %v8886_v19  ;;  %v9821_v19 = vld [vmem:[%s11804_s29 + $0x48] sm:$0xff]   ;;  %vm16386_vm12 = vmmov %vm16372_vm0 }
 0x612   : > { %vm16387_vm11 = vmmov %vm16372_vm0 }
 0x615   : > { %10904 = vmatmul.mubr.msk.bf16.gmra.mrb[28].mxu1 %vm16367_vm1, %v14869_v39  ;;  %v15209_v39 = vld [vmem:[%s15384_s4] ss:$0 sm:$0xff] }
 0x616   : > { %10907 = vmatprep.mubr.msk.bf16.mxu1 %vm16369_vm3, %v16368_v59  ;;  %v9768_v59 = vunpack.c.l.bf16 %v9819_v35  ;;  %vm16384_vm3 = vmmov %vm16367_vm1 }
 0x61d   : > { %10908 = vmatmul.mubr.msk.bf16.gmra.mrb[32].mxu1 %vm16370_vm4, %v14875_v22  ;;  %v8880_v22 = vrot.slane %v8805_v47, 3  ;;  %vm16385_vm4 = vmmov %vm16367_vm1 }
 0x61f   : > { %v8881_v49 = vsel %vm16372_vm0, %v8879_v31, %v8880_v22  ;;  %v8883_v16 = vsel %vm16374_vm14, %v8880_v22, %v8882_v30  ;;  %v9820_v30 = vld [vmem:[%s11804_s29 + $0x40] sm:$0xff]   ;;  %v8902_v22 = vrot.slane %v9768_v59, 3  ;;  %vm16388_vm14 = vmmov %vm16372_vm0 }
 0x620   : > { %v8899_v12 = vsel %vm16388_vm14, %v8896_v37, %v8898_v32  ;;  %vm16402_vm14 = vmmov %vm16372_vm0 }
 0x6b0   : > { %v10877_v36 = vpop.f32.mrb[0].mxu1 }
 0x6b1   : > { %v8697_v51 = vadd.f32 %v10877_v36, %v15209_v39  ;;  %v8509_v50 = vpop.f32.mrb[1].mxu1 }
 0x6b2   : > { %v8695_v63 = vadd.f32 %v15209_v39, %v8509_v50  ;;  %v10878_v15 = vpop.f32.mrb[2].mxu1 }
 0x6b3   : > { %v8733_v42 = vmax.f32 %v8697_v51, 0.0  ;;  %v8698_v58 = vadd.f32 %v10878_v15, %v15209_v39  ;;  %v8512_v46 = vpop.f32.mrb[3].mxu1  ;;  %v8901_v51 = vsel %vm16386_vm12, %v8898_v32, %v8900_v38  ;;  %vm16400_vm12 = vmmov %vm16372_vm0 }
 0x6b4   : > { %v8731_v29 = vmax.f32 %v8695_v63, 0.0  ;;  %v8696_v5 = vadd.f32 %v15209_v39, %v8512_v46  ;;  %v9773_v63 = vunpack.c.h.bf16 %v9820_v30  ;;  %v8903_v46 = vsel %vm16387_vm11, %v8900_v38, %v8902_v22  ;;  %v9824_v38 = vld [vmem:[%s11804_s29 + $0x60] sm:$0xff]   ;;  %vm16401_vm11 = vmmov %vm16372_vm0 }
 0x6b5   : > { %v8990_v13 = vadd.f32 %v8885_v41, %v8733_v42  ;;  %v8734_v28 = vmax.f32 %v8698_v58, 0.0  ;;  %v9772_v41 = vunpack.c.l.bf16 %v9820_v30 }
 0x6b6   : > { %v8988_v56 = vadd.f32 %v8881_v49, %v8731_v29  ;;  %v8732_v55 = vmax.f32 %v8696_v5, 0.0  ;;  %v9769_v49 = vunpack.c.h.bf16 %v9819_v35  ;;  %v9776_v29 = vunpack.c.l.bf16 %v9821_v19 }
 0x6b7   : > { %9026 = vst.msk [vmem:[%s15222_s15 + $0x10] sm:$0xff] %vm16375_vm13, %v8990_v13  ;;  %v8991_v21 = vadd.f32 %v8887_v60, %v8734_v28  ;;  %vm16389_vm13 = vmmov %vm16367_vm1 }
 0x6b8   : > { %9024 = vst.msk [vmem:[%s15222_s15] sm:$0xff] %vm16376_vm10, %v8988_v56  ;;  %v8989_v48 = vadd.f32 %v8883_v16, %v8732_v55  ;;  %v10881_v24 = vpop.f32.mrb[4].mxu1  ;;  %v8906_v16 = vrot.slane %v9772_v41, 3  ;;  %v8908_v56 = vrot.slane %v9773_v63, 3  ;;  %v8904_v44 = vrot.slane %v9769_v49, 3  ;;  %vm16390_vm10 = vmmov %vm16367_vm1 }
 0x6b9   : > { %9027 = vst.msk [vmem:[%s15222_s15 + $0x18] sm:$0xff] %vm16377_vm15, %v8991_v21  ;;  %v8701_v9 = vadd.f32 %v10881_v24, %v15209_v39  ;;  %v8525_v43 = vpop.f32.mrb[5].mxu1  ;;  %v8910_v54 = vrot.slane %v9776_v29, 3  ;;  %vm16391_vm15 = vmmov %vm16367_vm1 }
 0x6ba   : > { %9025 = vst.msk [vmem:[%s15222_s15 + $0x8] sm:$0xff] %vm16378_vm6, %v8989_v48  ;;  %v8699_v20 = vadd.f32 %v15209_v39, %v8525_v43  ;;  %v10882_v53 = vpop.f32.mrb[6].mxu1  ;;  %vm16392_vm6 = vmmov %vm16367_vm1  ;;  %v8905_v1 = vsel %vm16394_vm2, %v8902_v22, %v8904_v44  ;;  %v8907_v59 = vsel %vm16396_vm8, %v8904_v44, %v8906_v16  ;;  %v9825_v22 = vld [vmem:[%s11804_s29 + $0x68] sm:$0xff]  }
 0x6bb   : > { %v8737_v14 = vmax.f32 %v8701_v9, 0.0  ;;  %v8702_v10 = vadd.f32 %v10882_v53, %v15209_v39  ;;  %v8528_v40 = vpop.f32.mrb[7].mxu1  ;;  %v8909_v9 = vsel %vm16393_vm9, %v8906_v16, %v8908_v56  ;;  %vm16407_vm9 = vmmov %vm16372_vm0 }
 0x6bc   : > { %v8735_v0 = vmax.f32 %v8699_v20, 0.0  ;;  %v8700_v61 = vadd.f32 %v15209_v39, %v8528_v40  ;;  %v9781_v20 = vunpack.c.h.bf16 %v9822_v7  ;;  %v8911_v40 = vsel %vm16395_vm7, %v8908_v56, %v8910_v54  ;;  %v9826_v56 = vld [vmem:[%s11804_s29 + $0x70] sm:$0xff]   ;;  %vm16408_vm2 = vmmov %vm16372_vm0 }
 0x6bd   : > { %v8994_v6 = vadd.f32 %v8893_v11, %v8737_v14  ;;  %v8738_v8 = vmax.f32 %v8702_v10, 0.0  ;;  %v9780_v11 = vunpack.c.l.bf16 %v9822_v7  ;;  %vm16409_vm7 = vmmov %vm16372_vm0 }
 0x6be   : > { %v8992_v17 = vadd.f32 %v8889_v2, %v8735_v0  ;;  %v8736_v27 = vmax.f32 %v8700_v61, 0.0  ;;  %v9777_v2 = vunpack.c.h.bf16 %v9821_v19  ;;  %v9784_v0 = vunpack.c.l.bf16 %v9823_v3  ;;  %vm16410_vm8 = vmmov %vm16372_vm0 }
 0x6bf   : > { %9030 = vst.msk [vmem:[%s15222_s15 + $0x30] sm:$0xff] %vm16383_vm5, %v8994_v6  ;;  %v8995_v47 = vadd.f32 %v8895_v45, %v8738_v8  ;;  %vm16397_vm5 = vmmov %vm16367_vm1 }
 0x6c0   : > { %9028 = vst.msk [vmem:[%s15222_s15 + $0x20] sm:$0xff] %vm16367_vm1, %v8992_v17  ;;  %v8993_v4 = vadd.f32 %v8891_v57, %v8736_v27  ;;  %v10885_v31 = vpop.f32.mrb[8].mxu1  ;;  %v8914_v57 = vrot.slane %v9780_v11, 3  ;;  %v8916_v17 = vrot.slane %v9781_v20, 3  ;;  %v8912_v32 = vrot.slane %v9777_v2, 3 }
 0x6c1   : > { %9031 = vst.msk [vmem:[%s15222_s15 + $0x38] sm:$0xff] %vm16384_vm3, %v8995_v47  ;;  %v8705_v33 = vadd.f32 %v10885_v31, %v15209_v39  ;;  %v8541_v36 = vpop.f32.mrb[9].mxu1  ;;  %v8918_v30 = vrot.slane %v9784_v0, 3  ;;  %vm16398_vm3 = vmmov %vm16367_vm1 }
 0x6c2   : > { %9029 = vst.msk [vmem:[%s15222_s15 + $0x28] sm:$0xff] %vm16385_vm4, %v8993_v4  ;;  %v8703_v50 = vadd.f32 %v15209_v39, %v8541_v36  ;;  %v10886_v34 = vpop.f32.mrb[10].mxu1  ;;  %vm16399_vm4 = vmmov %vm16367_vm1  ;;  %v8913_v41 = vsel %vm16372_vm0, %v8910_v54, %v8912_v32  ;;  %v8915_v29 = vsel %vm16402_vm14, %v8912_v32, %v8914_v57  ;;  %v9827_v54 = vld [vmem:[%s11804_s29 + $0x78] sm:$0xff]  }
 0x6c3   : > { %v8741_v15 = vmax.f32 %v8705_v33, 0.0  ;;  %v8706_v26 = vadd.f32 %v10886_v34, %v15209_v39  ;;  %v8544_v42 = vpop.f32.mrb[11].mxu1  ;;  %v8917_v33 = vsel %vm16400_vm12, %v8914_v57, %v8916_v17  ;;  %vm16414_vm12 = vmmov %vm16372_vm0 }
 0x6c4   : > { %v8739_v58 = vmax.f32 %v8703_v50, 0.0  ;;  %v8704_v23 = vadd.f32 %v15209_v39, %v8544_v42  ;;  %v9789_v50 = vunpack.c.h.bf16 %v9824_v38  ;;  %v8919_v42 = vsel %vm16401_vm11, %v8916_v17, %v8918_v30  ;;  %v9828_v17 = vld [vmem:[%s11804_s29 + $0x80] sm:$0xff]   ;;  %vm16415_vm11 = vmmov %vm16372_vm0 }
 0x6c5   : > { %v8998_v60 = vadd.f32 %v8901_v51, %v8741_v15  ;;  %v8742_v5 = vmax.f32 %v8706_v26, 0.0  ;;  %v9788_v51 = vunpack.c.l.bf16 %v9824_v38  ;;  %vm16416_vm14 = vmmov %vm16372_vm0 }
 0x6c6   : > { %v8996_v13 = vadd.f32 %v8897_v18, %v8739_v58  ;;  %v8740_v28 = vmax.f32 %v8704_v23, 0.0  ;;  %v9785_v18 = vunpack.c.h.bf16 %v9823_v3  ;;  %v9792_v58 = vunpack.c.l.bf16 %v9825_v22 }
 0x6c7   : > { %9034 = vst.msk [vmem:[%s15222_s15 + $0x50] sm:$0xff] %vm16389_vm13, %v8998_v60  ;;  %v8999_v55 = vadd.f32 %v8903_v46, %v8742_v5  ;;  %vm16403_vm13 = vmmov %vm16367_vm1 }
 0x6c8   : > { %9032 = vst.msk [vmem:[%s15222_s15 + $0x40] sm:$0xff] %vm16390_vm10, %v8996_v13  ;;  %v8997_v21 = vadd.f32 %v8899_v12, %v8740_v28  ;;  %v10889_v52 = vpop.f32.mrb[12].mxu1  ;;  %v8922_v12 = vrot.slane %v9788_v51, 3  ;;  %v8924_v13 = vrot.slane %v9789_v50, 3  ;;  %v8920_v16 = vrot.slane %v9785_v18, 3  ;;  %vm16404_vm10 = vmmov %vm16367_vm1 }
 0x6c9   : > { %9035 = vst.msk [vmem:[%s15222_s15 + $0x58] sm:$0xff] %vm16391_vm15, %v8999_v55  ;;  %v8709_v48 = vadd.f32 %v10889_v52, %v15209_v39  ;;  %v8557_v24 = vpop.f32.mrb[13].mxu1  ;;  %v8926_v7 = vrot.slane %v9792_v58, 3  ;;  %vm16405_vm15 = vmmov %vm16367_vm1 }
 0x6ca   : > { %9033 = vst.msk [vmem:[%s15222_s15 + $0x48] sm:$0xff] %vm16392_vm6, %v8997_v21  ;;  %v8707_v43 = vadd.f32 %v15209_v39, %v8557_v24  ;;  %v10890_v35 = vpop.f32.mrb[14].mxu1  ;;  %vm16406_vm6 = vmmov %vm16367_vm1  ;;  %v8921_v11 = vsel %vm16408_vm2, %v8918_v30, %v8920_v16  ;;  %v8923_v0 = vsel %vm16410_vm8, %v8920_v16, %v8922_v12  ;;  %v9829_v30 = vld [vmem:[%s11804_s29 + $0x88] sm:$0xff]  }
 0x6cb   : > { %v8745_v53 = vmax.f32 %v8709_v48, 0.0  ;;  %v8710_v25 = vadd.f32 %v10890_v35, %v15209_v39  ;;  %v8560_v14 = vpop.f32.mrb[15].mxu1  ;;  %v8925_v48 = vsel %vm16407_vm9, %v8922_v12, %v8924_v13  ;;  %vm16421_vm9 = vmmov %vm16372_vm0 }
 0x6cc   : > { %v8743_v10 = vmax.f32 %v8707_v43, 0.0  ;;  %v8708_v62 = vadd.f32 %v15209_v39, %v8560_v14  ;;  %v9797_v43 = vunpack.c.h.bf16 %v9826_v56  ;;  %v8927_v14 = vsel %vm16409_vm7, %v8924_v13, %v8926_v7  ;;  %v9830_v13 = vld [vmem:[%s11804_s29 + $0x90] sm:$0xff]   ;;  %vm16422_vm2 = vmmov %vm16372_vm0 }
 0x6cd   : > { %v9002_v45 = vadd.f32 %v8909_v9, %v8745_v53  ;;  %v8746_v61 = vmax.f32 %v8710_v25, 0.0  ;;  %v9796_v9 = vunpack.c.l.bf16 %v9826_v56  ;;  %vm16423_vm7 = vmmov %vm16372_vm0 }
 0x6ce   : > { %v9000_v6 = vadd.f32 %v8905_v1, %v8743_v10  ;;  %v8744_v8 = vmax.f32 %v8708_v62, 0.0  ;;  %v9793_v1 = vunpack.c.h.bf16 %v9825_v22  ;;  %v9800_v10 = vunpack.c.l.bf16 %v9827_v54  ;;  %vm16424_vm8 = vmmov %vm16372_vm0 }
 0x6cf   : > { %9038 = vst.msk [vmem:[%s15222_s15 + $0x70] sm:$0xff] %vm16397_vm5, %v9002_v45  ;;  %v9003_v27 = vadd.f32 %v8911_v40, %v8746_v61  ;;  %vm16411_vm5 = vmmov %vm16367_vm1 }
 0x6d0   : > { %9036 = vst.msk [vmem:[%s15222_s15 + $0x60] sm:$0xff] %vm16367_vm1, %v9000_v6  ;;  %v9001_v47 = vadd.f32 %v8907_v59, %v8744_v8  ;;  %v10893_v37 = vpop.f32.mrb[16].mxu1  ;;  %v8930_v59 = vrot.slane %v9796_v9, 3  ;;  %v8932_v6 = vrot.slane %v9797_v43, 3  ;;  %v8928_v57 = vrot.slane %v9793_v1, 3 }
 0x6d1   : > { %9039 = vst.msk [vmem:[%s15222_s15 + $0x78] sm:$0xff] %vm16398_vm3, %v9003_v27  ;;  %v8713_v4 = vadd.f32 %v10893_v37, %v15209_v39  ;;  %v8573_v31 = vpop.f32.mrb[17].mxu1  ;;  %v8934_v38 = vrot.slane %v9800_v10, 3  ;;  %vm16412_vm3 = vmmov %vm16367_vm1 }
 0x6d2   : > { %9037 = vst.msk [vmem:[%s15222_s15 + $0x68] sm:$0xff] %vm16399_vm4, %v9001_v47  ;;  %v8711_v36 = vadd.f32 %v15209_v39, %v8573_v31  ;;  %v10894_v19 = vpop.f32.mrb[18].mxu1  ;;  %vm16413_vm4 = vmmov %vm16367_vm1  ;;  %v8929_v51 = vsel %vm16372_vm0, %v8926_v7, %v8928_v57  ;;  %v8931_v58 = vsel %vm16416_vm14, %v8928_v57, %v8930_v59  ;;  %v8803_v7 = vld [vmem:[%s11804_s29 + $0x98] sm:$0x3] }
 0x6d3   : > { %v8749_v34 = vmax.f32 %v8713_v4, 0.0  ;;  %v8714_v63 = vadd.f32 %v10894_v19, %v15209_v39  ;;  %v8576_v15 = vpop.f32.mrb[19].mxu1  ;;  %v8933_v4 = vsel %vm16414_vm12, %v8930_v59, %v8932_v6  ;;  %vm16428_vm12 = vmmov %vm16372_vm0 }
 0x6d4   : > { %v8747_v26 = vmax.f32 %v8711_v36, 0.0  ;;  %v8712_v49 = vadd.f32 %v15209_v39, %v8576_v15  ;;  %v9805_v36 = vunpack.c.h.bf16 %v9828_v17  ;;  %v8935_v15 = vsel %vm16415_vm11, %v8932_v6, %v8934_v38  ;;  %vm16429_vm11 = vmmov %vm16372_vm0 }
 0x6d5   : > { %v9006_v46 = vadd.f32 %v8917_v33, %v8749_v34  ;;  %v8750_v23 = vmax.f32 %v8714_v63, 0.0  ;;  %v9804_v33 = vunpack.c.l.bf16 %v9828_v17  ;;  %vm16430_vm14 = vmmov %vm16372_vm0 }
 0x6d6   : > { %v9004_v60 = vadd.f32 %v8913_v41, %v8747_v26  ;;  %v8748_v5 = vmax.f32 %v8712_v49, 0.0  ;;  %v9801_v41 = vunpack.c.h.bf16 %v9827_v54  ;;  %v9808_v26 = vunpack.c.l.bf16 %v9829_v30 }
 0x6d7   : > { %9042 = vst.msk [vmem:[%s15222_s15 + $0x90] sm:$0xff] %vm16403_vm13, %v9006_v46  ;;  %v9007_v28 = vadd.f32 %v8919_v42, %v8750_v23  ;;  %vm16417_vm13 = vmmov %vm16367_vm1 }
 0x6d8   : > { %9040 = vst.msk [vmem:[%s15222_s15 + $0x80] sm:$0xff] %vm16404_vm10, %v9004_v60  ;;  %v9005_v55 = vadd.f32 %v8915_v29, %v8748_v5  ;;  %v10897_v44 = vpop.f32.mrb[20].mxu1  ;;  %v8938_v29 = vrot.slane %v9804_v33, 3  ;;  %v8940_v60 = vrot.slane %v9805_v36, 3  ;;  %v8936_v12 = vrot.slane %v9801_v41, 3  ;;  %vm16418_vm10 = vmmov %vm16367_vm1 }
 0x6d9   : > { %9043 = vst.msk [vmem:[%s15222_s15 + $0x98] sm:$0xff] %vm16405_vm15, %v9007_v28  ;;  %v8717_v21 = vadd.f32 %v10897_v44, %v15209_v39  ;;  %v8589_v52 = vpop.f32.mrb[21].mxu1  ;;  %v8942_v56 = vrot.slane %v9808_v26, 3  ;;  %vm16419_vm15 = vmmov %vm16367_vm1 }
 0x6da   : > { %9041 = vst.msk [vmem:[%s15222_s15 + $0x88] sm:$0xff] %vm16406_vm6, %v9005_v55  ;;  %v8715_v24 = vadd.f32 %v15209_v39, %v8589_v52  ;;  %v10898_v3 = vpop.f32.mrb[22].mxu1  ;;  %vm16420_vm6 = vmmov %vm16367_vm1  ;;  %v8937_v9 = vsel %vm16422_vm2, %v8934_v38, %v8936_v12  ;;  %v8939_v10 = vsel %vm16424_vm8, %v8936_v12, %v8938_v29 }
 0x6db   : > { %v8753_v35 = vmax.f32 %v8717_v21, 0.0  ;;  %v8718_v20 = vadd.f32 %v10898_v3, %v15209_v39  ;;  %v8592_v53 = vpop.f32.mrb[23].mxu1  ;;  %v8941_v21 = vsel %vm16421_vm9, %v8938_v29, %v8940_v60 }
 0x6dc   : > { %v8751_v25 = vmax.f32 %v8715_v24, 0.0  ;;  %v8716_v2 = vadd.f32 %v15209_v39, %v8592_v53  ;;  %v9813_v24 = vunpack.c.h.bf16 %v9830_v13  ;;  %v8943_v53 = vsel %vm16423_vm7, %v8940_v60, %v8942_v56 }
 0x6dd   : > { %v9010_v40 = vadd.f32 %v8925_v48, %v8753_v35  ;;  %v8754_v62 = vmax.f32 %v8718_v20, 0.0  ;;  %v9812_v48 = vunpack.c.l.bf16 %v9830_v13 }
 0x6de   : > { %v9008_v45 = vadd.f32 %v8921_v11, %v8751_v25  ;;  %v8752_v61 = vmax.f32 %v8716_v2, 0.0  ;;  %v9809_v11 = vunpack.c.h.bf16 %v9829_v30  ;;  %v8840_v25 = vunpack.c.l.bf16 %v8803_v7 }
 0x6df   : > { %9046 = vst.msk [vmem:[%s15222_s15 + $0xb0] sm:$0xff] %vm16411_vm5, %v9010_v40  ;;  %v9011_v8 = vadd.f32 %v8927_v14, %v8754_v62  ;;  %vm16425_vm5 = vmmov %vm16367_vm1 }
 0x6e0   : > { %9044 = vst.msk [vmem:[%s15222_s15 + $0xa0] sm:$0xff] %vm16367_vm1, %v9008_v45  ;;  %v9009_v27 = vadd.f32 %v8923_v0, %v8752_v61  ;;  %v10901_v32 = vpop.f32.mrb[24].mxu1  ;;  %v8946_v0 = vrot.slane %v9812_v48, 3  ;;  %v8948_v45 = vrot.slane %v9813_v24, 3  ;;  %v8944_v59 = vrot.slane %v9809_v11, 3 }
 0x6e1   : > { %9047 = vst.msk [vmem:[%s15222_s15 + $0xb8] sm:$0xff] %vm16412_vm3, %v9011_v8  ;;  %v8721_v47 = vadd.f32 %v10901_v32, %v15209_v39  ;;  %v8605_v37 = vpop.f32.mrb[25].mxu1  ;;  %v8950_v57 = vrot.slane %v8840_v25, 3  ;;  %vm16426_vm3 = vmmov %vm16367_vm1 }
 0x6e2   : > { %9045 = vst.msk [vmem:[%s15222_s15 + $0xa8] sm:$0xff] %vm16413_vm4, %v9009_v27  ;;  %v8719_v31 = vadd.f32 %v15209_v39, %v8605_v37  ;;  %v10902_v22 = vpop.f32.mrb[26].mxu1  ;;  %vm16427_vm4 = vmmov %vm16367_vm1  ;;  %v8949_v32 = vsel %vm16428_vm12, %v8946_v0, %v8948_v45  ;;  %v8945_v30 = vsel %vm16372_vm0, %v8942_v56, %v8944_v59 }
 0x6e3   : > { %v8757_v19 = vmax.f32 %v8721_v47, 0.0  ;;  %v8722_v50 = vadd.f32 %v10902_v22, %v15209_v39  ;;  %v8608_v34 = vpop.f32.mrb[27].mxu1  ;;  %v8951_v33 = vsel %vm16429_vm11, %v8948_v45, %v8950_v57 }
 0x6e4   : > { %v8755_v63 = vmax.f32 %v8719_v31, 0.0  ;;  %v8720_v18 = vadd.f32 %v15209_v39, %v8608_v34 }
 0x6e5   : > { %v9014_v42 = vadd.f32 %v8933_v4, %v8757_v19  ;;  %v8758_v49 = vmax.f32 %v8722_v50, 0.0  ;;  %v8947_v50 = vsel %vm16430_vm14, %v8944_v59, %v8946_v0 }
 0x6e6   : > { %v9012_v46 = vadd.f32 %v8929_v51, %v8755_v63  ;;  %v8756_v23 = vmax.f32 %v8720_v18, 0.0 }
 0x6e7   : > { %9050 = vst.msk [vmem:[%s15222_s15 + $0xd0] sm:$0xff] %vm16417_vm13, %v9014_v42  ;;  %v9015_v5 = vadd.f32 %v8935_v15, %v8758_v49  ;;  %vm16431_vm13 = vmmov %vm16367_vm1 }
 0x6e8   : > { %9048 = vst.msk [vmem:[%s15222_s15 + $0xc0] sm:$0xff] %vm16418_vm10, %v9012_v46  ;;  %v9013_v28 = vadd.f32 %v8931_v58, %v8756_v23  ;;  %v10905_v16 = vpop.f32.mrb[28].mxu1  ;;  %vm16432_vm10 = vmmov %vm16367_vm1 }
 0x6e9   : > { %9051 = vst.msk [vmem:[%s15222_s15 + $0xd8] sm:$0xff] %vm16419_vm15, %v9015_v5  ;;  %v8725_v55 = vadd.f32 %v10905_v16, %v15209_v39  ;;  %v8621_v44 = vpop.f32.mrb[29].mxu1  ;;  %vm16433_vm15 = vmmov %vm16367_vm1 }
 0x6ea   : > { %9049 = vst.msk [vmem:[%s15222_s15 + $0xc8] sm:$0xff] %vm16420_vm6, %v9013_v28  ;;  %v8723_v52 = vadd.f32 %v15209_v39, %v8621_v44  ;;  %v10906_v54 = vpop.f32.mrb[30].mxu1  ;;  %vm16434_vm6 = vmmov %vm16367_vm1 }
 0x6eb   : > { %v8761_v3 = vmax.f32 %v8725_v55, 0.0  ;;  %v8726_v43 = vadd.f32 %v10906_v54, %v15209_v39  ;;  %v8624_v35 = vpop.f32.mrb[31].mxu1 }
 0x6ec   : > { %v8759_v20 = vmax.f32 %v8723_v52, 0.0  ;;  %v8724_v1 = vadd.f32 %v15209_v39, %v8624_v35 }
 0x6ed   : > { %v9018_v14 = vadd.f32 %v8941_v21, %v8761_v3  ;;  %v8762_v2 = vmax.f32 %v8726_v43, 0.0 }
 0x6ee   : > { %v9016_v40 = vadd.f32 %v8937_v9, %v8759_v20  ;;  %v8760_v62 = vmax.f32 %v8724_v1, 0.0 }
 0x6ef   : > { %9054 = vst.msk [vmem:[%s15222_s15 + $0xf0] sm:$0xff] %vm16425_vm5, %v9018_v14  ;;  %v9019_v61 = vadd.f32 %v8943_v53, %v8762_v2 }
 0x6f0   : > { %9052 = vst.msk [vmem:[%s15222_s15 + $0xe0] sm:$0xff] %vm16367_vm1, %v9016_v40  ;;  %v9017_v6 = vadd.f32 %v8939_v10, %v8760_v62  ;;  %v10909_v8 = vpop.f32.mrb[32].mxu1 }
 0x6f1   : > { %9055 = vst.msk [vmem:[%s15222_s15 + $0xf8] sm:$0xff] %vm16426_vm3, %v9019_v61  ;;  %v8729_v17 = vadd.f32 %v10909_v8, %v15209_v39  ;;  %v8637_v27 = vpop.f32.mrb[33].mxu1 }
 0x6f2   : > { %9053 = vst.msk [vmem:[%s15222_s15 + $0xe8] sm:$0xff] %vm16427_vm4, %v9017_v6  ;;  %v8727_v38 = vadd.f32 %v15209_v39, %v8637_v27  ;;  %v10910_v47 = vpop.f32.mrb[34].mxu1 }
 0x6f3   : > { %v8765_v37 = vmax.f32 %v8729_v17, 0.0  ;;  %v8730_v4 = vadd.f32 %v10910_v47, %v15209_v39  ;;  %v8640_v31 = vpop.f32.mrb[35].mxu1 }
 0x6f4   : > { %v8763_v22 = vmax.f32 %v8727_v38, 0.0  ;;  %v8728_v36 = vadd.f32 %v15209_v39, %v8640_v31 }
 0x6f5   : > { %v9022_v19 = vadd.f32 %v8949_v32, %v8765_v37  ;;  %v8766_v51 = vmax.f32 %v8730_v4, 0.0 }
 0x6f6   : > { %v9020_v34 = vadd.f32 %v8945_v30, %v8763_v22  ;;  %v8764_v41 = vmax.f32 %v8728_v36, 0.0 }
 0x6f7   : > { %9058 = vst.msk [vmem:[%s15222_s15 + $0x110] sm:$0xff] %vm16431_vm13, %v9022_v19  ;;  %v9023_v63 = vadd.f32 %v8951_v33, %v8766_v51 }
 0x6f8   : > { %9056 = vst.msk [vmem:[%s15222_s15 + $0x100] sm:$0xff] %vm16432_vm10, %v9020_v34  ;;  %v9021_v15 = vadd.f32 %v8947_v50, %v8764_v41 }
 0x6f9   : > { %9059 = vst.msk [vmem:[%s15222_s15 + $0x118] sm:$0xff] %vm16433_vm15, %v9023_v63 }
 0x6fa   : > { %9057 = vst.msk [vmem:[%s15222_s15 + $0x108] sm:$0xff] %vm16434_vm6, %v9021_v15 }
 0x6fb PF: > { %s15_s18 = sadd.s32 1, %s11748_s18  }
 0x6fc   : > { %p12_p4 = scmp.ge.s32.totalorder %s15_s18, 4  }
 0x6fe   :  { %14 = sbr.rel (!%p12_p4) target bundleno = 1 (0x1), region = 86 }

</bundles_post_ra>
